<compile_context>
chip_gen: v7x
topology: tpu7x:2x2x1
jax: 0.10.0
libtpu: 0.0.40
codegen_flags: <defaults>
</compile_context>

<pallas_src>
import functools

import numpy as np
import jax
import jax.numpy as jnp
from jax import lax
from jax.experimental import pallas as pl
from jax.experimental.pallas import tpu as pltpu

KERNELS = (1, 3, 5, 7)


def _sk_attention_kernel(x_ref, masks_ref, convw_ref, convb_ref, lw_ref, lb_ref,
                         v_ref, attn_ref, *, H, W, C, K, F, pmax, Bblk):
    """One grid step processes Bblk batch images. Layout: channels on sublanes,
    (image, flattened H*W) folded together on lanes."""
    HW = H * W
    BHW = Bblk * HW

    # Fold the Bblk images into the lane dimension: (C, Bblk*HW) f32.
    if Bblk == 1:
        x = x_ref[0]
    else:
        x = jnp.concatenate([x_ref[b] for b in range(Bblk)], axis=-1)

    # im2col patch for ALL taps of ALL branches: one roll + one (pre-broadcast,
    # pre-tiled) mask multiply per tap, ONE sublane concat, ONE cast to bf16.
    pieces = []
    for dy in range(F):
        oy = dy - pmax
        for dx in range(F):
            ox = dx - pmax
            s = oy * W + ox                         # flattened input offset of this tap
            if s == 0:
                xs = x                              # center tap: always valid
            else:
                # rolled[q] = x[(q + s) mod BHW]; taps that crossed a row / image
                # boundary (incl. the cross-image wrap) are zeroed by the mask.
                xs = pltpu.roll(x, shift=(-s) % BHW, axis=1) * masks_ref[dy * F + dx]
            pieces.append(xs)
    patch = jnp.concatenate(pieces, axis=0).astype(jnp.bfloat16)   # (F*F*C, BHW)

    # All K conv branches in a single 196-deep MXU contraction; folded BN + ReLU.
    conv = jnp.dot(convw_ref[...], patch, preferred_element_type=jnp.float32)
    feats = jnp.maximum(conv + convb_ref[...], 0.0)                # (K*C, BHW) f32

    # U = sum over branches.
    U = feats[0:C]
    for k in range(1, K):
        U = U + feats[k * C:(k + 1) * C]

    # Per image: global average pool (static 128-multiple lane slices), composed
    # fc∘fcs logits, softmax over the K branch groups (groups of C sublanes).
    attn_list = []
    for b in range(Bblk):
        S = jnp.sum(U[:, b * HW:(b + 1) * HW], axis=1, keepdims=True) * (1.0 / HW)
        logits = jnp.dot(lw_ref[...], S,
                         preferred_element_type=jnp.float32) + lb_ref[...]   # (K*C, 1)
        groups = [logits[k * C:(k + 1) * C] for k in range(K)]
        m = groups[0]
        for g in groups[1:]:
            m = jnp.maximum(m, g)
        es = [jnp.exp(g - m) for g in groups]
        den = es[0]
        for e in es[1:]:
            den = den + e
        inv = 1.0 / den
        attn_list.append(jnp.concatenate([e * inv for e in es], axis=0))     # (K*C, 1)

    # Lane-broadcast each image's attention over that image's HW lanes.
    if Bblk == 1:
        attn_lane = jnp.broadcast_to(attn_list[0], (K * C, HW))
    else:
        attn_lane = jnp.concatenate(
            [jnp.broadcast_to(a, (K * C, HW)) for a in attn_list], axis=1)   # (K*C, BHW)

    # V = sum_k attn_k * feats_k ; lane-dense (C, HW) stores == NCHW.
    V = attn_lane[0:C] * feats[0:C]
    for k in range(1, K):
        V = V + attn_lane[k * C:(k + 1) * C] * feats[k * C:(k + 1) * C]
    for b in range(Bblk):
        v_ref[b] = V[:, b * HW:(b + 1) * HW]

    # Lane-broadcast the tiny attention vectors -> full-vreg (unmasked) store.
    if Bblk == 1:
        attn_ref[0] = jnp.broadcast_to(attn_list[0], (K * C, 128))
    else:
        attn_ref[0] = jnp.concatenate(
            [jnp.broadcast_to(a, (K * C, 128)) for a in attn_list], axis=1)


def sk_attention_forward(x_nchw, params):
    """NCHW in -> (V in NCHW, attention weights (K, bs, C, 1, 1))."""
    bs, C, H, W = x_nchw.shape
    K = len(KERNELS)
    kmax = max(KERNELS)
    pmax = kmax // 2
    F = 2 * pmax + 1
    HW = H * W
    d = params['fc_w'].shape[0]

    # Fold pairs of images into one grid step (lane dimension) when possible.
    Bblk = 2 if bs % 2 == 0 else 1
    n_blocks = bs // Bblk

    # NCHW kept end-to-end: collapsing (H, W) -> H*W is a free reshape
    # (no transpose pass, no jnp.pad pass over HBM).
    x_flat = x_nchw.reshape(bs, C, HW)

    # Branch-stacked conv weights over a unified F x F tap frame (bf16 MXU operand):
    #   convw[b*C + co, (dy*F + dx)*C + ci] = folded W_b[co, ci, tap (dy, dx)]
    convw = jnp.zeros((K * C, F * F * C), jnp.float32)
    convb = []
    for bidx, k in enumerate(KERNELS):
        w = params[f'conv{k}_w']                            # (k, k, Cin, Cout), BN folded
        off = pmax - k // 2
        w_t = jnp.transpose(w, (3, 0, 1, 2))                # (Cout, k, k, Cin)
        for i in range(k):
            dy = off + i
            convw = convw.at[bidx * C:(bidx + 1) * C,
                             (dy * F + off) * C:(dy * F + off + k) * C].set(
                                 w_t[:, i].reshape(C, k * C))
        convb.append(params[f'conv{k}_b'])
    convw = convw.astype(jnp.bfloat16)
    convb = jnp.concatenate(convb, axis=0).reshape(K * C, 1)

    # fc ∘ fcs composed offline (exact: no activation between them in the module).
    fcs_w = params['fcs_w'].reshape(K * C, d)
    fcs_b = params['fcs_b'].reshape(K * C, 1)
    logits_w = fcs_w @ params['fc_w']                                   # (K*C, C)
    logits_b = fcs_w @ params['fc_b'].reshape(d, 1) + fcs_b             # (K*C, 1)

    # Per-tap validity masks, pre-broadcast to C sublanes and pre-tiled per image so
    # the in-kernel lane roll's cross-image wraparound is zeroed too.
    yy, xx = np.meshgrid(np.arange(H), np.arange(W), indexing='ij')
    yy = yy.reshape(-1)
    xx = xx.reshape(-1)
    masks = np.zeros((F * F, HW), np.float32)
    for dy in range(F):
        for dx in range(F):
            oy, ox = dy - pmax, dx - pmax
            valid = ((yy + oy >= 0) & (yy + oy < H) &
                     (xx + ox >= 0) & (xx + ox < W))
            masks[dy * F + dx] = valid.astype(np.float32)
    masks = np.tile(np.broadcast_to(masks[:, None, :], (F * F, C, HW)), (1, 1, Bblk))
    masks = jnp.asarray(masks)                                          # (F*F, C, Bblk*HW)

    kernel = functools.partial(_sk_attention_kernel,
                               H=H, W=W, C=C, K=K, F=F, pmax=pmax, Bblk=Bblk)

    # TODO(synk): at production shapes (e.g. C=512, H=W=56) the branch-stacked im2col
    # weight no longer fits VMEM (esp. v7x's 64 MiB): tile the K*C output channels and
    # H*W (with a kmax-1 halo) over extra grid axes and stream weight slices via
    # memory_space=pl.ANY + pltpu.make_async_copy.
    V, attn = pl.pallas_call(
        kernel,
        out_shape=(jax.ShapeDtypeStruct((bs, C, HW), jnp.float32),
                   jax.ShapeDtypeStruct((n_blocks, K * C, Bblk * 128), jnp.float32)),
        grid=(n_blocks,),
        in_specs=[
            pl.BlockSpec((Bblk, C, HW), lambda b: (b, 0, 0)),
            pl.BlockSpec(masks.shape, lambda b: (0, 0, 0)),
            pl.BlockSpec(convw.shape, lambda b: (0, 0)),
            pl.BlockSpec(convb.shape, lambda b: (0, 0)),
            pl.BlockSpec(logits_w.shape, lambda b: (0, 0)),
            pl.BlockSpec(logits_b.shape, lambda b: (0, 0)),
        ],
        out_specs=(pl.BlockSpec((Bblk, C, HW), lambda b: (b, 0, 0)),
                   pl.BlockSpec((1, K * C, Bblk * 128), lambda b: (b, 0, 0))),
        compiler_params=pltpu.CompilerParams(
            dimension_semantics=("parallel",)),   # batch blocks independent (v7x 2 TCs)
    )(x_flat, masks, convw, convb, logits_w, logits_b)

    V_nchw = V.reshape(bs, C, H, W)               # already NCHW: pure reshape, no transpose
    attn_cols = attn[:, :, ::128]                                       # (n_blocks, K*C, Bblk)
    attn_out = attn_cols.reshape(n_blocks, K, C, Bblk)
    attn_out = jnp.transpose(attn_out, (1, 0, 3, 2)).reshape(K, bs, C)[..., None, None]
    return V_nchw, attn_out


def init_params(key, C, d):
    """Deterministic synthetic parameters; BN (inference mode) folded into the convs.
    Conv weights are rounded through bf16 so the in-kernel bf16 MXU operands match
    the f32 reference on the weight side."""
    params = {}
    keys = iter(jax.random.split(key, 64))
    eps = 1e-5
    for k in KERNELS:
        w = jax.random.normal(next(keys), (C, C, k, k), jnp.float32) / np.sqrt(C * k * k)
        b = 0.1 * jax.random.normal(next(keys), (C,), jnp.float32)
        gamma = 1.0 + 0.1 * jax.random.normal(next(keys), (C,), jnp.float32)
        beta = 0.1 * jax.random.normal(next(keys), (C,), jnp.float32)
        rmean = 0.1 * jax.random.normal(next(keys), (C,), jnp.float32)
        rvar = jnp.abs(jax.random.normal(next(keys), (C,), jnp.float32)) + 1.0
        s = gamma / jnp.sqrt(rvar + eps)
        w_hwio = jnp.transpose(w, (2, 3, 1, 0)) * s[None, None, None, :]  # (k, k, Cin, Cout)
        w_hwio = w_hwio.astype(jnp.bfloat16).astype(jnp.float32)
        params[f'conv{k}_w'] = w_hwio
        params[f'conv{k}_b'] = s * (b - rmean) + beta                     # (C,)
    params['fc_w'] = jax.random.normal(next(keys), (d, C), jnp.float32) / np.sqrt(C)
    params['fc_b'] = 0.1 * jax.random.normal(next(keys), (d,), jnp.float32)
    fcs_w, fcs_b = [], []
    for _ in KERNELS:
        fcs_w.append(jax.random.normal(next(keys), (C, d), jnp.float32) / np.sqrt(d))
        fcs_b.append(0.1 * jax.random.normal(next(keys), (C,), jnp.float32))
    params['fcs_w'] = jnp.stack(fcs_w)                                    # (K, C, d)
    params['fcs_b'] = jnp.stack(fcs_b)                                    # (K, C)
    return params


def sk_attention_reference(x_nchw, params):
    """Pure-JAX reference with identical (BN-folded) parameters."""
    bs, C, H, W = x_nchw.shape
    x = jnp.transpose(x_nchw, (0, 2, 3, 1))
    feats = []
    for k in KERNELS:
        pad = k // 2
        out = lax.conv_general_dilated(
            x, params[f'conv{k}_w'], (1, 1), ((pad, pad), (pad, pad)),
            dimension_numbers=('NHWC', 'HWIO', 'NHWC'))
        out = jnp.maximum(out + params[f'conv{k}_b'][None, None, None, :], 0.0)
        feats.append(out)
    feats = jnp.stack(feats, 0)                                           # (K, bs, H, W, C)
    U = feats.sum(0)
    S = U.mean(axis=(1, 2))                                               # (bs, C)
    Z = S @ params['fc_w'].T + params['fc_b']                             # (bs, d)
    logits = jnp.einsum('bd,kcd->kbc', Z, params['fcs_w']) + params['fcs_b'][:, None, :]
    attn = jax.nn.softmax(logits, axis=0)                                 # (K, bs, C)
    V = (attn[:, :, None, None, :] * feats).sum(0)                        # (bs, H, W, C)
    return jnp.transpose(V, (0, 3, 1, 2)), attn[..., None, None]


if __name__ == "__main__":
    key = jax.random.PRNGKey(0)
    kx, kp = jax.random.split(key)

    bs, C, H, W = 2, 4, 16, 16
    reduction, L = 16, 32
    d = max(L, C // reduction)

    x = jax.random.normal(kx, (bs, C, H, W), jnp.float32)
    params = init_params(kp, C, d)

    V, attn = sk_attention_forward(x, params)
    V = jax.block_until_ready(V)
    attn = jax.block_until_ready(attn)

    V_r, attn_r = sk_attention_reference(x, params)
    # bf16 MXU operands (activation side) -> slightly looser tolerance than pure f32.
    np.testing.assert_allclose(np.asarray(V), np.asarray(V_r), rtol=2e-2, atol=2e-2)
    np.testing.assert_allclose(np.asarray(attn), np.asarray(attn_r), rtol=2e-2, atol=2e-2)

    print("KERNEL_OK")
</pallas_src>

<mosaic_0001>
module attributes {stable_mosaic.version = 11 : i64} {
  func.func @_sk_attention_kernel(%arg0: i32, %arg1: memref<2x4x256xf32, #tpu.memory_space<vmem>>, %arg2: memref<49x4x512xf32, #tpu.memory_space<vmem>>, %arg3: memref<16x196xbf16, #tpu.memory_space<vmem>>, %arg4: memref<16x1xf32, #tpu.memory_space<vmem>>, %arg5: memref<16x4xf32, #tpu.memory_space<vmem>>, %arg6: memref<16x1xf32, #tpu.memory_space<vmem>>, %arg7: memref<2x4x256xf32, #tpu.memory_space<vmem>>, %arg8: memref<1x16x256xf32, #tpu.memory_space<vmem>>) attributes {dimension_semantics = [#tpu.dimension_semantics<parallel>], iteration_bounds = array<i64: 1>, scalar_prefetch = 0 : i64, scratch_operands = 0 : i64, tpu.core_type = #tpu.core_type<tc>, window_params = [{transform_indices = @transform_0, window_bounds = array<i64: 2, 4, 256>}, {pipeline_mode = #tpu.pipeline_mode<synchronous>, transform_indices = @transform_1, window_bounds = array<i64: 49, 4, 512>}, {pipeline_mode = #tpu.pipeline_mode<synchronous>, transform_indices = @transform_2, window_bounds = array<i64: 16, 196>}, {pipeline_mode = #tpu.pipeline_mode<synchronous>, transform_indices = @transform_3, window_bounds = array<i64: 16, 1>}, {pipeline_mode = #tpu.pipeline_mode<synchronous>, transform_indices = @transform_4, window_bounds = array<i64: 16, 4>}, {pipeline_mode = #tpu.pipeline_mode<synchronous>, transform_indices = @transform_5, window_bounds = array<i64: 16, 1>}, {transform_indices = @transform_6, window_bounds = array<i64: 2, 4, 256>}, {transform_indices = @transform_7, window_bounds = array<i64: 1, 16, 256>}]} {
    %c0 = arith.constant 0 : index
    %c0_0 = arith.constant 0 : index
    %c0_1 = arith.constant 0 : index
    %0 = vector.load %arg1[%c0, %c0_0, %c0_1] : memref<2x4x256xf32, #tpu.memory_space<vmem>>, vector<1x4x256xf32>
    %1 = vector.shape_cast %0 : vector<1x4x256xf32> to vector<4x256xf32>
    %c1 = arith.constant 1 : index
    %c0_2 = arith.constant 0 : index
    %c0_3 = arith.constant 0 : index
    %2 = vector.load %arg1[%c1, %c0_2, %c0_3] : memref<2x4x256xf32, #tpu.memory_space<vmem>>, vector<1x4x256xf32>
    %3 = vector.shape_cast %2 : vector<1x4x256xf32> to vector<4x256xf32>
    %4 = tpu.concatenate %1, %3 in 1 : vector<4x256xf32>, vector<4x256xf32> -> vector<4x512xf32>
    %c51_i32 = arith.constant 51 : i32
    %5 = tpu.dynamic_rotate %4 by %c51_i32 dim 1 : vector<4x512xf32>, i32 -> vector<4x512xf32>
    %c0_4 = arith.constant 0 : index
    %c0_5 = arith.constant 0 : index
    %c0_6 = arith.constant 0 : index
    %6 = vector.load %arg2[%c0_4, %c0_5, %c0_6] : memref<49x4x512xf32, #tpu.memory_space<vmem>>, vector<1x4x512xf32>
    %7 = vector.shape_cast %6 : vector<1x4x512xf32> to vector<4x512xf32>
    %8 = arith.mulf %5, %7 : vector<4x512xf32>
    %c50_i32 = arith.constant 50 : i32
    %9 = tpu.dynamic_rotate %4 by %c50_i32 dim 1 : vector<4x512xf32>, i32 -> vector<4x512xf32>
    %c1_7 = arith.constant 1 : index
    %c0_8 = arith.constant 0 : index
    %c0_9 = arith.constant 0 : index
    %10 = vector.load %arg2[%c1_7, %c0_8, %c0_9] : memref<49x4x512xf32, #tpu.memory_space<vmem>>, vector<1x4x512xf32>
    %11 = vector.shape_cast %10 : vector<1x4x512xf32> to vector<4x512xf32>
    %12 = arith.mulf %9, %11 : vector<4x512xf32>
    %c49_i32 = arith.constant 49 : i32
    %13 = tpu.dynamic_rotate %4 by %c49_i32 dim 1 : vector<4x512xf32>, i32 -> vector<4x512xf32>
    %c2 = arith.constant 2 : index
    %c0_10 = arith.constant 0 : index
    %c0_11 = arith.constant 0 : index
    %14 = vector.load %arg2[%c2, %c0_10, %c0_11] : memref<49x4x512xf32, #tpu.memory_space<vmem>>, vector<1x4x512xf32>
    %15 = vector.shape_cast %14 : vector<1x4x512xf32> to vector<4x512xf32>
    %16 = arith.mulf %13, %15 : vector<4x512xf32>
    %c48_i32 = arith.constant 48 : i32
    %17 = tpu.dynamic_rotate %4 by %c48_i32 dim 1 : vector<4x512xf32>, i32 -> vector<4x512xf32>
    %c3 = arith.constant 3 : index
    %c0_12 = arith.constant 0 : index
    %c0_13 = arith.constant 0 : index
    %18 = vector.load %arg2[%c3, %c0_12, %c0_13] : memref<49x4x512xf32, #tpu.memory_space<vmem>>, vector<1x4x512xf32>
    %19 = vector.shape_cast %18 : vector<1x4x512xf32> to vector<4x512xf32>
    %20 = arith.mulf %17, %19 : vector<4x512xf32>
    %c47_i32 = arith.constant 47 : i32
    %21 = tpu.dynamic_rotate %4 by %c47_i32 dim 1 : vector<4x512xf32>, i32 -> vector<4x512xf32>
    %c4 = arith.constant 4 : index
    %c0_14 = arith.constant 0 : index
    %c0_15 = arith.constant 0 : index
    %22 = vector.load %arg2[%c4, %c0_14, %c0_15] : memref<49x4x512xf32, #tpu.memory_space<vmem>>, vector<1x4x512xf32>
    %23 = vector.shape_cast %22 : vector<1x4x512xf32> to vector<4x512xf32>
    %24 = arith.mulf %21, %23 : vector<4x512xf32>
    %c46_i32 = arith.constant 46 : i32
    %25 = tpu.dynamic_rotate %4 by %c46_i32 dim 1 : vector<4x512xf32>, i32 -> vector<4x512xf32>
    %c5 = arith.constant 5 : index
    %c0_16 = arith.constant 0 : index
    %c0_17 = arith.constant 0 : index
    %26 = vector.load %arg2[%c5, %c0_16, %c0_17] : memref<49x4x512xf32, #tpu.memory_space<vmem>>, vector<1x4x512xf32>
    %27 = vector.shape_cast %26 : vector<1x4x512xf32> to vector<4x512xf32>
    %28 = arith.mulf %25, %27 : vector<4x512xf32>
    %c45_i32 = arith.constant 45 : i32
    %29 = tpu.dynamic_rotate %4 by %c45_i32 dim 1 : vector<4x512xf32>, i32 -> vector<4x512xf32>
    %c6 = arith.constant 6 : index
    %c0_18 = arith.constant 0 : index
    %c0_19 = arith.constant 0 : index
    %30 = vector.load %arg2[%c6, %c0_18, %c0_19] : memref<49x4x512xf32, #tpu.memory_space<vmem>>, vector<1x4x512xf32>
    %31 = vector.shape_cast %30 : vector<1x4x512xf32> to vector<4x512xf32>
    %32 = arith.mulf %29, %31 : vector<4x512xf32>
    %c35_i32 = arith.constant 35 : i32
    %33 = tpu.dynamic_rotate %4 by %c35_i32 dim 1 : vector<4x512xf32>, i32 -> vector<4x512xf32>
    %c7 = arith.constant 7 : index
    %c0_20 = arith.constant 0 : index
    %c0_21 = arith.constant 0 : index
    %34 = vector.load %arg2[%c7, %c0_20, %c0_21] : memref<49x4x512xf32, #tpu.memory_space<vmem>>, vector<1x4x512xf32>
    %35 = vector.shape_cast %34 : vector<1x4x512xf32> to vector<4x512xf32>
    %36 = arith.mulf %33, %35 : vector<4x512xf32>
    %c34_i32 = arith.constant 34 : i32
    %37 = tpu.dynamic_rotate %4 by %c34_i32 dim 1 : vector<4x512xf32>, i32 -> vector<4x512xf32>
    %c8 = arith.constant 8 : index
    %c0_22 = arith.constant 0 : index
    %c0_23 = arith.constant 0 : index
    %38 = vector.load %arg2[%c8, %c0_22, %c0_23] : memref<49x4x512xf32, #tpu.memory_space<vmem>>, vector<1x4x512xf32>
    %39 = vector.shape_cast %38 : vector<1x4x512xf32> to vector<4x512xf32>
    %40 = arith.mulf %37, %39 : vector<4x512xf32>
    %c33_i32 = arith.constant 33 : i32
    %41 = tpu.dynamic_rotate %4 by %c33_i32 dim 1 : vector<4x512xf32>, i32 -> vector<4x512xf32>
    %c9 = arith.constant 9 : index
    %c0_24 = arith.constant 0 : index
    %c0_25 = arith.constant 0 : index
    %42 = vector.load %arg2[%c9, %c0_24, %c0_25] : memref<49x4x512xf32, #tpu.memory_space<vmem>>, vector<1x4x512xf32>
    %43 = vector.shape_cast %42 : vector<1x4x512xf32> to vector<4x512xf32>
    %44 = arith.mulf %41, %43 : vector<4x512xf32>
    %c32_i32 = arith.constant 32 : i32
    %45 = tpu.dynamic_rotate %4 by %c32_i32 dim 1 : vector<4x512xf32>, i32 -> vector<4x512xf32>
    %c10 = arith.constant 10 : index
    %c0_26 = arith.constant 0 : index
    %c0_27 = arith.constant 0 : index
    %46 = vector.load %arg2[%c10, %c0_26, %c0_27] : memref<49x4x512xf32, #tpu.memory_space<vmem>>, vector<1x4x512xf32>
    %47 = vector.shape_cast %46 : vector<1x4x512xf32> to vector<4x512xf32>
    %48 = arith.mulf %45, %47 : vector<4x512xf32>
    %c31_i32 = arith.constant 31 : i32
    %49 = tpu.dynamic_rotate %4 by %c31_i32 dim 1 : vector<4x512xf32>, i32 -> vector<4x512xf32>
    %c11 = arith.constant 11 : index
    %c0_28 = arith.constant 0 : index
    %c0_29 = arith.constant 0 : index
    %50 = vector.load %arg2[%c11, %c0_28, %c0_29] : memref<49x4x512xf32, #tpu.memory_space<vmem>>, vector<1x4x512xf32>
    %51 = vector.shape_cast %50 : vector<1x4x512xf32> to vector<4x512xf32>
    %52 = arith.mulf %49, %51 : vector<4x512xf32>
    %c30_i32 = arith.constant 30 : i32
    %53 = tpu.dynamic_rotate %4 by %c30_i32 dim 1 : vector<4x512xf32>, i32 -> vector<4x512xf32>
    %c12 = arith.constant 12 : index
    %c0_30 = arith.constant 0 : index
    %c0_31 = arith.constant 0 : index
    %54 = vector.load %arg2[%c12, %c0_30, %c0_31] : memref<49x4x512xf32, #tpu.memory_space<vmem>>, vector<1x4x512xf32>
    %55 = vector.shape_cast %54 : vector<1x4x512xf32> to vector<4x512xf32>
    %56 = arith.mulf %53, %55 : vector<4x512xf32>
    %c29_i32 = arith.constant 29 : i32
    %57 = tpu.dynamic_rotate %4 by %c29_i32 dim 1 : vector<4x512xf32>, i32 -> vector<4x512xf32>
    %c13 = arith.constant 13 : index
    %c0_32 = arith.constant 0 : index
    %c0_33 = arith.constant 0 : index
    %58 = vector.load %arg2[%c13, %c0_32, %c0_33] : memref<49x4x512xf32, #tpu.memory_space<vmem>>, vector<1x4x512xf32>
    %59 = vector.shape_cast %58 : vector<1x4x512xf32> to vector<4x512xf32>
    %60 = arith.mulf %57, %59 : vector<4x512xf32>
    %c19_i32 = arith.constant 19 : i32
    %61 = tpu.dynamic_rotate %4 by %c19_i32 dim 1 : vector<4x512xf32>, i32 -> vector<4x512xf32>
    %c14 = arith.constant 14 : index
    %c0_34 = arith.constant 0 : index
    %c0_35 = arith.constant 0 : index
    %62 = vector.load %arg2[%c14, %c0_34, %c0_35] : memref<49x4x512xf32, #tpu.memory_space<vmem>>, vector<1x4x512xf32>
    %63 = vector.shape_cast %62 : vector<1x4x512xf32> to vector<4x512xf32>
    %64 = arith.mulf %61, %63 : vector<4x512xf32>
    %c18_i32 = arith.constant 18 : i32
    %65 = tpu.dynamic_rotate %4 by %c18_i32 dim 1 : vector<4x512xf32>, i32 -> vector<4x512xf32>
    %c15 = arith.constant 15 : index
    %c0_36 = arith.constant 0 : index
    %c0_37 = arith.constant 0 : index
    %66 = vector.load %arg2[%c15, %c0_36, %c0_37] : memref<49x4x512xf32, #tpu.memory_space<vmem>>, vector<1x4x512xf32>
    %67 = vector.shape_cast %66 : vector<1x4x512xf32> to vector<4x512xf32>
    %68 = arith.mulf %65, %67 : vector<4x512xf32>
    %c17_i32 = arith.constant 17 : i32
    %69 = tpu.dynamic_rotate %4 by %c17_i32 dim 1 : vector<4x512xf32>, i32 -> vector<4x512xf32>
    %c16 = arith.constant 16 : index
    %c0_38 = arith.constant 0 : index
    %c0_39 = arith.constant 0 : index
    %70 = vector.load %arg2[%c16, %c0_38, %c0_39] : memref<49x4x512xf32, #tpu.memory_space<vmem>>, vector<1x4x512xf32>
    %71 = vector.shape_cast %70 : vector<1x4x512xf32> to vector<4x512xf32>
    %72 = arith.mulf %69, %71 : vector<4x512xf32>
    %c16_i32 = arith.constant 16 : i32
    %73 = tpu.dynamic_rotate %4 by %c16_i32 dim 1 : vector<4x512xf32>, i32 -> vector<4x512xf32>
    %c17 = arith.constant 17 : index
    %c0_40 = arith.constant 0 : index
    %c0_41 = arith.constant 0 : index
    %74 = vector.load %arg2[%c17, %c0_40, %c0_41] : memref<49x4x512xf32, #tpu.memory_space<vmem>>, vector<1x4x512xf32>
    %75 = vector.shape_cast %74 : vector<1x4x512xf32> to vector<4x512xf32>
    %76 = arith.mulf %73, %75 : vector<4x512xf32>
    %c15_i32 = arith.constant 15 : i32
    %77 = tpu.dynamic_rotate %4 by %c15_i32 dim 1 : vector<4x512xf32>, i32 -> vector<4x512xf32>
    %c18 = arith.constant 18 : index
    %c0_42 = arith.constant 0 : index
    %c0_43 = arith.constant 0 : index
    %78 = vector.load %arg2[%c18, %c0_42, %c0_43] : memref<49x4x512xf32, #tpu.memory_space<vmem>>, vector<1x4x512xf32>
    %79 = vector.shape_cast %78 : vector<1x4x512xf32> to vector<4x512xf32>
    %80 = arith.mulf %77, %79 : vector<4x512xf32>
    %c14_i32 = arith.constant 14 : i32
    %81 = tpu.dynamic_rotate %4 by %c14_i32 dim 1 : vector<4x512xf32>, i32 -> vector<4x512xf32>
    %c19 = arith.constant 19 : index
    %c0_44 = arith.constant 0 : index
    %c0_45 = arith.constant 0 : index
    %82 = vector.load %arg2[%c19, %c0_44, %c0_45] : memref<49x4x512xf32, #tpu.memory_space<vmem>>, vector<1x4x512xf32>
    %83 = vector.shape_cast %82 : vector<1x4x512xf32> to vector<4x512xf32>
    %84 = arith.mulf %81, %83 : vector<4x512xf32>
    %c13_i32 = arith.constant 13 : i32
    %85 = tpu.dynamic_rotate %4 by %c13_i32 dim 1 : vector<4x512xf32>, i32 -> vector<4x512xf32>
    %c20 = arith.constant 20 : index
    %c0_46 = arith.constant 0 : index
    %c0_47 = arith.constant 0 : index
    %86 = vector.load %arg2[%c20, %c0_46, %c0_47] : memref<49x4x512xf32, #tpu.memory_space<vmem>>, vector<1x4x512xf32>
    %87 = vector.shape_cast %86 : vector<1x4x512xf32> to vector<4x512xf32>
    %88 = arith.mulf %85, %87 : vector<4x512xf32>
    %c3_i32 = arith.constant 3 : i32
    %89 = tpu.dynamic_rotate %4 by %c3_i32 dim 1 : vector<4x512xf32>, i32 -> vector<4x512xf32>
    %c21 = arith.constant 21 : index
    %c0_48 = arith.constant 0 : index
    %c0_49 = arith.constant 0 : index
    %90 = vector.load %arg2[%c21, %c0_48, %c0_49] : memref<49x4x512xf32, #tpu.memory_space<vmem>>, vector<1x4x512xf32>
    %91 = vector.shape_cast %90 : vector<1x4x512xf32> to vector<4x512xf32>
    %92 = arith.mulf %89, %91 : vector<4x512xf32>
    %c2_i32 = arith.constant 2 : i32
    %93 = tpu.dynamic_rotate %4 by %c2_i32 dim 1 : vector<4x512xf32>, i32 -> vector<4x512xf32>
    %c22 = arith.constant 22 : index
    %c0_50 = arith.constant 0 : index
    %c0_51 = arith.constant 0 : index
    %94 = vector.load %arg2[%c22, %c0_50, %c0_51] : memref<49x4x512xf32, #tpu.memory_space<vmem>>, vector<1x4x512xf32>
    %95 = vector.shape_cast %94 : vector<1x4x512xf32> to vector<4x512xf32>
    %96 = arith.mulf %93, %95 : vector<4x512xf32>
    %c1_i32 = arith.constant 1 : i32
    %97 = tpu.dynamic_rotate %4 by %c1_i32 dim 1 : vector<4x512xf32>, i32 -> vector<4x512xf32>
    %c23 = arith.constant 23 : index
    %c0_52 = arith.constant 0 : index
    %c0_53 = arith.constant 0 : index
    %98 = vector.load %arg2[%c23, %c0_52, %c0_53] : memref<49x4x512xf32, #tpu.memory_space<vmem>>, vector<1x4x512xf32>
    %99 = vector.shape_cast %98 : vector<1x4x512xf32> to vector<4x512xf32>
    %100 = arith.mulf %97, %99 : vector<4x512xf32>
    %c511_i32 = arith.constant 511 : i32
    %101 = tpu.dynamic_rotate %4 by %c511_i32 dim 1 : vector<4x512xf32>, i32 -> vector<4x512xf32>
    %c25 = arith.constant 25 : index
    %c0_54 = arith.constant 0 : index
    %c0_55 = arith.constant 0 : index
    %102 = vector.load %arg2[%c25, %c0_54, %c0_55] : memref<49x4x512xf32, #tpu.memory_space<vmem>>, vector<1x4x512xf32>
    %103 = vector.shape_cast %102 : vector<1x4x512xf32> to vector<4x512xf32>
    %104 = arith.mulf %101, %103 : vector<4x512xf32>
    %c510_i32 = arith.constant 510 : i32
    %105 = tpu.dynamic_rotate %4 by %c510_i32 dim 1 : vector<4x512xf32>, i32 -> vector<4x512xf32>
    %c26 = arith.constant 26 : index
    %c0_56 = arith.constant 0 : index
    %c0_57 = arith.constant 0 : index
    %106 = vector.load %arg2[%c26, %c0_56, %c0_57] : memref<49x4x512xf32, #tpu.memory_space<vmem>>, vector<1x4x512xf32>
    %107 = vector.shape_cast %106 : vector<1x4x512xf32> to vector<4x512xf32>
    %108 = arith.mulf %105, %107 : vector<4x512xf32>
    %c509_i32 = arith.constant 509 : i32
    %109 = tpu.dynamic_rotate %4 by %c509_i32 dim 1 : vector<4x512xf32>, i32 -> vector<4x512xf32>
    %c27 = arith.constant 27 : index
    %c0_58 = arith.constant 0 : index
    %c0_59 = arith.constant 0 : index
    %110 = vector.load %arg2[%c27, %c0_58, %c0_59] : memref<49x4x512xf32, #tpu.memory_space<vmem>>, vector<1x4x512xf32>
    %111 = vector.shape_cast %110 : vector<1x4x512xf32> to vector<4x512xf32>
    %112 = arith.mulf %109, %111 : vector<4x512xf32>
    %c499_i32 = arith.constant 499 : i32
    %113 = tpu.dynamic_rotate %4 by %c499_i32 dim 1 : vector<4x512xf32>, i32 -> vector<4x512xf32>
    %c28 = arith.constant 28 : index
    %c0_60 = arith.constant 0 : index
    %c0_61 = arith.constant 0 : index
    %114 = vector.load %arg2[%c28, %c0_60, %c0_61] : memref<49x4x512xf32, #tpu.memory_space<vmem>>, vector<1x4x512xf32>
    %115 = vector.shape_cast %114 : vector<1x4x512xf32> to vector<4x512xf32>
    %116 = arith.mulf %113, %115 : vector<4x512xf32>
    %c498_i32 = arith.constant 498 : i32
    %117 = tpu.dynamic_rotate %4 by %c498_i32 dim 1 : vector<4x512xf32>, i32 -> vector<4x512xf32>
    %c29 = arith.constant 29 : index
    %c0_62 = arith.constant 0 : index
    %c0_63 = arith.constant 0 : index
    %118 = vector.load %arg2[%c29, %c0_62, %c0_63] : memref<49x4x512xf32, #tpu.memory_space<vmem>>, vector<1x4x512xf32>
    %119 = vector.shape_cast %118 : vector<1x4x512xf32> to vector<4x512xf32>
    %120 = arith.mulf %117, %119 : vector<4x512xf32>
    %c497_i32 = arith.constant 497 : i32
    %121 = tpu.dynamic_rotate %4 by %c497_i32 dim 1 : vector<4x512xf32>, i32 -> vector<4x512xf32>
    %c30 = arith.constant 30 : index
    %c0_64 = arith.constant 0 : index
    %c0_65 = arith.constant 0 : index
    %122 = vector.load %arg2[%c30, %c0_64, %c0_65] : memref<49x4x512xf32, #tpu.memory_space<vmem>>, vector<1x4x512xf32>
    %123 = vector.shape_cast %122 : vector<1x4x512xf32> to vector<4x512xf32>
    %124 = arith.mulf %121, %123 : vector<4x512xf32>
    %c496_i32 = arith.constant 496 : i32
    %125 = tpu.dynamic_rotate %4 by %c496_i32 dim 1 : vector<4x512xf32>, i32 -> vector<4x512xf32>
    %c31 = arith.constant 31 : index
    %c0_66 = arith.constant 0 : index
    %c0_67 = arith.constant 0 : index
    %126 = vector.load %arg2[%c31, %c0_66, %c0_67] : memref<49x4x512xf32, #tpu.memory_space<vmem>>, vector<1x4x512xf32>
    %127 = vector.shape_cast %126 : vector<1x4x512xf32> to vector<4x512xf32>
    %128 = arith.mulf %125, %127 : vector<4x512xf32>
    %c495_i32 = arith.constant 495 : i32
    %129 = tpu.dynamic_rotate %4 by %c495_i32 dim 1 : vector<4x512xf32>, i32 -> vector<4x512xf32>
    %c32 = arith.constant 32 : index
    %c0_68 = arith.constant 0 : index
    %c0_69 = arith.constant 0 : index
    %130 = vector.load %arg2[%c32, %c0_68, %c0_69] : memref<49x4x512xf32, #tpu.memory_space<vmem>>, vector<1x4x512xf32>
    %131 = vector.shape_cast %130 : vector<1x4x512xf32> to vector<4x512xf32>
    %132 = arith.mulf %129, %131 : vector<4x512xf32>
    %c494_i32 = arith.constant 494 : i32
    %133 = tpu.dynamic_rotate %4 by %c494_i32 dim 1 : vector<4x512xf32>, i32 -> vector<4x512xf32>
    %c33 = arith.constant 33 : index
    %c0_70 = arith.constant 0 : index
    %c0_71 = arith.constant 0 : index
    %134 = vector.load %arg2[%c33, %c0_70, %c0_71] : memref<49x4x512xf32, #tpu.memory_space<vmem>>, vector<1x4x512xf32>
    %135 = vector.shape_cast %134 : vector<1x4x512xf32> to vector<4x512xf32>
    %136 = arith.mulf %133, %135 : vector<4x512xf32>
    %c493_i32 = arith.constant 493 : i32
    %137 = tpu.dynamic_rotate %4 by %c493_i32 dim 1 : vector<4x512xf32>, i32 -> vector<4x512xf32>
    %c34 = arith.constant 34 : index
    %c0_72 = arith.constant 0 : index
    %c0_73 = arith.constant 0 : index
    %138 = vector.load %arg2[%c34, %c0_72, %c0_73] : memref<49x4x512xf32, #tpu.memory_space<vmem>>, vector<1x4x512xf32>
    %139 = vector.shape_cast %138 : vector<1x4x512xf32> to vector<4x512xf32>
    %140 = arith.mulf %137, %139 : vector<4x512xf32>
    %c483_i32 = arith.constant 483 : i32
    %141 = tpu.dynamic_rotate %4 by %c483_i32 dim 1 : vector<4x512xf32>, i32 -> vector<4x512xf32>
    %c35 = arith.constant 35 : index
    %c0_74 = arith.constant 0 : index
    %c0_75 = arith.constant 0 : index
    %142 = vector.load %arg2[%c35, %c0_74, %c0_75] : memref<49x4x512xf32, #tpu.memory_space<vmem>>, vector<1x4x512xf32>
    %143 = vector.shape_cast %142 : vector<1x4x512xf32> to vector<4x512xf32>
    %144 = arith.mulf %141, %143 : vector<4x512xf32>
    %c482_i32 = arith.constant 482 : i32
    %145 = tpu.dynamic_rotate %4 by %c482_i32 dim 1 : vector<4x512xf32>, i32 -> vector<4x512xf32>
    %c36 = arith.constant 36 : index
    %c0_76 = arith.constant 0 : index
    %c0_77 = arith.constant 0 : index
    %146 = vector.load %arg2[%c36, %c0_76, %c0_77] : memref<49x4x512xf32, #tpu.memory_space<vmem>>, vector<1x4x512xf32>
    %147 = vector.shape_cast %146 : vector<1x4x512xf32> to vector<4x512xf32>
    %148 = arith.mulf %145, %147 : vector<4x512xf32>
    %c481_i32 = arith.constant 481 : i32
    %149 = tpu.dynamic_rotate %4 by %c481_i32 dim 1 : vector<4x512xf32>, i32 -> vector<4x512xf32>
    %c37 = arith.constant 37 : index
    %c0_78 = arith.constant 0 : index
    %c0_79 = arith.constant 0 : index
    %150 = vector.load %arg2[%c37, %c0_78, %c0_79] : memref<49x4x512xf32, #tpu.memory_space<vmem>>, vector<1x4x512xf32>
    %151 = vector.shape_cast %150 : vector<1x4x512xf32> to vector<4x512xf32>
    %152 = arith.mulf %149, %151 : vector<4x512xf32>
    %c480_i32 = arith.constant 480 : i32
    %153 = tpu.dynamic_rotate %4 by %c480_i32 dim 1 : vector<4x512xf32>, i32 -> vector<4x512xf32>
    %c38 = arith.constant 38 : index
    %c0_80 = arith.constant 0 : index
    %c0_81 = arith.constant 0 : index
    %154 = vector.load %arg2[%c38, %c0_80, %c0_81] : memref<49x4x512xf32, #tpu.memory_space<vmem>>, vector<1x4x512xf32>
    %155 = vector.shape_cast %154 : vector<1x4x512xf32> to vector<4x512xf32>
    %156 = arith.mulf %153, %155 : vector<4x512xf32>
    %c479_i32 = arith.constant 479 : i32
    %157 = tpu.dynamic_rotate %4 by %c479_i32 dim 1 : vector<4x512xf32>, i32 -> vector<4x512xf32>
    %c39 = arith.constant 39 : index
    %c0_82 = arith.constant 0 : index
    %c0_83 = arith.constant 0 : index
    %158 = vector.load %arg2[%c39, %c0_82, %c0_83] : memref<49x4x512xf32, #tpu.memory_space<vmem>>, vector<1x4x512xf32>
    %159 = vector.shape_cast %158 : vector<1x4x512xf32> to vector<4x512xf32>
    %160 = arith.mulf %157, %159 : vector<4x512xf32>
    %c478_i32 = arith.constant 478 : i32
    %161 = tpu.dynamic_rotate %4 by %c478_i32 dim 1 : vector<4x512xf32>, i32 -> vector<4x512xf32>
    %c40 = arith.constant 40 : index
    %c0_84 = arith.constant 0 : index
    %c0_85 = arith.constant 0 : index
    %162 = vector.load %arg2[%c40, %c0_84, %c0_85] : memref<49x4x512xf32, #tpu.memory_space<vmem>>, vector<1x4x512xf32>
    %163 = vector.shape_cast %162 : vector<1x4x512xf32> to vector<4x512xf32>
    %164 = arith.mulf %161, %163 : vector<4x512xf32>
    %c477_i32 = arith.constant 477 : i32
    %165 = tpu.dynamic_rotate %4 by %c477_i32 dim 1 : vector<4x512xf32>, i32 -> vector<4x512xf32>
    %c41 = arith.constant 41 : index
    %c0_86 = arith.constant 0 : index
    %c0_87 = arith.constant 0 : index
    %166 = vector.load %arg2[%c41, %c0_86, %c0_87] : memref<49x4x512xf32, #tpu.memory_space<vmem>>, vector<1x4x512xf32>
    %167 = vector.shape_cast %166 : vector<1x4x512xf32> to vector<4x512xf32>
    %168 = arith.mulf %165, %167 : vector<4x512xf32>
    %c467_i32 = arith.constant 467 : i32
    %169 = tpu.dynamic_rotate %4 by %c467_i32 dim 1 : vector<4x512xf32>, i32 -> vector<4x512xf32>
    %c42 = arith.constant 42 : index
    %c0_88 = arith.constant 0 : index
    %c0_89 = arith.constant 0 : index
    %170 = vector.load %arg2[%c42, %c0_88, %c0_89] : memref<49x4x512xf32, #tpu.memory_space<vmem>>, vector<1x4x512xf32>
    %171 = vector.shape_cast %170 : vector<1x4x512xf32> to vector<4x512xf32>
    %172 = arith.mulf %169, %171 : vector<4x512xf32>
    %c466_i32 = arith.constant 466 : i32
    %173 = tpu.dynamic_rotate %4 by %c466_i32 dim 1 : vector<4x512xf32>, i32 -> vector<4x512xf32>
    %c43 = arith.constant 43 : index
    %c0_90 = arith.constant 0 : index
    %c0_91 = arith.constant 0 : index
    %174 = vector.load %arg2[%c43, %c0_90, %c0_91] : memref<49x4x512xf32, #tpu.memory_space<vmem>>, vector<1x4x512xf32>
    %175 = vector.shape_cast %174 : vector<1x4x512xf32> to vector<4x512xf32>
    %176 = arith.mulf %173, %175 : vector<4x512xf32>
    %c465_i32 = arith.constant 465 : i32
    %177 = tpu.dynamic_rotate %4 by %c465_i32 dim 1 : vector<4x512xf32>, i32 -> vector<4x512xf32>
    %c44 = arith.constant 44 : index
    %c0_92 = arith.constant 0 : index
    %c0_93 = arith.constant 0 : index
    %178 = vector.load %arg2[%c44, %c0_92, %c0_93] : memref<49x4x512xf32, #tpu.memory_space<vmem>>, vector<1x4x512xf32>
    %179 = vector.shape_cast %178 : vector<1x4x512xf32> to vector<4x512xf32>
    %180 = arith.mulf %177, %179 : vector<4x512xf32>
    %c464_i32 = arith.constant 464 : i32
    %181 = tpu.dynamic_rotate %4 by %c464_i32 dim 1 : vector<4x512xf32>, i32 -> vector<4x512xf32>
    %c45 = arith.constant 45 : index
    %c0_94 = arith.constant 0 : index
    %c0_95 = arith.constant 0 : index
    %182 = vector.load %arg2[%c45, %c0_94, %c0_95] : memref<49x4x512xf32, #tpu.memory_space<vmem>>, vector<1x4x512xf32>
    %183 = vector.shape_cast %182 : vector<1x4x512xf32> to vector<4x512xf32>
    %184 = arith.mulf %181, %183 : vector<4x512xf32>
    %c463_i32 = arith.constant 463 : i32
    %185 = tpu.dynamic_rotate %4 by %c463_i32 dim 1 : vector<4x512xf32>, i32 -> vector<4x512xf32>
    %c46 = arith.constant 46 : index
    %c0_96 = arith.constant 0 : index
    %c0_97 = arith.constant 0 : index
    %186 = vector.load %arg2[%c46, %c0_96, %c0_97] : memref<49x4x512xf32, #tpu.memory_space<vmem>>, vector<1x4x512xf32>
    %187 = vector.shape_cast %186 : vector<1x4x512xf32> to vector<4x512xf32>
    %188 = arith.mulf %185, %187 : vector<4x512xf32>
    %c462_i32 = arith.constant 462 : i32
    %189 = tpu.dynamic_rotate %4 by %c462_i32 dim 1 : vector<4x512xf32>, i32 -> vector<4x512xf32>
    %c47 = arith.constant 47 : index
    %c0_98 = arith.constant 0 : index
    %c0_99 = arith.constant 0 : index
    %190 = vector.load %arg2[%c47, %c0_98, %c0_99] : memref<49x4x512xf32, #tpu.memory_space<vmem>>, vector<1x4x512xf32>
    %191 = vector.shape_cast %190 : vector<1x4x512xf32> to vector<4x512xf32>
    %192 = arith.mulf %189, %191 : vector<4x512xf32>
    %c461_i32 = arith.constant 461 : i32
    %193 = tpu.dynamic_rotate %4 by %c461_i32 dim 1 : vector<4x512xf32>, i32 -> vector<4x512xf32>
    %c48 = arith.constant 48 : index
    %c0_100 = arith.constant 0 : index
    %c0_101 = arith.constant 0 : index
    %194 = vector.load %arg2[%c48, %c0_100, %c0_101] : memref<49x4x512xf32, #tpu.memory_space<vmem>>, vector<1x4x512xf32>
    %195 = vector.shape_cast %194 : vector<1x4x512xf32> to vector<4x512xf32>
    %196 = arith.mulf %193, %195 : vector<4x512xf32>
    %197 = tpu.concatenate %8, %12, %16, %20, %24, %28, %32, %36, %40, %44, %48, %52, %56, %60, %64, %68 in 0 : vector<4x512xf32>, vector<4x512xf32>, vector<4x512xf32>, vector<4x512xf32>, vector<4x512xf32>, vector<4x512xf32>, vector<4x512xf32>, vector<4x512xf32>, vector<4x512xf32>, vector<4x512xf32>, vector<4x512xf32>, vector<4x512xf32>, vector<4x512xf32>, vector<4x512xf32>, vector<4x512xf32>, vector<4x512xf32> -> vector<64x512xf32>
    %198 = tpu.concatenate %72, %76, %80, %84, %88, %92, %96, %100, %4, %104, %108, %112, %116, %120, %124, %128 in 0 : vector<4x512xf32>, vector<4x512xf32>, vector<4x512xf32>, vector<4x512xf32>, vector<4x512xf32>, vector<4x512xf32>, vector<4x512xf32>, vector<4x512xf32>, vector<4x512xf32>, vector<4x512xf32>, vector<4x512xf32>, vector<4x512xf32>, vector<4x512xf32>, vector<4x512xf32>, vector<4x512xf32>, vector<4x512xf32> -> vector<64x512xf32>
    %199 = tpu.concatenate %132, %136, %140, %144, %148, %152, %156, %160, %164, %168, %172, %176, %180, %184, %188, %192 in 0 : vector<4x512xf32>, vector<4x512xf32>, vector<4x512xf32>, vector<4x512xf32>, vector<4x512xf32>, vector<4x512xf32>, vector<4x512xf32>, vector<4x512xf32>, vector<4x512xf32>, vector<4x512xf32>, vector<4x512xf32>, vector<4x512xf32>, vector<4x512xf32>, vector<4x512xf32>, vector<4x512xf32>, vector<4x512xf32> -> vector<64x512xf32>
    %200 = tpu.concatenate %197, %198, %199, %196 in 0 : vector<64x512xf32>, vector<64x512xf32>, vector<64x512xf32>, vector<4x512xf32> -> vector<196x512xf32>
    %201 = arith.truncf %200 : vector<196x512xf32> to vector<196x512xbf16>
    %c0_102 = arith.constant 0 : index
    %c0_103 = arith.constant 0 : index
    %202 = vector.load %arg3[%c0_102, %c0_103] : memref<16x196xbf16, #tpu.memory_space<vmem>>, vector<16x196xbf16>
    %cst = arith.constant dense<0.000000e+00> : vector<16x512xf32>
    %203 = tpu.matmul %202, %201, %cst {dimension_numbers = #tpu.dot_dimension_numbers<[1], [0], [0], [1], [0, 0, 1, 1], [], []>} : vector<16x196xbf16>, vector<196x512xbf16>, vector<16x512xf32> -> vector<16x512xf32>
    %c0_104 = arith.constant 0 : index
    %c0_105 = arith.constant 0 : index
    %204 = vector.load %arg4[%c0_104, %c0_105] : memref<16x1xf32, #tpu.memory_space<vmem>>, vector<16x1xf32>
    %205 = vector.broadcast %204 : vector<16x1xf32> to vector<16x512xf32>
    %206 = arith.addf %203, %205 : vector<16x512xf32>
    %cst_106 = arith.constant 0.000000e+00 : f32
    %207 = vector.broadcast %cst_106 : f32 to vector<16x512xf32>
    %208 = arith.maximumf %206, %207 : vector<16x512xf32>
    %209 = vector.extract_strided_slice %208 {offsets = [0, 0], sizes = [4, 512], strides = [1, 1]} : vector<16x512xf32> to vector<4x512xf32>
    %210 = vector.extract_strided_slice %208 {offsets = [4, 0], sizes = [4, 512], strides = [1, 1]} : vector<16x512xf32> to vector<4x512xf32>
    %211 = arith.addf %209, %210 : vector<4x512xf32>
    %212 = vector.extract_strided_slice %208 {offsets = [8, 0], sizes = [4, 512], strides = [1, 1]} : vector<16x512xf32> to vector<4x512xf32>
    %213 = arith.addf %211, %212 : vector<4x512xf32>
    %214 = vector.extract_strided_slice %208 {offsets = [12, 0], sizes = [4, 512], strides = [1, 1]} : vector<16x512xf32> to vector<4x512xf32>
    %215 = arith.addf %213, %214 : vector<4x512xf32>
    %216 = vector.extract_strided_slice %215 {offsets = [0, 0], sizes = [4, 256], strides = [1, 1]} : vector<4x512xf32> to vector<4x256xf32>
    %cst_107 = arith.constant dense<0.000000e+00> : vector<4xf32>
    %217 = vector.multi_reduction <add>, %216, %cst_107 [1] : vector<4x256xf32> to vector<4xf32>
    %218 = vector.shape_cast %217 : vector<4xf32> to vector<4x1xf32>
    %cst_108 = arith.constant 3.906250e-03 : f32
    %219 = vector.broadcast %cst_108 : f32 to vector<4x1xf32>
    %220 = arith.mulf %218, %219 : vector<4x1xf32>
    %c0_109 = arith.constant 0 : index
    %c0_110 = arith.constant 0 : index
    %221 = vector.load %arg5[%c0_109, %c0_110] : memref<16x4xf32, #tpu.memory_space<vmem>>, vector<16x4xf32>
    %cst_111 = arith.constant dense<0.000000e+00> : vector<16x1xf32>
    %222 = tpu.matmul %221, %220, %cst_111 {dimension_numbers = #tpu.dot_dimension_numbers<[1], [0], [0], [1], [0, 0, 1, 1], [], []>} : vector<16x4xf32>, vector<4x1xf32>, vector<16x1xf32> -> vector<16x1xf32>
    %c0_112 = arith.constant 0 : index
    %c0_113 = arith.constant 0 : index
    %223 = vector.load %arg6[%c0_112, %c0_113] : memref<16x1xf32, #tpu.memory_space<vmem>>, vector<16x1xf32>
    %224 = arith.addf %222, %223 : vector<16x1xf32>
    %225 = vector.extract_strided_slice %224 {offsets = [0, 0], sizes = [4, 1], strides = [1, 1]} : vector<16x1xf32> to vector<4x1xf32>
    %226 = vector.extract_strided_slice %224 {offsets = [4, 0], sizes = [4, 1], strides = [1, 1]} : vector<16x1xf32> to vector<4x1xf32>
    %227 = vector.extract_strided_slice %224 {offsets = [8, 0], sizes = [4, 1], strides = [1, 1]} : vector<16x1xf32> to vector<4x1xf32>
    %228 = vector.extract_strided_slice %224 {offsets = [12, 0], sizes = [4, 1], strides = [1, 1]} : vector<16x1xf32> to vector<4x1xf32>
    %229 = arith.maximumf %225, %226 : vector<4x1xf32>
    %230 = arith.maximumf %229, %227 : vector<4x1xf32>
    %231 = arith.maximumf %230, %228 : vector<4x1xf32>
    %232 = arith.subf %225, %231 : vector<4x1xf32>
    %233 = math.exp %232 : vector<4x1xf32>
    %234 = arith.subf %226, %231 : vector<4x1xf32>
    %235 = math.exp %234 : vector<4x1xf32>
    %236 = arith.subf %227, %231 : vector<4x1xf32>
    %237 = math.exp %236 : vector<4x1xf32>
    %238 = arith.subf %228, %231 : vector<4x1xf32>
    %239 = math.exp %238 : vector<4x1xf32>
    %240 = arith.addf %233, %235 : vector<4x1xf32>
    %241 = arith.addf %240, %237 : vector<4x1xf32>
    %242 = arith.addf %241, %239 : vector<4x1xf32>
    %cst_114 = arith.constant 1.000000e+00 : f32
    %243 = vector.broadcast %cst_114 : f32 to vector<4x1xf32>
    %244 = arith.divf %243, %242 : vector<4x1xf32>
    %245 = arith.mulf %233, %244 : vector<4x1xf32>
    %246 = arith.mulf %235, %244 : vector<4x1xf32>
    %247 = arith.mulf %237, %244 : vector<4x1xf32>
    %248 = arith.mulf %239, %244 : vector<4x1xf32>
    %249 = tpu.concatenate %245, %246, %247, %248 in 0 : vector<4x1xf32>, vector<4x1xf32>, vector<4x1xf32>, vector<4x1xf32> -> vector<16x1xf32>
    %250 = vector.extract_strided_slice %215 {offsets = [0, 256], sizes = [4, 256], strides = [1, 1]} : vector<4x512xf32> to vector<4x256xf32>
    %cst_115 = arith.constant dense<0.000000e+00> : vector<4xf32>
    %251 = vector.multi_reduction <add>, %250, %cst_115 [1] : vector<4x256xf32> to vector<4xf32>
    %252 = vector.shape_cast %251 : vector<4xf32> to vector<4x1xf32>
    %cst_116 = arith.constant 3.906250e-03 : f32
    %253 = vector.broadcast %cst_116 : f32 to vector<4x1xf32>
    %254 = arith.mulf %252, %253 : vector<4x1xf32>
    %c0_117 = arith.constant 0 : index
    %c0_118 = arith.constant 0 : index
    %255 = vector.load %arg5[%c0_117, %c0_118] : memref<16x4xf32, #tpu.memory_space<vmem>>, vector<16x4xf32>
    %cst_119 = arith.constant dense<0.000000e+00> : vector<16x1xf32>
    %256 = tpu.matmul %255, %254, %cst_119 {dimension_numbers = #tpu.dot_dimension_numbers<[1], [0], [0], [1], [0, 0, 1, 1], [], []>} : vector<16x4xf32>, vector<4x1xf32>, vector<16x1xf32> -> vector<16x1xf32>
    %c0_120 = arith.constant 0 : index
    %c0_121 = arith.constant 0 : index
    %257 = vector.load %arg6[%c0_120, %c0_121] : memref<16x1xf32, #tpu.memory_space<vmem>>, vector<16x1xf32>
    %258 = arith.addf %256, %257 : vector<16x1xf32>
    %259 = vector.extract_strided_slice %258 {offsets = [0, 0], sizes = [4, 1], strides = [1, 1]} : vector<16x1xf32> to vector<4x1xf32>
    %260 = vector.extract_strided_slice %258 {offsets = [4, 0], sizes = [4, 1], strides = [1, 1]} : vector<16x1xf32> to vector<4x1xf32>
    %261 = vector.extract_strided_slice %258 {offsets = [8, 0], sizes = [4, 1], strides = [1, 1]} : vector<16x1xf32> to vector<4x1xf32>
    %262 = vector.extract_strided_slice %258 {offsets = [12, 0], sizes = [4, 1], strides = [1, 1]} : vector<16x1xf32> to vector<4x1xf32>
    %263 = arith.maximumf %259, %260 : vector<4x1xf32>
    %264 = arith.maximumf %263, %261 : vector<4x1xf32>
    %265 = arith.maximumf %264, %262 : vector<4x1xf32>
    %266 = arith.subf %259, %265 : vector<4x1xf32>
    %267 = math.exp %266 : vector<4x1xf32>
    %268 = arith.subf %260, %265 : vector<4x1xf32>
    %269 = math.exp %268 : vector<4x1xf32>
    %270 = arith.subf %261, %265 : vector<4x1xf32>
    %271 = math.exp %270 : vector<4x1xf32>
    %272 = arith.subf %262, %265 : vector<4x1xf32>
    %273 = math.exp %272 : vector<4x1xf32>
    %274 = arith.addf %267, %269 : vector<4x1xf32>
    %275 = arith.addf %274, %271 : vector<4x1xf32>
    %276 = arith.addf %275, %273 : vector<4x1xf32>
    %cst_122 = arith.constant 1.000000e+00 : f32
    %277 = vector.broadcast %cst_122 : f32 to vector<4x1xf32>
    %278 = arith.divf %277, %276 : vector<4x1xf32>
    %279 = arith.mulf %267, %278 : vector<4x1xf32>
    %280 = arith.mulf %269, %278 : vector<4x1xf32>
    %281 = arith.mulf %271, %278 : vector<4x1xf32>
    %282 = arith.mulf %273, %278 : vector<4x1xf32>
    %283 = tpu.concatenate %279, %280, %281, %282 in 0 : vector<4x1xf32>, vector<4x1xf32>, vector<4x1xf32>, vector<4x1xf32> -> vector<16x1xf32>
    %284 = vector.shape_cast %249 : vector<16x1xf32> to vector<16x1xf32>
    %285 = vector.broadcast %284 : vector<16x1xf32> to vector<16x256xf32>
    %286 = vector.shape_cast %283 : vector<16x1xf32> to vector<16x1xf32>
    %287 = vector.broadcast %286 : vector<16x1xf32> to vector<16x256xf32>
    %288 = tpu.concatenate %285, %287 in 1 : vector<16x256xf32>, vector<16x256xf32> -> vector<16x512xf32>
    %289 = vector.extract_strided_slice %288 {offsets = [0, 0], sizes = [4, 512], strides = [1, 1]} : vector<16x512xf32> to vector<4x512xf32>
    %290 = vector.extract_strided_slice %208 {offsets = [0, 0], sizes = [4, 512], strides = [1, 1]} : vector<16x512xf32> to vector<4x512xf32>
    %291 = arith.mulf %289, %290 : vector<4x512xf32>
    %292 = vector.extract_strided_slice %288 {offsets = [4, 0], sizes = [4, 512], strides = [1, 1]} : vector<16x512xf32> to vector<4x512xf32>
    %293 = vector.extract_strided_slice %208 {offsets = [4, 0], sizes = [4, 512], strides = [1, 1]} : vector<16x512xf32> to vector<4x512xf32>
    %294 = arith.mulf %292, %293 : vector<4x512xf32>
    %295 = arith.addf %291, %294 : vector<4x512xf32>
    %296 = vector.extract_strided_slice %288 {offsets = [8, 0], sizes = [4, 512], strides = [1, 1]} : vector<16x512xf32> to vector<4x512xf32>
    %297 = vector.extract_strided_slice %208 {offsets = [8, 0], sizes = [4, 512], strides = [1, 1]} : vector<16x512xf32> to vector<4x512xf32>
    %298 = arith.mulf %296, %297 : vector<4x512xf32>
    %299 = arith.addf %295, %298 : vector<4x512xf32>
    %300 = vector.extract_strided_slice %288 {offsets = [12, 0], sizes = [4, 512], strides = [1, 1]} : vector<16x512xf32> to vector<4x512xf32>
    %301 = vector.extract_strided_slice %208 {offsets = [12, 0], sizes = [4, 512], strides = [1, 1]} : vector<16x512xf32> to vector<4x512xf32>
    %302 = arith.mulf %300, %301 : vector<4x512xf32>
    %303 = arith.addf %299, %302 : vector<4x512xf32>
    %304 = vector.extract_strided_slice %303 {offsets = [0, 0], sizes = [4, 256], strides = [1, 1]} : vector<4x512xf32> to vector<4x256xf32>
    %c0_123 = arith.constant 0 : index
    %c0_124 = arith.constant 0 : index
    %c0_125 = arith.constant 0 : index
    %305 = vector.load %arg7[%c0_123, %c0_124, %c0_125] : memref<2x4x256xf32, #tpu.memory_space<vmem>>, vector<1x4x256xf32>
    %306 = vector.shape_cast %305 : vector<1x4x256xf32> to vector<4x256xf32>
    %307 = vector.shape_cast %304 : vector<4x256xf32> to vector<1x4x256xf32>
    tpu.vector_store %arg7[%c0_123, %c0_124, %c0_125], %307 {strides = array<i32>} : memref<2x4x256xf32, #tpu.memory_space<vmem>>, vector<1x4x256xf32>,
    %308 = vector.extract_strided_slice %303 {offsets = [0, 256], sizes = [4, 256], strides = [1, 1]} : vector<4x512xf32> to vector<4x256xf32>
    %c1_126 = arith.constant 1 : index
    %c0_127 = arith.constant 0 : index
    %c0_128 = arith.constant 0 : index
    %309 = vector.load %arg7[%c1_126, %c0_127, %c0_128] : memref<2x4x256xf32, #tpu.memory_space<vmem>>, vector<1x4x256xf32>
    %310 = vector.shape_cast %309 : vector<1x4x256xf32> to vector<4x256xf32>
    %311 = vector.shape_cast %308 : vector<4x256xf32> to vector<1x4x256xf32>
    tpu.vector_store %arg7[%c1_126, %c0_127, %c0_128], %311 {strides = array<i32>} : memref<2x4x256xf32, #tpu.memory_space<vmem>>, vector<1x4x256xf32>,
    %312 = vector.shape_cast %249 : vector<16x1xf32> to vector<16x1xf32>
    %313 = vector.broadcast %312 : vector<16x1xf32> to vector<16x128xf32>
    %314 = vector.shape_cast %283 : vector<16x1xf32> to vector<16x1xf32>
    %315 = vector.broadcast %314 : vector<16x1xf32> to vector<16x128xf32>
    %316 = tpu.concatenate %313, %315 in 1 : vector<16x128xf32>, vector<16x128xf32> -> vector<16x256xf32>
    %c0_129 = arith.constant 0 : index
    %c0_130 = arith.constant 0 : index
    %c0_131 = arith.constant 0 : index
    %317 = vector.load %arg8[%c0_129, %c0_130, %c0_131] : memref<1x16x256xf32, #tpu.memory_space<vmem>>, vector<1x16x256xf32>
    %318 = vector.shape_cast %317 : vector<1x16x256xf32> to vector<16x256xf32>
    %319 = vector.shape_cast %316 : vector<16x256xf32> to vector<1x16x256xf32>
    tpu.vector_store %arg8[%c0_129, %c0_130, %c0_131], %319 {strides = array<i32>} : memref<1x16x256xf32, #tpu.memory_space<vmem>>, vector<1x16x256xf32>,
    return
  }
  func.func @transform_0(%arg0: i32) -> (i32, i32, i32) {
    %c0_i32 = arith.constant 0 : i32
    %c0_i32_0 = arith.constant 0 : i32
    %c0_i32_1 = arith.constant 0 : i32
    return %arg0, %c0_i32, %c0_i32_0 : i32, i32, i32
  }
  func.func @transform_1(%arg0: i32) -> (i32, i32, i32) {
    %c0_i32 = arith.constant 0 : i32
    %c0_i32_0 = arith.constant 0 : i32
    %c0_i32_1 = arith.constant 0 : i32
    %c0_i32_2 = arith.constant 0 : i32
    return %c0_i32, %c0_i32_0, %c0_i32_1 : i32, i32, i32
  }
  func.func @transform_2(%arg0: i32) -> (i32, i32) {
    %c0_i32 = arith.constant 0 : i32
    %c0_i32_0 = arith.constant 0 : i32
    %c0_i32_1 = arith.constant 0 : i32
    return %c0_i32, %c0_i32_0 : i32, i32
  }
  func.func @transform_3(%arg0: i32) -> (i32, i32) {
    %c0_i32 = arith.constant 0 : i32
    %c0_i32_0 = arith.constant 0 : i32
    %c0_i32_1 = arith.constant 0 : i32
    return %c0_i32, %c0_i32_0 : i32, i32
  }
  func.func @transform_4(%arg0: i32) -> (i32, i32) {
    %c0_i32 = arith.constant 0 : i32
    %c0_i32_0 = arith.constant 0 : i32
    %c0_i32_1 = arith.constant 0 : i32
    return %c0_i32, %c0_i32_0 : i32, i32
  }
  func.func @transform_5(%arg0: i32) -> (i32, i32) {
    %c0_i32 = arith.constant 0 : i32
    %c0_i32_0 = arith.constant 0 : i32
    %c0_i32_1 = arith.constant 0 : i32
    return %c0_i32, %c0_i32_0 : i32, i32
  }
  func.func @transform_6(%arg0: i32) -> (i32, i32, i32) {
    %c0_i32 = arith.constant 0 : i32
    %c0_i32_0 = arith.constant 0 : i32
    %c0_i32_1 = arith.constant 0 : i32
    return %arg0, %c0_i32, %c0_i32_0 : i32, i32, i32
  }
  func.func @transform_7(%arg0: i32) -> (i32, i32, i32) {
    %c0_i32 = arith.constant 0 : i32
    %c0_i32_0 = arith.constant 0 : i32
    %c0_i32_1 = arith.constant 0 : i32
    return %arg0, %c0_i32, %c0_i32_0 : i32, i32, i32
  }
}

</mosaic_0001>

<bundles_post_ra>
// kernel: tpu_custom_call.1
= control target key start
LH: loop header
LB: loop body
LE: loop exit
PB: predicated region body
PF: predicated region fallthrough
CT: control target
= control target key end

     0   :  { %13 = vsyncpa [#allocation3], 0  ;;  %s3530_s0 = inlined_call_operand.vmem [shape: f32[2,4,256], index: 0, kind: input, shape index: {}]   ;;  %s3531_s1 = inlined_call_operand.hbm [shape: f32[49,4,512], index: 1, kind: input, shape index: {}]   ;;  %s3532_s2 = inlined_call_operand.vmem [shape: bf16[16,196], index: 2, kind: input, shape index: {}]   ;;  %s3533_s3 = inlined_call_operand.vmem [shape: f32[16,1], index: 3, kind: input, shape index: {}]   ;;  %s3534_s4 = inlined_call_operand.vmem [shape: f32[16,4], index: 4, kind: input, shape index: {}]   ;;  %s3535_s5 = inlined_call_operand.vmem [shape: f32[16,1], index: 5, kind: input, shape index: {}]   ;;  %s3536_s6 = inlined_call_operand.hbm [shape: f32[2,4,256], index: 6, kind: output, shape index: {0}]   ;;  %s3537_s7 = inlined_call_operand.hbm [shape: f32[1,16,256], index: 7, kind: output, shape index: {1}]  }
   0x1   :  { %14 = vsyncpa [#allocation4], 0 }
   0x2   :  { %15 = vsyncpa [#allocation7], 0  ;;  %s2567_s24 = smov [#allocation2]   ;;  %s2495_s28 = scalar_lea.hbm %s3531_s1, 12544 }
   0x3   :  { %s23_s25 = sshll.u32 %s2567_s24, 4  ;;  %p2496_p0 = scmp.ne.s32.totalorder %s3531_s1, %s2495_s28  ;;  %s24_s25 = int_to_ptr.vmem [resolvable:$true] %s23_s25 }
   0x4   :  { %p2499_p1 = scmp.lt.u32.totalorder %s2495_s28, %s3531_s1 }
   0x6   :  { %p2501_p2 = pnand %p2499_p1, %p2496_p0 }
   0x8   :  { %2504 = shalt.err (!%p2501_p2)
}
   0x9   :  { %s2505_s10 = scalar_lea.vmem %s24_s25, 12544  ;;  %p2510_p4 = scmp.lt.s32.totalorder %s24_s25, %s24_s25 }
   0xa   :  { %p2506_p3 = scmp.ne.s32.totalorder %s24_s25, %s2505_s10  ;;  %p2511_p5 = scmp.lt.s32.totalorder %s2505_s10, %s2505_s10 }
   0xc   :  { %p2512_p6 = por %p2511_p5, %p2510_p4 }
   0xe   :  { %p2513_p7 = pnand %p2512_p6, %p2506_p3 }
  0x10   :  { %2516 = shalt.err (!%p2513_p7)
}
  0x11   :  { %s2568_s11 = smov 256   ;;  %s2569_s12 = smov 16  }
  0x12   :  { %29 = dma.hbm_to_vmem [thread:$0]  %s3531_s1, 12544, %s24_s25, [#allocation3], %s2568_s11, %s2568_s11, %s2569_s12  }
  0x13   :  { %2561 = dma.done.wait [#allocation3], 12544  }
  0x14   :  { %2562 = vsyncadd [#allocation3], 4294954752  ;;  %v2680_v0 = vld [vmem:[%s3530_s0 + $0x8] sm:$0xff]  ;;  %v2685_v1 = vld [vmem:[%s3530_s0] sm:$0xff]  ;;  %s2570_s19 = smov 50   ;;  %s2571_s1 = smov 48   ;;  %v59_v8 = vlaneseq }
  0x15   :  { %82 = vrot.lane.b32.xlu1 %v2680_v0, %s2570_s19  ;;  %78 = vrot.lane.b32.xlu0 %v2685_v1, %s2570_s19  ;;  %v2691_v2 = vcombine.high %v2680_v0, %v2680_v0  ;;  %v2697_v3 = vcombine.high %v2685_v1, %v2685_v1  ;;  %s2572_s20 = smov 51   ;;  %s2573_s21 = smov 49   ;;  %v93_v14 = vld [vmem:[#allocation2 + $0x18] sm:$0xff]  ;;  %v144_v15 = vld [vmem:[#allocation2 + $0x30] sm:$0xff]  ;;  %v66_v19 = vld [vmem:[#allocation2] sm:$0xff]  ;;  %vm1396_vm3 = vcmask 1043456  }
  0x16   :  { %s2574_s22 = smov 46   ;;  %s2575_s23 = smov 35   ;;  %v2759_v11 = vand.u32 127, %v59_v8  ;;  %v92_v16 = vld [vmem:[#allocation2 + $0x10] sm:$0xff]  ;;  %v145_v17 = vld [vmem:[#allocation2 + $0x38] sm:$0xff]  ;;  %v97_v21 = vcombine.high %v93_v14, %v93_v14  ;;  %v67_v23 = vld [vmem:[#allocation2 + $0x8] sm:$0xff]  ;;  %v148_v26 = vcombine.high %v144_v15, %v144_v15  ;;  %v70_v30 = vcombine.high %v66_v19, %v66_v19 }
  0x17   :  { %s2576_s24 = smov 47   ;;  %s2577_s25 = smov 45   ;;  %v96_v22 = vcombine.high %v92_v16, %v92_v16  ;;  %v149_v29 = vcombine.high %v145_v17, %v145_v17  ;;  %v118_v31 = vld [vmem:[#allocation2 + $0x20] sm:$0xff]  ;;  %v71_v35 = vcombine.high %v67_v23, %v67_v23  ;;  %v119_v37 = vld [vmem:[#allocation2 + $0x28] sm:$0xff] }
  0x18   :  { %s2578_s26 = smov 33   ;;  %s2579_s27 = smov 31   ;;  %vm86_vm0 = vcmp.lt.s32.totalorder %v2759_v11, 50  ;;  %vm138_vm1 = vcmp.lt.s32.totalorder %v2759_v11, 48  ;;  %vm61_vm2 = vcmp.lt.s32.totalorder %v2759_v11, 51  ;;  %vm112_vm4 = vcmp.lt.s32.totalorder %v2759_v11, 49 }
  0x19   :  { %84 = vrot.lane.b32.xlu1 %v2691_v2, %s2570_s19  ;;  %130 = vrot.lane.b32.xlu0 %v2685_v1, %s2571_s1  ;;  %s2580_s28 = smov 34   ;;  %s2581_s29 = smov 32   ;;  %v122_v44 = vcombine.high %v118_v31, %v118_v31  ;;  %v123_v48 = vcombine.high %v119_v37, %v119_v37  ;;  %vm190_vm5 = vcmp.lt.s32.totalorder %v2759_v11, 46  ;;  %vm242_vm6 = vcmp.lt.s32.totalorder %v2759_v11, 35 }
  0x1a   :  { %s2582_s30 = smov 29   ;;  %s2583_s8 = smov 18   ;;  %vm164_vm7 = vcmp.lt.s32.totalorder %v2759_v11, 47  ;;  %vm216_vm8 = vcmp.lt.s32.totalorder %v2759_v11, 45  ;;  %vm294_vm9 = vcmp.lt.s32.totalorder %v2759_v11, 33  ;;  %vm346_vm10 = vcmp.lt.s32.totalorder %v2759_v11, 31 }
  0x1b   :  { %s2584_s9 = smov 30   ;;  %s2585_s10 = smov 19   ;;  %vm268_vm11 = vcmp.lt.s32.totalorder %v2759_v11, 34  ;;  %vm320_vm12 = vcmp.lt.s32.totalorder %v2759_v11, 32  ;;  %vm398_vm13 = vcmp.lt.s32.totalorder %v2759_v11, 29  ;;  %vm450_vm14 = vcmp.lt.s32.totalorder %v2759_v11, 18 }
  0x1c   :  { %s2586_s13 = smov 14   ;;  %s2587_s14 = smov 17   ;;  %vm372_vm15 = vcmp.lt.s32.totalorder %v2759_v11, 30 }
  0x1d   :  { %132 = vrot.lane.b32.xlu1 %v2697_v3, %s2571_s1  ;;  %80 = vrot.lane.b32.xlu0 %v2697_v3, %s2570_s19  ;;  %s2588_s15 = smov 15   ;;  %s2589_s16 = smov 3  }
  0x1e   :  { %s2590_s17 = smov 1   ;;  %s2591_s18 = smov 13  }
  0x1f   :  { %s2592_s19 = smov 2  }
  0x21   :  { %136 = vrot.lane.b32.xlu1 %v2691_v2, %s2571_s1  ;;  %134 = vrot.lane.b32.xlu0 %v2680_v0, %s2571_s1  ;;  %s2593_s1 = smov 127  }
  0x25   :  { %53 = vrot.lane.b32.xlu1 %v2697_v3, %s2572_s20  ;;  %51 = vrot.lane.b32.xlu0 %v2685_v1, %s2572_s20 }
  0x29   :  { %57 = vrot.lane.b32.xlu1 %v2691_v2, %s2572_s20  ;;  %55 = vrot.lane.b32.xlu0 %v2680_v0, %s2572_s20  ;;  %s2594_s20 = smov 125  }
  0x2d   :  { %106 = vrot.lane.b32.xlu1 %v2697_v3, %s2573_s21  ;;  %104 = vrot.lane.b32.xlu0 %v2685_v1, %s2573_s21 }
  0x31   :  { %110 = vrot.lane.b32.xlu1 %v2691_v2, %s2573_s21  ;;  %108 = vrot.lane.b32.xlu0 %v2680_v0, %s2573_s21  ;;  %s2595_s21 = smov 126  }
  0x35   :  { %184 = vrot.lane.b32.xlu1 %v2697_v3, %s2574_s22  ;;  %182 = vrot.lane.b32.xlu0 %v2685_v1, %s2574_s22 }
  0x39   :  { %188 = vrot.lane.b32.xlu1 %v2691_v2, %s2574_s22  ;;  %186 = vrot.lane.b32.xlu0 %v2680_v0, %s2574_s22  ;;  %s2596_s22 = smov 114  }
  0x3d   :  { %236 = vrot.lane.b32.xlu1 %v2697_v3, %s2575_s23  ;;  %234 = vrot.lane.b32.xlu0 %v2685_v1, %s2575_s23 }
  0x41   :  { %240 = vrot.lane.b32.xlu1 %v2691_v2, %s2575_s23  ;;  %238 = vrot.lane.b32.xlu0 %v2680_v0, %s2575_s23  ;;  %s2597_s23 = smov 112  }
  0x45   :  { %158 = vrot.lane.b32.xlu1 %v2697_v3, %s2576_s24  ;;  %156 = vrot.lane.b32.xlu0 %v2685_v1, %s2576_s24 }
  0x49   :  { %162 = vrot.lane.b32.xlu1 %v2691_v2, %s2576_s24  ;;  %160 = vrot.lane.b32.xlu0 %v2680_v0, %s2576_s24  ;;  %s2598_s24 = smov 115  }
  0x4d   :  { %210 = vrot.lane.b32.xlu1 %v2697_v3, %s2577_s25  ;;  %208 = vrot.lane.b32.xlu0 %v2685_v1, %s2577_s25 }
  0x51   :  { %214 = vrot.lane.b32.xlu1 %v2691_v2, %s2577_s25  ;;  %212 = vrot.lane.b32.xlu0 %v2680_v0, %s2577_s25  ;;  %s2599_s25 = smov 113  }
  0x55   :  { %288 = vrot.lane.b32.xlu1 %v2697_v3, %s2578_s26  ;;  %286 = vrot.lane.b32.xlu0 %v2685_v1, %s2578_s26 }
  0x59   :  { %292 = vrot.lane.b32.xlu1 %v2691_v2, %s2578_s26  ;;  %290 = vrot.lane.b32.xlu0 %v2680_v0, %s2578_s26 }
  0x5d   :  { %340 = vrot.lane.b32.xlu1 %v2697_v3, %s2579_s27  ;;  %338 = vrot.lane.b32.xlu0 %v2685_v1, %s2579_s27 }
  0x61   :  { %344 = vrot.lane.b32.xlu1 %v2691_v2, %s2579_s27  ;;  %342 = vrot.lane.b32.xlu0 %v2680_v0, %s2579_s27 }
  0x65   :  { %262 = vrot.lane.b32.xlu1 %v2697_v3, %s2580_s28  ;;  %260 = vrot.lane.b32.xlu0 %v2685_v1, %s2580_s28 }
  0x69   :  { %266 = vrot.lane.b32.xlu1 %v2691_v2, %s2580_s28  ;;  %264 = vrot.lane.b32.xlu0 %v2680_v0, %s2580_s28 }
  0x6d   :  { %314 = vrot.lane.b32.xlu1 %v2697_v3, %s2581_s29  ;;  %312 = vrot.lane.b32.xlu0 %v2685_v1, %s2581_s29 }
  0x71   :  { %318 = vrot.lane.b32.xlu1 %v2691_v2, %s2581_s29  ;;  %316 = vrot.lane.b32.xlu0 %v2680_v0, %s2581_s29 }
  0x75   :  { %392 = vrot.lane.b32.xlu1 %v2697_v3, %s2582_s30  ;;  %390 = vrot.lane.b32.xlu0 %v2685_v1, %s2582_s30 }
  0x79   :  { %396 = vrot.lane.b32.xlu1 %v2691_v2, %s2582_s30  ;;  %394 = vrot.lane.b32.xlu0 %v2680_v0, %s2582_s30  ;;  %s2600_s30 = smov 110  }
  0x7d   :  { %444 = vrot.lane.b32.xlu1 %v2697_v3, %s2583_s8  ;;  %442 = vrot.lane.b32.xlu0 %v2685_v1, %s2583_s8 }
  0x81   :  { %448 = vrot.lane.b32.xlu1 %v2691_v2, %s2583_s8  ;;  %446 = vrot.lane.b32.xlu0 %v2680_v0, %s2583_s8  ;;  %s2602_s8 = smov 111  }
  0x85   :  { %366 = vrot.lane.b32.xlu1 %v2697_v3, %s2584_s9  ;;  %364 = vrot.lane.b32.xlu0 %v2685_v1, %s2584_s9 }
  0x87   :  { %v83_v4 = vpop.permute.xlu1 %82  ;;  %v79_v5 = vpop.permute.xlu0 %78 }
  0x89   :  { %370 = vrot.lane.b32.xlu1 %v2691_v2, %s2584_s9  ;;  %368 = vrot.lane.b32.xlu0 %v2680_v0, %s2584_s9  ;;  %s2603_s9 = smov 109  }
  0x8b   :  { %v85_v6 = vpop.permute.xlu1 %84  ;;  %v131_v7 = vpop.permute.xlu0 %130 }
  0x8c   :  { %v87_v24 = vsel %vm86_vm0, %v83_v4, %v85_v6  ;;  %v90_v25 = vsel %vm86_vm0, %v85_v6, %v79_v5 }
  0x8d   :  { %418 = vrot.lane.b32.xlu1 %v2697_v3, %s2585_s10  ;;  %416 = vrot.lane.b32.xlu0 %v2685_v1, %s2585_s10  ;;  %v100_v38 = vmul.f32 %v92_v16, %v90_v25  ;;  %v103_v39 = vmul.f32 %v97_v21, %v87_v24 }
  0x8f   :  { %v133_v9 = vpop.permute.xlu1 %132  ;;  %v81_v10 = vpop.permute.xlu0 %80  ;;  %v1304_v55 = vrot.slane %v100_v38, 4  ;;  %v1307_v56 = vrot.slane %v103_v39, 4  ;;  %v196_v39 = vld [vmem:[#allocation2 + $0x50] sm:$0xff] }
  0x90   :  { %v141_v27 = vsel %vm138_vm1, %v131_v7, %v133_v9  ;;  %v89_v28 = vsel %vm86_vm0, %v79_v5, %v81_v10  ;;  %v88_v32 = vsel %vm86_vm0, %v81_v10, %v83_v4  ;;  %vm424_vm0 = vcmp.lt.s32.totalorder %v2759_v11, 19 }
  0x91   :  { %422 = vrot.lane.b32.xlu1 %v2691_v2, %s2585_s10  ;;  %420 = vrot.lane.b32.xlu0 %v2680_v0, %s2585_s10  ;;  %v153_v42 = vmul.f32 %v148_v26, %v141_v27  ;;  %v101_v43 = vmul.f32 %v96_v22, %v89_v28  ;;  %v102_v45 = vmul.f32 %v93_v14, %v88_v32  ;;  %s2604_s10 = smov 97  }
  0x93   :  { %v137_v12 = vpop.permute.xlu1 %136  ;;  %v135_v13 = vpop.permute.xlu0 %134  ;;  %v1317_v59 = vrot.slane %v153_v42, 4  ;;  %v1305_v60 = vrot.slane %v101_v43, 4  ;;  %v1306_v63 = vrot.slane %v102_v45, 4  ;;  %v249_v42 = vld [vmem:[#allocation2 + $0x78] sm:$0xff]  ;;  %v200_v45 = vcombine.high %v196_v39, %v196_v39 }
  0x94   :  { %v142_v33 = vsel %vm138_vm1, %v137_v12, %v131_v7  ;;  %v140_v40 = vsel %vm138_vm1, %v133_v9, %v135_v13  ;;  %v139_v47 = vsel %vm138_vm1, %v135_v13, %v137_v12  ;;  %vm502_vm1 = vcmp.lt.s32.totalorder %v2759_v11, 16 }
  0x95   :  { %496 = vrot.lane.b32.xlu1 %v2697_v3, %s2569_s12  ;;  %494 = vrot.lane.b32.xlu0 %v2685_v1, %s2569_s12  ;;  %v152_v46 = vmul.f32 %v144_v15, %v142_v33  ;;  %v154_v49 = vmul.f32 %v145_v17, %v140_v40  ;;  %v155_v61 = vmul.f32 %v149_v29, %v139_v47  ;;  %v248_v40 = vld [vmem:[#allocation2 + $0x70] sm:$0xff]  ;;  %v171_v47 = vld [vmem:[#allocation2 + $0x48] sm:$0xff] }
  0x97   :  { %v54_v18 = vpop.permute.xlu1 %53  ;;  %v52_v20 = vpop.permute.xlu0 %51  ;;  %v1316_v4 = vrot.slane %v152_v46, 4  ;;  %v1318_v7 = vrot.slane %v154_v49, 4  ;;  %v170_v46 = vld [vmem:[#allocation2 + $0x40] sm:$0xff] }
  0x98   :  { %v64_v41 = vsel %vm61_vm2, %v52_v20, %v54_v18 }
  0x99   :  { %500 = vrot.lane.b32.xlu1 %v2691_v2, %s2569_s12  ;;  %498 = vrot.lane.b32.xlu0 %v2680_v0, %s2569_s12  ;;  %v75_v50 = vmul.f32 %v70_v30, %v64_v41  ;;  %v197_v41 = vld [vmem:[#allocation2 + $0x58] sm:$0xff] }
  0x9b   :  { %v58_v34 = vpop.permute.xlu1 %57  ;;  %v56_v36 = vpop.permute.xlu0 %55  ;;  %v1398_v12 = vsel %vm1396_vm3, %v75_v50, %v1305_v60  ;;  %v252_v50 = vcombine.high %v248_v40, %v248_v40  ;;  %v175_v60 = vcombine.high %v171_v47, %v171_v47 }
  0x9c   :  { %v65_v51 = vsel %vm61_vm2, %v58_v34, %v52_v20  ;;  %v62_v52 = vsel %vm61_vm2, %v56_v36, %v58_v34  ;;  %v63_v57 = vsel %vm61_vm2, %v54_v18, %v56_v36  ;;  %v1319_v18 = vrot.slane %v155_v61, 4 }
  0x9d   :  { %548 = vrot.lane.b32.xlu1 %v2697_v3, %s2586_s13  ;;  %546 = vrot.lane.b32.xlu0 %v2685_v1, %s2586_s13  ;;  %v74_v5 = vmul.f32 %v66_v19, %v65_v51  ;;  %v77_v6 = vmul.f32 %v71_v35, %v62_v52  ;;  %v76_v8 = vmul.f32 %v67_v23, %v63_v57  ;;  %vm554_vm2 = vcmp.lt.s32.totalorder %v2759_v11, 14 }
  0x9e   :  { %v201_v51 = vcombine.high %v197_v41, %v197_v41 }
  0x9f   :  { %v107_v53 = vpop.permute.xlu1 %106  ;;  %v105_v54 = vpop.permute.xlu0 %104  ;;  %v1397_v22 = vsel %vm1396_vm3, %v74_v5, %v1304_v55  ;;  %v1400_v23 = vsel %vm1396_vm3, %v77_v6, %v1307_v56  ;;  %v1399_v28 = vsel %vm1396_vm3, %v76_v8, %v1306_v63  ;;  %v222_v55 = vld [vmem:[#allocation2 + $0x60] sm:$0xff] }
  0xa0   :  { %v115_v58 = vsel %vm112_vm4, %v105_v54, %v107_v53 }
  0xa1   :  { %v127_v62 = vmul.f32 %v122_v44, %v115_v58  ;;  %552 = vrot.lane.b32.xlu1 %v2691_v2, %s2586_s13  ;;  %550 = vrot.lane.b32.xlu0 %v2680_v0, %s2586_s13  ;;  %v174_v58 = vcombine.high %v170_v46, %v170_v46  ;;  %s2605_s13 = smov 95  }
  0xa3   :  { %v111_v9 = vpop.permute.xlu1 %110  ;;  %v109_v10 = vpop.permute.xlu0 %108  ;;  %v1402_v13 = vsel %vm1396_vm3, %v127_v62, %v1317_v59  ;;  %v223_v62 = vld [vmem:[#allocation2 + $0x68] sm:$0xff] }
  0xa4   :  { %v116_v14 = vsel %vm112_vm4, %v111_v9, %v105_v54  ;;  %v113_v15 = vsel %vm112_vm4, %v109_v10, %v111_v9  ;;  %v114_v16 = vsel %vm112_vm4, %v107_v53, %v109_v10  ;;  %v1686_v17 = vpack.c.bf16 %v1402_v13, %v1398_v12 }
  0xa5   :  { %v126_v19 = vmul.f32 %v118_v31, %v116_v14  ;;  %v128_v20 = vmul.f32 %v119_v37, %v114_v16  ;;  %v129_v21 = vmul.f32 %v123_v48, %v113_v15  ;;  %470 = vrot.lane.b32.xlu1 %v2697_v3, %s2587_s14  ;;  %468 = vrot.lane.b32.xlu0 %v2685_v1, %s2587_s14  ;;  %vm476_vm4 = vcmp.lt.s32.totalorder %v2759_v11, 17 }
  0xa6   :  { %1777 = vmatprep.subr.bf16.mxu0 %v1686_v17  ;;  %v253_v54 = vcombine.high %v249_v42, %v249_v42  ;;  %v226_v9 = vcombine.high %v222_v55, %v222_v55  ;;  %v227_v14 = vcombine.high %v223_v62, %v223_v62 }
  0xa7   :  { %v185_v24 = vpop.permute.xlu1 %184  ;;  %v183_v25 = vpop.permute.xlu0 %182  ;;  %v1401_v26 = vsel %vm1396_vm3, %v126_v19, %v1316_v4  ;;  %v1404_v27 = vsel %vm1396_vm3, %v129_v21, %v1319_v18  ;;  %v1403_v29 = vsel %vm1396_vm3, %v128_v20, %v1318_v7 }
  0xa8   :  { %v1685_v30 = vpack.c.bf16 %v1401_v26, %v1397_v22  ;;  %v1688_v31 = vpack.c.bf16 %v1404_v27, %v1400_v23  ;;  %v1687_v32 = vpack.c.bf16 %v1403_v29, %v1399_v28  ;;  %v193_v48 = vsel %vm190_vm5, %v183_v25, %v185_v24 }
  0xa9   :  { %474 = vrot.lane.b32.xlu1 %v2691_v2, %s2587_s14  ;;  %472 = vrot.lane.b32.xlu0 %v2680_v0, %s2587_s14  ;;  %v205_v63 = vmul.f32 %v200_v45, %v193_v48  ;;  %s2606_s14 = smov 98  }
  0xaa   :  { %1778 = vmatpush1.bf16.msra.mxu0 %v1685_v30  ;;  %1820 = vmatprep.subr.bf16.mxu1 %v1688_v31 }
  0xab   :  { %v189_v33 = vpop.permute.xlu1 %188  ;;  %1821 = vmatpush1.bf16.msra.mxu1 %v1687_v32  ;;  %v187_v34 = vpop.permute.xlu0 %186  ;;  %v1329_v21 = vrot.slane %v205_v63, 4 }
  0xac   :  { %v194_v49 = vsel %vm190_vm5, %v189_v33, %v183_v25  ;;  %v192_v52 = vsel %vm190_vm5, %v185_v24, %v187_v34  ;;  %v191_v56 = vsel %vm190_vm5, %v187_v34, %v189_v33  ;;  %vm528_vm5 = vcmp.lt.s32.totalorder %v2759_v11, 15 }
  0xad   :  { %522 = vrot.lane.b32.xlu1 %v2697_v3, %s2588_s15  ;;  %520 = vrot.lane.b32.xlu0 %v2685_v1, %s2588_s15  ;;  %v204_v4 = vmul.f32 %v196_v39, %v194_v49  ;;  %v206_v7 = vmul.f32 %v197_v41, %v192_v52  ;;  %v207_v10 = vmul.f32 %v201_v51, %v191_v56 }
  0xaf   :  { %v237_v35 = vpop.permute.xlu1 %236  ;;  %v235_v36 = vpop.permute.xlu0 %234  ;;  %v1328_v22 = vrot.slane %v204_v4, 4  ;;  %v1330_v25 = vrot.slane %v206_v7, 4  ;;  %v1331_v29 = vrot.slane %v207_v10, 4  ;;  %v300_v4 = vld [vmem:[#allocation2 + $0x90] sm:$0xff]  ;;  %v353_v7 = vld [vmem:[#allocation2 + $0xb8] sm:$0xff] }
  0xb0   :  { %v245_v53 = vsel %vm242_vm6, %v235_v36, %v237_v35  ;;  %v304_v10 = vcombine.high %v300_v4, %v300_v4 }
  0xb1   :  { %526 = vrot.lane.b32.xlu1 %v2691_v2, %s2588_s15  ;;  %524 = vrot.lane.b32.xlu0 %v2680_v0, %s2588_s15  ;;  %v257_v8 = vmul.f32 %v252_v50, %v245_v53  ;;  %s2607_s15 = smov 96  }
  0xb3   :  { %v241_v37 = vpop.permute.xlu1 %240  ;;  %v239_v38 = vpop.permute.xlu0 %238  ;;  %v1341_v26 = vrot.slane %v257_v8, 4 }
  0xb4   :  { %v246_v57 = vsel %vm242_vm6, %v241_v37, %v235_v36  ;;  %v244_v5 = vsel %vm242_vm6, %v237_v35, %v239_v38  ;;  %v243_v13 = vsel %vm242_vm6, %v239_v38, %v241_v37  ;;  %vm606_vm6 = vcmp.lt.s32.totalorder %v2759_v11, 3 }
  0xb5   :  { %600 = vrot.lane.b32.xlu1 %v2697_v3, %s2589_s16  ;;  %598 = vrot.lane.b32.xlu0 %v2685_v1, %s2589_s16  ;;  %v256_v12 = vmul.f32 %v248_v40, %v246_v57  ;;  %v258_v15 = vmul.f32 %v249_v42, %v244_v5  ;;  %v259_v27 = vmul.f32 %v253_v54, %v243_v13  ;;  %v352_v5 = vld [vmem:[#allocation2 + $0xb0] sm:$0xff]  ;;  %v275_v13 = vld [vmem:[#allocation2 + $0x88] sm:$0xff] }
  0xb7   :  { %v159_v43 = vpop.permute.xlu1 %158  ;;  %v157_v44 = vpop.permute.xlu0 %156  ;;  %v1340_v30 = vrot.slane %v256_v12, 4  ;;  %v1342_v33 = vrot.slane %v258_v15, 4  ;;  %v274_v12 = vld [vmem:[#allocation2 + $0x80] sm:$0xff] }
  0xb8   :  { %v167_v6 = vsel %vm164_vm7, %v157_v44, %v159_v43 }
  0xb9   :  { %604 = vrot.lane.b32.xlu1 %v2691_v2, %s2589_s16  ;;  %602 = vrot.lane.b32.xlu0 %v2680_v0, %s2589_s16  ;;  %v179_v16 = vmul.f32 %v174_v58, %v167_v6  ;;  %v301_v6 = vld [vmem:[#allocation2 + $0x98] sm:$0xff]  ;;  %s2608_s16 = smov 93  }
  0xbb   :  { %v163_v59 = vpop.permute.xlu1 %162  ;;  %v161_v61 = vpop.permute.xlu0 %160  ;;  %v1406_v37 = vsel %vm1396_vm3, %v179_v16, %v1329_v21  ;;  %v356_v16 = vcombine.high %v352_v5, %v352_v5  ;;  %v326_v21 = vld [vmem:[#allocation2 + $0xa0] sm:$0xff] }
  0xbc   :  { %v168_v17 = vsel %vm164_vm7, %v163_v59, %v157_v44  ;;  %v165_v18 = vsel %vm164_vm7, %v161_v61, %v163_v59  ;;  %v166_v23 = vsel %vm164_vm7, %v159_v43, %v161_v61  ;;  %v1343_v43 = vrot.slane %v259_v27, 4 }
  0xbd   :  { %652 = vrot.lane.b32.xlu1 %v2697_v3, %s2590_s17  ;;  %650 = vrot.lane.b32.xlu0 %v2685_v1, %s2590_s17  ;;  %v178_v31 = vmul.f32 %v170_v46, %v168_v17  ;;  %v181_v32 = vmul.f32 %v175_v60, %v165_v18  ;;  %v180_v34 = vmul.f32 %v171_v47, %v166_v23  ;;  %vm658_vm7 = vcmp.lt.s32.totalorder %v2759_v11, 1 }
  0xbe   :  { %v305_v17 = vcombine.high %v301_v6, %v301_v6 }
  0xbf   :  { %v211_v19 = vpop.permute.xlu1 %210  ;;  %v209_v20 = vpop.permute.xlu0 %208  ;;  %v1405_v47 = vsel %vm1396_vm3, %v178_v31, %v1328_v22  ;;  %v1408_v48 = vsel %vm1396_vm3, %v181_v32, %v1331_v29  ;;  %v1407_v53 = vsel %vm1396_vm3, %v180_v34, %v1330_v25 }
  0xc0   :  { %v219_v24 = vsel %vm216_vm8, %v209_v20, %v211_v19 }
  0xc1   :  { %v231_v28 = vmul.f32 %v226_v9, %v219_v24  ;;  %656 = vrot.lane.b32.xlu1 %v2691_v2, %s2590_s17  ;;  %654 = vrot.lane.b32.xlu0 %v2680_v0, %s2590_s17  ;;  %v278_v24 = vcombine.high %v274_v12, %v274_v12  ;;  %s2609_s17 = smov 82  }
  0xc3   :  { %v215_v35 = vpop.permute.xlu1 %214  ;;  %v213_v36 = vpop.permute.xlu0 %212  ;;  %v1410_v38 = vsel %vm1396_vm3, %v231_v28, %v1341_v26  ;;  %v279_v26 = vcombine.high %v275_v13, %v275_v13  ;;  %v327_v28 = vld [vmem:[#allocation2 + $0xa8] sm:$0xff] }
  0xc4   :  { %v220_v39 = vsel %vm216_vm8, %v215_v35, %v209_v20  ;;  %v217_v40 = vsel %vm216_vm8, %v213_v36, %v215_v35  ;;  %v218_v41 = vsel %vm216_vm8, %v211_v19, %v213_v36  ;;  %v1690_v42 = vpack.c.bf16 %v1410_v38, %v1406_v37 }
  0xc5   :  { %v230_v44 = vmul.f32 %v222_v55, %v220_v39  ;;  %v232_v45 = vmul.f32 %v223_v62, %v218_v41  ;;  %v233_v46 = vmul.f32 %v227_v14, %v217_v40  ;;  %574 = vrot.lane.b32.xlu1 %v2697_v3, %s2591_s18  ;;  %572 = vrot.lane.b32.xlu0 %v2685_v1, %s2591_s18  ;;  %vm580_vm8 = vcmp.lt.s32.totalorder %v2759_v11, 13 }
  0xc6   :  { %1779 = vmatprep.subr.bf16.mxu0 %v1690_v42  ;;  %v357_v20 = vcombine.high %v353_v7, %v353_v7  ;;  %v330_v35 = vcombine.high %v326_v21, %v326_v21  ;;  %v331_v39 = vcombine.high %v327_v28, %v327_v28 }
  0xc7   :  { %v289_v49 = vpop.permute.xlu1 %288  ;;  %v287_v50 = vpop.permute.xlu0 %286  ;;  %v1409_v51 = vsel %vm1396_vm3, %v230_v44, %v1340_v30  ;;  %v1412_v52 = vsel %vm1396_vm3, %v233_v46, %v1343_v43  ;;  %v1411_v54 = vsel %vm1396_vm3, %v232_v45, %v1342_v33 }
  0xc8   :  { %v1689_v55 = vpack.c.bf16 %v1409_v51, %v1405_v47  ;;  %v1692_v56 = vpack.c.bf16 %v1412_v52, %v1408_v48  ;;  %v1691_v57 = vpack.c.bf16 %v1411_v54, %v1407_v53  ;;  %v297_v14 = vsel %vm294_vm9, %v287_v50, %v289_v49 }
  0xc9   :  { %578 = vrot.lane.b32.xlu1 %v2691_v2, %s2591_s18  ;;  %576 = vrot.lane.b32.xlu0 %v2680_v0, %s2591_s18  ;;  %v309_v29 = vmul.f32 %v304_v10, %v297_v14  ;;  %s2610_s18 = smov 94  }
  0xca   :  { %1780 = vmatpush1.bf16.msra.mxu0 %v1689_v55  ;;  %1822 = vmatprep.subr.bf16.mxu1 %v1692_v56 }
  0xcb   :  { %v293_v58 = vpop.permute.xlu1 %292  ;;  %1823 = vmatpush1.bf16.msra.mxu1 %v1691_v57  ;;  %v291_v59 = vpop.permute.xlu0 %290  ;;  %v1353_v46 = vrot.slane %v309_v29, 4 }
  0xcc   :  { %v298_v15 = vsel %vm294_vm9, %v293_v58, %v287_v50  ;;  %v296_v18 = vsel %vm294_vm9, %v289_v49, %v291_v59  ;;  %v295_v22 = vsel %vm294_vm9, %v291_v59, %v293_v58  ;;  %vm632_vm9 = vcmp.lt.s32.totalorder %v2759_v11, 2 }
  0xcd   :  { %626 = vrot.lane.b32.xlu1 %v2697_v3, %s2592_s19  ;;  %624 = vrot.lane.b32.xlu0 %v2685_v1, %s2592_s19  ;;  %v308_v30 = vmul.f32 %v300_v4, %v298_v15  ;;  %v310_v33 = vmul.f32 %v301_v6, %v296_v18  ;;  %v311_v36 = vmul.f32 %v305_v17, %v295_v22 }
  0xcf   :  { %v341_v60 = vpop.permute.xlu1 %340  ;;  %v339_v61 = vpop.permute.xlu0 %338  ;;  %v1352_v47 = vrot.slane %v308_v30, 4  ;;  %v1354_v50 = vrot.slane %v310_v33, 4  ;;  %v1355_v54 = vrot.slane %v311_v36, 4  ;;  %v404_v30 = vld [vmem:[#allocation2 + $0xd0] sm:$0xff]  ;;  %v457_v33 = vld [vmem:[#allocation2 + $0xf8] sm:$0xff] }
  0xd0   :  { %v349_v19 = vsel %vm346_vm10, %v339_v61, %v341_v60  ;;  %v408_v36 = vcombine.high %v404_v30, %v404_v30 }
  0xd1   :  { %630 = vrot.lane.b32.xlu1 %v2691_v2, %s2592_s19  ;;  %628 = vrot.lane.b32.xlu0 %v2680_v0, %s2592_s19  ;;  %v361_v34 = vmul.f32 %v356_v16, %v349_v19  ;;  %s2611_s19 = smov 83  }
  0xd3   :  { %v345_v62 = vpop.permute.xlu1 %344  ;;  %v343_v63 = vpop.permute.xlu0 %342  ;;  %v1365_v51 = vrot.slane %v361_v34, 4 }
  0xd4   :  { %v350_v23 = vsel %vm346_vm10, %v345_v62, %v339_v61  ;;  %v348_v31 = vsel %vm346_vm10, %v341_v60, %v343_v63  ;;  %v347_v38 = vsel %vm346_vm10, %v343_v63, %v345_v62  ;;  %vm684_vm10 = vcmp.lt.s32.totalorder %v2759_v11, 127 }
  0xd5   :  { %678 = vrot.lane.b32.xlu1 %v2697_v3, %s2593_s1  ;;  %676 = vrot.lane.b32.xlu0 %v2685_v1, %s2593_s1  ;;  %v360_v37 = vmul.f32 %v352_v5, %v350_v23  ;;  %v362_v40 = vmul.f32 %v353_v7, %v348_v31  ;;  %v363_v52 = vmul.f32 %v357_v20, %v347_v38  ;;  %v456_v31 = vld [vmem:[#allocation2 + $0xf0] sm:$0xff]  ;;  %v379_v38 = vld [vmem:[#allocation2 + $0xc8] sm:$0xff] }
  0xd7   :  { %v263_v8 = vpop.permute.xlu1 %262  ;;  %v261_v9 = vpop.permute.xlu0 %260  ;;  %v1364_v55 = vrot.slane %v360_v37, 4  ;;  %v1366_v58 = vrot.slane %v362_v40, 4  ;;  %v378_v37 = vld [vmem:[#allocation2 + $0xc0] sm:$0xff] }
  0xd8   :  { %v271_v32 = vsel %vm268_vm11, %v261_v9, %v263_v8 }
  0xd9   :  { %682 = vrot.lane.b32.xlu1 %v2691_v2, %s2593_s1  ;;  %680 = vrot.lane.b32.xlu0 %v2680_v0, %s2593_s1  ;;  %v283_v41 = vmul.f32 %v278_v24, %v271_v32  ;;  %v405_v32 = vld [vmem:[#allocation2 + $0xd8] sm:$0xff]  ;;  %s2612_s1 = smov 80  }
  0xdb   :  { %v267_v25 = vpop.permute.xlu1 %266  ;;  %v265_v27 = vpop.permute.xlu0 %264  ;;  %v1414_v62 = vsel %vm1396_vm3, %v283_v41, %v1353_v46  ;;  %v460_v41 = vcombine.high %v456_v31, %v456_v31  ;;  %v430_v46 = vld [vmem:[#allocation2 + $0xe0] sm:$0xff] }
  0xdc   :  { %v272_v42 = vsel %vm268_vm11, %v267_v25, %v261_v9  ;;  %v269_v43 = vsel %vm268_vm11, %v265_v27, %v267_v25  ;;  %v270_v48 = vsel %vm268_vm11, %v263_v8, %v265_v27  ;;  %v1367_v8 = vrot.slane %v363_v52, 4 }
  0xdd   :  { %730 = vrot.lane.b32.xlu1 %v2697_v3, %s2594_s20  ;;  %728 = vrot.lane.b32.xlu0 %v2685_v1, %s2594_s20  ;;  %v282_v56 = vmul.f32 %v274_v12, %v272_v42  ;;  %v285_v57 = vmul.f32 %v279_v26, %v269_v43  ;;  %v284_v59 = vmul.f32 %v275_v13, %v270_v48  ;;  %vm736_vm11 = vcmp.lt.s32.totalorder %v2759_v11, 125 }
  0xde   :  { %v409_v42 = vcombine.high %v405_v32, %v405_v32 }
  0xdf   :  { %v315_v44 = vpop.permute.xlu1 %314  ;;  %v313_v45 = vpop.permute.xlu0 %312  ;;  %v1413_v13 = vsel %vm1396_vm3, %v282_v56, %v1352_v47  ;;  %v1416_v14 = vsel %vm1396_vm3, %v285_v57, %v1355_v54  ;;  %v1415_v19 = vsel %vm1396_vm3, %v284_v59, %v1354_v50 }
  0xe0   :  { %v323_v49 = vsel %vm320_vm12, %v313_v45, %v315_v44 }
  0xe1   :  { %v335_v53 = vmul.f32 %v330_v35, %v323_v49  ;;  %734 = vrot.lane.b32.xlu1 %v2691_v2, %s2594_s20  ;;  %732 = vrot.lane.b32.xlu0 %v2680_v0, %s2594_s20  ;;  %v382_v49 = vcombine.high %v378_v37, %v378_v37  ;;  %s2613_s20 = smov 78  }
  0xe3   :  { %v319_v60 = vpop.permute.xlu1 %318  ;;  %v317_v61 = vpop.permute.xlu0 %316  ;;  %v1418_v63 = vsel %vm1396_vm3, %v335_v53, %v1365_v51  ;;  %v383_v51 = vcombine.high %v379_v38, %v379_v38  ;;  %v431_v53 = vld [vmem:[#allocation2 + $0xe8] sm:$0xff] }
  0xe4   :  { %v324_v4 = vsel %vm320_vm12, %v319_v60, %v313_v45  ;;  %v321_v5 = vsel %vm320_vm12, %v317_v61, %v319_v60  ;;  %v322_v6 = vsel %vm320_vm12, %v315_v44, %v317_v61  ;;  %v1694_v7 = vpack.c.bf16 %v1418_v63, %v1414_v62 }
  0xe5   :  { %v334_v9 = vmul.f32 %v326_v21, %v324_v4  ;;  %v336_v10 = vmul.f32 %v327_v28, %v322_v6  ;;  %v337_v12 = vmul.f32 %v331_v39, %v321_v5  ;;  %704 = vrot.lane.b32.xlu1 %v2697_v3, %s2595_s21  ;;  %702 = vrot.lane.b32.xlu0 %v2685_v1, %s2595_s21  ;;  %vm710_vm12 = vcmp.lt.s32.totalorder %v2759_v11, 126 }
  0xe6   :  { %1781 = vmatprep.subr.bf16.mxu0 %v1694_v7  ;;  %v461_v45 = vcombine.high %v457_v33, %v457_v33  ;;  %v434_v60 = vcombine.high %v430_v46, %v430_v46  ;;  %v435_v4 = vcombine.high %v431_v53, %v431_v53 }
  0xe7   :  { %v393_v15 = vpop.permute.xlu1 %392  ;;  %v391_v16 = vpop.permute.xlu0 %390  ;;  %v1417_v17 = vsel %vm1396_vm3, %v334_v9, %v1364_v55  ;;  %v1420_v18 = vsel %vm1396_vm3, %v337_v12, %v1367_v8  ;;  %v1419_v20 = vsel %vm1396_vm3, %v336_v10, %v1366_v58 }
  0xe8   :  { %v1693_v21 = vpack.c.bf16 %v1417_v17, %v1413_v13  ;;  %v1696_v22 = vpack.c.bf16 %v1420_v18, %v1416_v14  ;;  %v1695_v23 = vpack.c.bf16 %v1419_v20, %v1415_v19  ;;  %v401_v39 = vsel %vm398_vm13, %v391_v16, %v393_v15 }
  0xe9   :  { %708 = vrot.lane.b32.xlu1 %v2691_v2, %s2595_s21  ;;  %706 = vrot.lane.b32.xlu0 %v2680_v0, %s2595_s21  ;;  %v413_v54 = vmul.f32 %v408_v36, %v401_v39  ;;  %v2995_v36 = vld [vmem:[%s3530_s0] sm:$0xff]  ;;  %s2614_s21 = smov 81  }
  0xea   :  { %1782 = vmatpush1.bf16.msra.mxu0 %v1693_v21  ;;  %1824 = vmatprep.subr.bf16.mxu1 %v1696_v22 }
  0xeb   :  { %v397_v24 = vpop.permute.xlu1 %396  ;;  %1825 = vmatpush1.bf16.msra.mxu1 %v1695_v23  ;;  %v395_v25 = vpop.permute.xlu0 %394 }
  0xec   :  { %v402_v40 = vsel %vm398_vm13, %v397_v24, %v391_v16  ;;  %v400_v43 = vsel %vm398_vm13, %v393_v15, %v395_v25  ;;  %v399_v47 = vsel %vm398_vm13, %v395_v25, %v397_v24  ;;  %vm840_vm13 = vcmp.lt.s32.totalorder %v2759_v11, 112 }
  0xed   :  { %782 = vrot.lane.b32.xlu1 %v2697_v3, %s2596_s22  ;;  %780 = vrot.lane.b32.xlu0 %v2685_v1, %s2596_s22  ;;  %v412_v55 = vmul.f32 %v404_v30, %v402_v40  ;;  %v414_v58 = vmul.f32 %v405_v32, %v400_v43  ;;  %v415_v61 = vmul.f32 %v409_v42, %v399_v47 }
  0xef   :  { %v445_v26 = vpop.permute.xlu1 %444  ;;  %v443_v27 = vpop.permute.xlu0 %442  ;;  %v1376_v12 = vrot.slane %v412_v55, 4  ;;  %v1378_v15 = vrot.slane %v414_v58, 4  ;;  %v1379_v19 = vrot.slane %v415_v61, 4  ;;  %v508_v55 = vld [vmem:[#allocation2 + $0x110] sm:$0xff]  ;;  %v561_v58 = vld [vmem:[#allocation2 + $0x138] sm:$0xff] }
  0xf0   :  { %v453_v44 = vsel %vm450_vm14, %v443_v27, %v445_v26  ;;  %v512_v61 = vcombine.high %v508_v55, %v508_v55 }
  0xf1   :  { %786 = vrot.lane.b32.xlu1 %v2691_v2, %s2596_s22  ;;  %784 = vrot.lane.b32.xlu0 %v2680_v0, %s2596_s22  ;;  %v465_v59 = vmul.f32 %v460_v41, %v453_v44  ;;  %s2615_s22 = smov 79  }
  0xf3   :  { %v449_v28 = vpop.permute.xlu1 %448  ;;  %v447_v29 = vpop.permute.xlu0 %446  ;;  %v1389_v16 = vrot.slane %v465_v59, 4 }
  0xf4   :  { %v454_v48 = vsel %vm450_vm14, %v449_v28, %v443_v27  ;;  %v452_v56 = vsel %vm450_vm14, %v445_v26, %v447_v29  ;;  %v451_v63 = vsel %vm450_vm14, %v447_v29, %v449_v28  ;;  %vm788_vm14 = vcmp.lt.s32.totalorder %v2759_v11, 114 }
  0xf5   :  { %834 = vrot.lane.b32.xlu1 %v2697_v3, %s2597_s23  ;;  %832 = vrot.lane.b32.xlu0 %v2685_v1, %s2597_s23  ;;  %v464_v62 = vmul.f32 %v456_v31, %v454_v48  ;;  %v466_v5 = vmul.f32 %v457_v33, %v452_v56  ;;  %v467_v17 = vmul.f32 %v461_v45, %v451_v63  ;;  %v3008_v48 = vld [vmem:[%s3530_s0 + $0x8] sm:$0xff]  ;;  %s2601_s0 = smov 99   ;;  %v560_v56 = vld [vmem:[#allocation2 + $0x130] sm:$0xff] }
  0xf6   :  { %v483_v63 = vld [vmem:[#allocation2 + $0x108] sm:$0xff] }
  0xf7   :  { %v367_v34 = vpop.permute.xlu1 %366  ;;  %v365_v35 = vpop.permute.xlu0 %364  ;;  %v1388_v20 = vrot.slane %v464_v62, 4  ;;  %v1390_v23 = vrot.slane %v466_v5, 4  ;;  %v1391_v32 = vrot.slane %v467_v17, 4  ;;  %v482_v62 = vld [vmem:[#allocation2 + $0x100] sm:$0xff] }
  0xf8   :  { %v375_v57 = vsel %vm372_vm15, %v365_v35, %v367_v34 }
  0xf9   :  { %838 = vrot.lane.b32.xlu1 %v2691_v2, %s2597_s23  ;;  %836 = vrot.lane.b32.xlu0 %v2680_v0, %s2597_s23  ;;  %v387_v6 = vmul.f32 %v382_v49, %v375_v57  ;;  %v509_v57 = vld [vmem:[#allocation2 + $0x118] sm:$0xff] }
  0xfb   :  { %v371_v50 = vpop.permute.xlu1 %370  ;;  %v369_v52 = vpop.permute.xlu0 %368 }
  0xfc   :  { %v376_v7 = vsel %vm372_vm15, %v371_v50, %v365_v35  ;;  %v373_v8 = vsel %vm372_vm15, %v369_v52, %v371_v50  ;;  %v374_v13 = vsel %vm372_vm15, %v367_v34, %v369_v52  ;;  %vm762_vm15 = vcmp.lt.s32.totalorder %v2759_v11, 115 }
  0xfd   :  { %756 = vrot.lane.b32.xlu1 %v2697_v3, %s2598_s24  ;;  %754 = vrot.lane.b32.xlu0 %v2685_v1, %s2598_s24  ;;  %v1377_v1 = vrot.slane %v413_v54, 4  ;;  %v386_v21 = vmul.f32 %v378_v37, %v376_v7  ;;  %v389_v22 = vmul.f32 %v383_v51, %v373_v8  ;;  %v388_v24 = vmul.f32 %v379_v38, %v374_v13 }
  0xfe   :  { %v513_v7 = vcombine.high %v509_v57, %v509_v57 }
  0xff   :  { %v419_v9 = vpop.permute.xlu1 %418  ;;  %v417_v10 = vpop.permute.xlu0 %416  ;;  %v1422_v27 = vsel %vm1396_vm3, %v387_v6, %v1377_v1  ;;  %v1421_v37 = vsel %vm1396_vm3, %v386_v21, %v1376_v12  ;;  %v1424_v38 = vsel %vm1396_vm3, %v389_v22, %v1379_v19  ;;  %v1423_v43 = vsel %vm1396_vm3, %v388_v24, %v1378_v15  ;;  %v534_v1 = vld [vmem:[#allocation2 + $0x120] sm:$0xff] }
 0x100   :  { %v427_v14 = vsel %vm424_vm0, %v417_v10, %v419_v9  ;;  %v564_v6 = vcombine.high %v560_v56, %v560_v56 }
 0x101   :  { %v439_v18 = vmul.f32 %v434_v60, %v427_v14  ;;  %760 = vrot.lane.b32.xlu1 %v2691_v2, %s2598_s24  ;;  %758 = vrot.lane.b32.xlu0 %v2680_v0, %s2598_s24  ;;  %v486_v14 = vcombine.high %v482_v62, %v482_v62 }
 0x103   :  { %v423_v25 = vpop.permute.xlu1 %422  ;;  %v421_v26 = vpop.permute.xlu0 %420  ;;  %v1426_v28 = vsel %vm1396_vm3, %v439_v18, %v1389_v16  ;;  %v487_v16 = vcombine.high %v483_v63, %v483_v63  ;;  %v535_v18 = vld [vmem:[#allocation2 + $0x128] sm:$0xff] }
 0x104   :  { %v428_v29 = vsel %vm424_vm0, %v423_v25, %v417_v10  ;;  %v425_v30 = vsel %vm424_vm0, %v421_v26, %v423_v25  ;;  %v426_v0 = vsel %vm424_vm0, %v419_v9, %v421_v26  ;;  %v1698_v31 = vpack.c.bf16 %v1426_v28, %v1422_v27 }
 0x105   :  { %v438_v33 = vmul.f32 %v430_v46, %v428_v29  ;;  %v440_v34 = vmul.f32 %v431_v53, %v426_v0  ;;  %v441_v35 = vmul.f32 %v435_v4, %v425_v30  ;;  %808 = vrot.lane.b32.xlu1 %v2697_v3, %s2599_s25  ;;  %806 = vrot.lane.b32.xlu0 %v2995_v36, %s2599_s25  ;;  %vm814_vm0 = vcmp.lt.s32.totalorder %v2759_v11, 113 }
 0x106   :  { %1783 = vmatprep.subr.bf16.mxu0 %v1698_v31  ;;  %v565_v10 = vcombine.high %v561_v58, %v561_v58  ;;  %v538_v25 = vcombine.high %v534_v1, %v534_v1  ;;  %v539_v29 = vcombine.high %v535_v18, %v535_v18 }
 0x107   :  { %v497_v39 = vpop.permute.xlu1 %496  ;;  %v495_v40 = vpop.permute.xlu0 %494  ;;  %v1425_v41 = vsel %vm1396_vm3, %v438_v33, %v1388_v20  ;;  %v1428_v42 = vsel %vm1396_vm3, %v441_v35, %v1391_v32  ;;  %v1427_v44 = vsel %vm1396_vm3, %v440_v34, %v1390_v23 }
 0x108   :  { %v1697_v45 = vpack.c.bf16 %v1425_v41, %v1421_v37  ;;  %v1700_v46 = vpack.c.bf16 %v1428_v42, %v1424_v38  ;;  %v1699_v47 = vpack.c.bf16 %v1427_v44, %v1423_v43  ;;  %v505_v4 = vsel %vm502_vm1, %v495_v40, %v497_v39 }
 0x109   :  { %812 = vrot.lane.b32.xlu1 %v2691_v2, %s2599_s25  ;;  %810 = vrot.lane.b32.xlu0 %v3008_v48, %s2599_s25  ;;  %v517_v19 = vmul.f32 %v512_v61, %v505_v4  ;;  %s2616_s25 = smov 77  }
 0x10a   :  { %1784 = vmatpush1.bf16.msra.mxu0 %v1697_v45  ;;  %1826 = vmatprep.subr.bf16.mxu1 %v1700_v46 }
 0x10b   :  { %v501_v49 = vpop.permute.xlu1 %500  ;;  %1827 = vmatpush1.bf16.msra.mxu1 %v1699_v47  ;;  %v499_v50 = vpop.permute.xlu0 %498  ;;  %v1434_v35 = vrot.slane %v517_v19, 4 }
 0x10c   :  { %v506_v5 = vsel %vm502_vm1, %v501_v49, %v495_v40  ;;  %v504_v8 = vsel %vm502_vm1, %v497_v39, %v499_v50  ;;  %v503_v12 = vsel %vm502_vm1, %v499_v50, %v501_v49  ;;  %vm1760_vm1 = vcmask 556032  }
 0x10d   :  { %886 = vrot.lane.b32.xlu1 %v2697_v3, %s2600_s30  ;;  %884 = vrot.lane.b32.xlu0 %v2995_v36, %s2600_s30  ;;  %v516_v20 = vmul.f32 %v508_v55, %v506_v5  ;;  %v518_v23 = vmul.f32 %v509_v57, %v504_v8  ;;  %v519_v26 = vmul.f32 %v513_v7, %v503_v12 }
 0x10f   :  { %v549_v51 = vpop.permute.xlu1 %548  ;;  %v547_v52 = vpop.permute.xlu0 %546  ;;  %v1433_v37 = vrot.slane %v516_v20, 4  ;;  %v1435_v40 = vrot.slane %v518_v23, 4  ;;  %v1436_v44 = vrot.slane %v519_v26, 4  ;;  %v612_v20 = vld [vmem:[#allocation2 + $0x150] sm:$0xff]  ;;  %v665_v23 = vld [vmem:[#allocation2 + $0x178] sm:$0xff] }
 0x110   :  { %v557_v9 = vsel %vm554_vm2, %v547_v52, %v549_v51  ;;  %v616_v26 = vcombine.high %v612_v20, %v612_v20 }
 0x111   :  { %890 = vrot.lane.b32.xlu1 %v2691_v2, %s2600_s30  ;;  %888 = vrot.lane.b32.xlu0 %v3008_v48, %s2600_s30  ;;  %v569_v24 = vmul.f32 %v564_v6, %v557_v9 }
 0x113   :  { %v553_v53 = vpop.permute.xlu1 %552  ;;  %v551_v54 = vpop.permute.xlu0 %550  ;;  %v1446_v41 = vrot.slane %v569_v24, 4 }
 0x114   :  { %v558_v13 = vsel %vm554_vm2, %v553_v53, %v547_v52  ;;  %v556_v21 = vsel %vm554_vm2, %v549_v51, %v551_v54  ;;  %v555_v28 = vsel %vm554_vm2, %v551_v54, %v553_v53  ;;  %vm944_vm2 = vcmp.lt.s32.totalorder %v2759_v11, 99 }
 0x115   :  { %938 = vrot.lane.b32.xlu1 %v2697_v3, %s2601_s0  ;;  %936 = vrot.lane.b32.xlu0 %v2995_v36, %s2601_s0  ;;  %v568_v27 = vmul.f32 %v560_v56, %v558_v13  ;;  %v570_v30 = vmul.f32 %v561_v58, %v556_v21  ;;  %v571_v42 = vmul.f32 %v565_v10, %v555_v28  ;;  %v664_v21 = vld [vmem:[#allocation2 + $0x170] sm:$0xff]  ;;  %v587_v28 = vld [vmem:[#allocation2 + $0x148] sm:$0xff] }
 0x117   :  { %v471_v59 = vpop.permute.xlu1 %470  ;;  %v469_v60 = vpop.permute.xlu0 %468  ;;  %v1445_v45 = vrot.slane %v568_v27, 4  ;;  %v1447_v49 = vrot.slane %v570_v30, 4  ;;  %v586_v27 = vld [vmem:[#allocation2 + $0x140] sm:$0xff] }
 0x118   :  { %v479_v22 = vsel %vm476_vm4, %v469_v60, %v471_v59 }
 0x119   :  { %942 = vrot.lane.b32.xlu1 %v2691_v2, %s2601_s0  ;;  %940 = vrot.lane.b32.xlu0 %v3008_v48, %s2601_s0  ;;  %v491_v0 = vmul.f32 %v486_v14, %v479_v22  ;;  %v613_v22 = vld [vmem:[#allocation2 + $0x158] sm:$0xff] }
 0x11b   :  { %v475_v15 = vpop.permute.xlu1 %474  ;;  %v473_v17 = vpop.permute.xlu0 %472  ;;  %v1526_v53 = vsel %vm1396_vm3, %v491_v0, %v1434_v35  ;;  %v668_v0 = vcombine.high %v664_v21, %v664_v21  ;;  %v638_v35 = vld [vmem:[#allocation2 + $0x160] sm:$0xff] }
 0x11c   :  { %v480_v31 = vsel %vm476_vm4, %v475_v15, %v469_v60  ;;  %v477_v32 = vsel %vm476_vm4, %v473_v17, %v475_v15  ;;  %v478_v38 = vsel %vm476_vm4, %v471_v59, %v473_v17  ;;  %v1448_v59 = vrot.slane %v571_v42, 4 }
 0x11d   :  { %860 = vrot.lane.b32.xlu1 %v2697_v3, %s2602_s8  ;;  %858 = vrot.lane.b32.xlu0 %v2995_v36, %s2602_s8  ;;  %v490_v46 = vmul.f32 %v482_v62, %v480_v31  ;;  %v493_v47 = vmul.f32 %v487_v16, %v477_v32  ;;  %v492_v50 = vmul.f32 %v483_v63, %v478_v38  ;;  %vm892_vm4 = vcmp.lt.s32.totalorder %v2759_v11, 110 }
 0x11e   :  { %v617_v31 = vcombine.high %v613_v22, %v613_v22 }
 0x11f   :  { %v523_v33 = vpop.permute.xlu1 %522  ;;  %v521_v34 = vpop.permute.xlu0 %520  ;;  %v1525_v63 = vsel %vm1396_vm3, %v490_v46, %v1433_v37  ;;  %v1528_v4 = vsel %vm1396_vm3, %v493_v47, %v1436_v44  ;;  %v1527_v9 = vsel %vm1396_vm3, %v492_v50, %v1435_v40 }
 0x120   :  { %v531_v39 = vsel %vm528_vm5, %v521_v34, %v523_v33 }
 0x121   :  { %v543_v43 = vmul.f32 %v538_v25, %v531_v39  ;;  %864 = vrot.lane.b32.xlu1 %v2691_v2, %s2602_s8  ;;  %862 = vrot.lane.b32.xlu0 %v3008_v48, %s2602_s8  ;;  %v590_v39 = vcombine.high %v586_v27, %v586_v27 }
 0x123   :  { %v527_v51 = vpop.permute.xlu1 %526  ;;  %v525_v52 = vpop.permute.xlu0 %524  ;;  %v1530_v54 = vsel %vm1396_vm3, %v543_v43, %v1446_v41  ;;  %v591_v41 = vcombine.high %v587_v28, %v587_v28  ;;  %v639_v43 = vld [vmem:[#allocation2 + $0x168] sm:$0xff] }
 0x124   :  { %v532_v55 = vsel %vm528_vm5, %v527_v51, %v521_v34  ;;  %v529_v56 = vsel %vm528_vm5, %v525_v52, %v527_v51  ;;  %v530_v57 = vsel %vm528_vm5, %v523_v33, %v525_v52  ;;  %v1702_v58 = vpack.c.bf16 %v1530_v54, %v1526_v53 }
 0x125   :  { %v542_v60 = vmul.f32 %v534_v1, %v532_v55  ;;  %v544_v61 = vmul.f32 %v535_v18, %v530_v57  ;;  %v545_v62 = vmul.f32 %v539_v29, %v529_v56  ;;  %912 = vrot.lane.b32.xlu1 %v2697_v3, %s2603_s9  ;;  %910 = vrot.lane.b32.xlu0 %v2995_v36, %s2603_s9  ;;  %vm866_vm5 = vcmp.lt.s32.totalorder %v2759_v11, 111 }
 0x126   :  { %1785 = vmatprep.subr.bf16.mxu0 %v1702_v58  ;;  %v669_v34 = vcombine.high %v665_v23, %v665_v23  ;;  %v642_v51 = vcombine.high %v638_v35, %v638_v35  ;;  %v643_v55 = vcombine.high %v639_v43, %v639_v43 }
 0x127   :  { %v601_v5 = vpop.permute.xlu1 %600  ;;  %v599_v6 = vpop.permute.xlu0 %598  ;;  %v1529_v7 = vsel %vm1396_vm3, %v542_v60, %v1445_v45  ;;  %v1532_v8 = vsel %vm1396_vm3, %v545_v62, %v1448_v59  ;;  %v1531_v10 = vsel %vm1396_vm3, %v544_v61, %v1447_v49 }
 0x128   :  { %v1701_v1 = vpack.c.bf16 %v1529_v7, %v1525_v63  ;;  %v1704_v12 = vpack.c.bf16 %v1532_v8, %v1528_v4  ;;  %v1703_v13 = vpack.c.bf16 %v1531_v10, %v1527_v9  ;;  %v609_v29 = vsel %vm606_vm6, %v599_v6, %v601_v5 }
 0x129   :  { %916 = vrot.lane.b32.xlu1 %v2691_v2, %s2603_s9  ;;  %914 = vrot.lane.b32.xlu0 %v3008_v48, %s2603_s9  ;;  %v621_v44 = vmul.f32 %v616_v26, %v609_v29 }
 0x12a   :  { %1786 = vmatpush1.bf16.msra.mxu0 %v1701_v1  ;;  %1828 = vmatprep.subr.bf16.mxu1 %v1704_v12 }
 0x12b   :  { %v605_v14 = vpop.permute.xlu1 %604  ;;  %1829 = vmatpush1.bf16.msra.mxu1 %v1703_v13  ;;  %v603_v15 = vpop.permute.xlu0 %602  ;;  %v1458_v62 = vrot.slane %v621_v44, 4  ;;  %v743_v44 = vld [vmem:[#allocation2 + $0x1b8] sm:$0xff] }
 0x12c   :  { %v610_v30 = vsel %vm606_vm6, %v605_v14, %v599_v6  ;;  %v608_v32 = vsel %vm606_vm6, %v601_v5, %v603_v15  ;;  %v607_v37 = vsel %vm606_vm6, %v603_v15, %v605_v14  ;;  %vm918_vm6 = vcmp.lt.s32.totalorder %v2759_v11, 109 }
 0x12d   :  { %990 = vrot.lane.b32.xlu1 %v2697_v3, %s2604_s10  ;;  %988 = vrot.lane.b32.xlu0 %v2995_v36, %s2604_s10  ;;  %v620_v45 = vmul.f32 %v612_v20, %v610_v30  ;;  %v622_v49 = vmul.f32 %v613_v22, %v608_v32  ;;  %v623_v52 = vmul.f32 %v617_v31, %v607_v37 }
 0x12f   :  { %v653_v16 = vpop.permute.xlu1 %652  ;;  %v651_v17 = vpop.permute.xlu0 %650  ;;  %v1457_v63 = vrot.slane %v620_v45, 4  ;;  %v1459_v6 = vrot.slane %v622_v49, 4  ;;  %v1460_v10 = vrot.slane %v623_v52, 4  ;;  %v690_v45 = vld [vmem:[#allocation2 + $0x190] sm:$0xff]  ;;  %v747_v52 = vcombine.high %v743_v44, %v743_v44 }
 0x130   :  { %v661_v33 = vsel %vm658_vm7, %v651_v17, %v653_v16  ;;  %v742_v49 = vld [vmem:[#allocation2 + $0x1b0] sm:$0xff] }
 0x131   :  { %994 = vrot.lane.b32.xlu1 %v2691_v2, %s2604_s10  ;;  %992 = vrot.lane.b32.xlu0 %v3008_v48, %s2604_s10  ;;  %v673_v50 = vmul.f32 %v668_v0, %v661_v33 }
 0x133   :  { %v657_v18 = vpop.permute.xlu1 %656  ;;  %v655_v19 = vpop.permute.xlu0 %654  ;;  %v1470_v7 = vrot.slane %v673_v50, 4 }
 0x134   :  { %v662_v38 = vsel %vm658_vm7, %v657_v18, %v651_v17  ;;  %v660_v46 = vsel %vm658_vm7, %v653_v16, %v655_v19  ;;  %v659_v54 = vsel %vm658_vm7, %v655_v19, %v657_v18  ;;  %vm1048_vm7 = vcmp.lt.s32.totalorder %v2759_v11, 95 }
 0x135   :  { %1042 = vrot.lane.b32.xlu1 %v2697_v3, %s2605_s13  ;;  %1040 = vrot.lane.b32.xlu0 %v2995_v36, %s2605_s13  ;;  %v672_v53 = vmul.f32 %v664_v21, %v662_v38  ;;  %v674_v56 = vmul.f32 %v665_v23, %v660_v46  ;;  %v675_v8 = vmul.f32 %v669_v34, %v659_v54 }
 0x136   :  { %v746_v54 = vcombine.high %v742_v49, %v742_v49 }
 0x137   :  { %v575_v24 = vpop.permute.xlu1 %574  ;;  %v573_v25 = vpop.permute.xlu0 %572  ;;  %v1469_v1 = vrot.slane %v672_v53, 4  ;;  %v1471_v14 = vrot.slane %v674_v56, 4 }
 0x138   :  { %v583_v47 = vsel %vm580_vm8, %v573_v25, %v575_v24 }
 0x139   :  { %1046 = vrot.lane.b32.xlu1 %v2691_v2, %s2605_s13  ;;  %1044 = vrot.lane.b32.xlu0 %v3008_v48, %s2605_s13  ;;  %v595_v57 = vmul.f32 %v590_v39, %v583_v47  ;;  %v694_v47 = vcombine.high %v690_v45, %v690_v45 }
 0x13b   :  { %v579_v40 = vpop.permute.xlu1 %578  ;;  %v577_v42 = vpop.permute.xlu0 %576  ;;  %v1534_v18 = vsel %vm1396_vm3, %v595_v57, %v1458_v62 }
 0x13c   :  { %v584_v58 = vsel %vm580_vm8, %v579_v40, %v573_v25  ;;  %v581_v59 = vsel %vm580_vm8, %v577_v42, %v579_v40  ;;  %v582_v4 = vsel %vm580_vm8, %v575_v24, %v577_v42  ;;  %v1472_v24 = vrot.slane %v675_v8, 4 }
 0x13d   :  { %964 = vrot.lane.b32.xlu1 %v2697_v3, %s2606_s14  ;;  %962 = vrot.lane.b32.xlu0 %v2995_v36, %s2606_s14  ;;  %v594_v12 = vmul.f32 %v586_v27, %v584_v58  ;;  %v597_v13 = vmul.f32 %v591_v41, %v581_v59  ;;  %v596_v15 = vmul.f32 %v587_v28, %v582_v4  ;;  %v691_v41 = vld [vmem:[#allocation2 + $0x198] sm:$0xff]  ;;  %v717_v4 = vld [vmem:[#allocation2 + $0x1a8] sm:$0xff]  ;;  %vm996_vm8 = vcmp.lt.s32.totalorder %v2759_v11, 97 }
 0x13e   :  { %v695_v46 = vcombine.high %v691_v41, %v691_v41 }
 0x13f   :  { %v627_v60 = vpop.permute.xlu1 %626  ;;  %v625_v61 = vpop.permute.xlu0 %624  ;;  %v1533_v28 = vsel %vm1396_vm3, %v594_v12, %v1457_v63  ;;  %v1536_v29 = vsel %vm1396_vm3, %v597_v13, %v1460_v10  ;;  %v1535_v33 = vsel %vm1396_vm3, %v596_v15, %v1459_v6  ;;  %v716_v10 = vld [vmem:[#allocation2 + $0x1a0] sm:$0xff]  ;;  %v721_v15 = vcombine.high %v717_v4, %v717_v4 }
 0x140   :  { %v635_v5 = vsel %vm632_vm9, %v625_v61, %v627_v60 }
 0x141   :  { %v647_v9 = vmul.f32 %v642_v51, %v635_v5  ;;  %968 = vrot.lane.b32.xlu1 %v2691_v2, %s2606_s14  ;;  %966 = vrot.lane.b32.xlu0 %v3008_v48, %s2606_s14 }
 0x143   :  { %v631_v16 = vpop.permute.xlu1 %630  ;;  %v629_v17 = vpop.permute.xlu0 %628  ;;  %v1538_v19 = vsel %vm1396_vm3, %v647_v9, %v1470_v7 }
 0x144   :  { %v636_v20 = vsel %vm632_vm9, %v631_v16, %v625_v61  ;;  %v633_v21 = vsel %vm632_vm9, %v629_v17, %v631_v16  ;;  %v634_v22 = vsel %vm632_vm9, %v627_v60, %v629_v17  ;;  %v1706_v23 = vpack.c.bf16 %v1538_v19, %v1534_v18 }
 0x145   :  { %v646_v25 = vmul.f32 %v638_v35, %v636_v20  ;;  %v648_v26 = vmul.f32 %v639_v43, %v634_v22  ;;  %v649_v27 = vmul.f32 %v643_v55, %v633_v21  ;;  %1016 = vrot.lane.b32.xlu1 %v2697_v3, %s2607_s15  ;;  %1014 = vrot.lane.b32.xlu0 %v2995_v36, %s2607_s15  ;;  %vm970_vm9 = vcmp.lt.s32.totalorder %v2759_v11, 98 }
 0x146   :  { %1787 = vmatprep.subr.bf16.mxu0 %v1706_v23  ;;  %v720_v16 = vcombine.high %v716_v10, %v716_v10 }
 0x147   :  { %v679_v30 = vpop.permute.xlu1 %678  ;;  %v677_v0 = vpop.permute.xlu0 %676  ;;  %v1537_v31 = vsel %vm1396_vm3, %v646_v25, %v1469_v1  ;;  %v1540_v32 = vsel %vm1396_vm3, %v649_v27, %v1472_v24  ;;  %v1539_v34 = vsel %vm1396_vm3, %v648_v26, %v1471_v14 }
 0x148   :  { %v1705_v35 = vpack.c.bf16 %v1537_v31, %v1533_v28  ;;  %v1708_v37 = vpack.c.bf16 %v1540_v32, %v1536_v29  ;;  %v1707_v38 = vpack.c.bf16 %v1539_v34, %v1535_v33  ;;  %v687_v56 = vsel %vm684_vm10, %v677_v0, %v679_v30 }
 0x149   :  { %1020 = vrot.lane.b32.xlu1 %v2691_v2, %s2607_s15  ;;  %1018 = vrot.lane.b32.xlu0 %v3008_v48, %s2607_s15  ;;  %v698_v5 = vmul.f32 %v690_v45, %v687_v56  ;;  %v847_v56 = vld [vmem:[#allocation2 + $0x1f8] sm:$0xff] }
 0x14a   :  { %1788 = vmatpush1.bf16.msra.mxu0 %v1705_v35  ;;  %1830 = vmatprep.subr.bf16.mxu1 %v1708_v37 }
 0x14b   :  { %v683_v39 = vpop.permute.xlu1 %682  ;;  %1831 = vmatpush1.bf16.msra.mxu1 %v1707_v38  ;;  %v681_v40 = vpop.permute.xlu0 %680  ;;  %v1481_v20 = vrot.slane %v698_v5, 4  ;;  %v846_v5 = vld [vmem:[#allocation2 + $0x1f0] sm:$0xff] }
 0x14c   :  { %v688_v50 = vsel %vm684_vm10, %v683_v39, %v677_v0  ;;  %v686_v51 = vsel %vm684_vm10, %v679_v30, %v681_v40  ;;  %v685_v57 = vsel %vm684_vm10, %v681_v40, %v683_v39  ;;  %vm1022_vm10 = vcmp.lt.s32.totalorder %v2759_v11, 96 }
 0x14d   :  { %1094 = vrot.lane.b32.xlu1 %v2697_v3, %s2608_s16  ;;  %1092 = vrot.lane.b32.xlu0 %v2995_v36, %s2608_s16  ;;  %v701_v61 = vmul.f32 %v695_v46, %v688_v50  ;;  %v699_v62 = vmul.f32 %v694_v47, %v686_v51  ;;  %v700_v6 = vmul.f32 %v691_v41, %v685_v57 }
 0x14e   :  { %v1541_v45 = vsel %vm1396_vm3, %v2995_v36, %v1481_v20 }
 0x14f   :  { %v731_v42 = vpop.permute.xlu1 %730  ;;  %v729_v43 = vpop.permute.xlu0 %728  ;;  %v1484_v17 = vrot.slane %v701_v61, 4  ;;  %v1482_v18 = vrot.slane %v699_v62, 4  ;;  %v1483_v21 = vrot.slane %v700_v6, 4  ;;  %v769_v62 = vld [vmem:[#allocation2 + $0x1c8] sm:$0xff]  ;;  %v851_v6 = vcombine.high %v847_v56, %v847_v56 }
 0x150   :  { %v739_v58 = vsel %vm736_vm11, %v729_v43, %v731_v42 }
 0x151   :  { %1098 = vrot.lane.b32.xlu1 %v2691_v2, %s2608_s16  ;;  %1096 = vrot.lane.b32.xlu0 %v3008_v48, %s2608_s16  ;;  %v750_v7 = vmul.f32 %v742_v49, %v739_v58  ;;  %v1542_v33 = vsel %vm1396_vm3, %v2697_v3, %v1482_v18  ;;  %v1544_v34 = vsel %vm1396_vm3, %v2691_v2, %v1484_v17 }
 0x152   :  { %v1543_v41 = vsel %vm1396_vm3, %v3008_v48, %v1483_v21 }
 0x153   :  { %v735_v53 = vpop.permute.xlu1 %734  ;;  %v733_v55 = vpop.permute.xlu0 %732  ;;  %v1493_v22 = vrot.slane %v750_v7, 4 }
 0x154   :  { %v740_v59 = vsel %vm736_vm11, %v735_v53, %v729_v43  ;;  %v738_v60 = vsel %vm736_vm11, %v731_v42, %v733_v55  ;;  %v737_v63 = vsel %vm736_vm11, %v733_v55, %v735_v53  ;;  %v795_v55 = vld [vmem:[#allocation2 + $0x1d8] sm:$0xff]  ;;  %vm1152_vm11 = vcmp.lt.s32.totalorder %v2759_v11, 82 }
 0x155   :  { %1146 = vrot.lane.b32.xlu1 %v2697_v3, %s2609_s17  ;;  %1144 = vrot.lane.b32.xlu0 %v2995_v36, %s2609_s17  ;;  %v753_v8 = vmul.f32 %v747_v52, %v740_v59  ;;  %v751_v12 = vmul.f32 %v746_v54, %v738_v60  ;;  %v752_v14 = vmul.f32 %v743_v44, %v737_v63  ;;  %v794_v59 = vld [vmem:[#allocation2 + $0x1d0] sm:$0xff] }
 0x156   :  { %v799_v60 = vcombine.high %v795_v55, %v795_v55  ;;  %v798_v61 = vcombine.high %v794_v59, %v794_v59 }
 0x157   :  { %v705_v9 = vpop.permute.xlu1 %704  ;;  %v703_v1 = vpop.permute.xlu0 %702  ;;  %v1496_v23 = vrot.slane %v753_v8, 4  ;;  %v1494_v26 = vrot.slane %v751_v12, 4  ;;  %v1495_v30 = vrot.slane %v752_v14, 4 }
 0x158   :  { %v713_v13 = vsel %vm710_vm12, %v703_v1, %v705_v9 }
 0x159   :  { %1150 = vrot.lane.b32.xlu1 %v2691_v2, %s2609_s17  ;;  %1148 = vrot.lane.b32.xlu0 %v3008_v48, %s2609_s17  ;;  %v724_v19 = vmul.f32 %v716_v10, %v713_v13  ;;  %v768_v10 = vld [vmem:[#allocation2 + $0x1c0] sm:$0xff]  ;;  %v821_v13 = vld [vmem:[#allocation2 + $0x1e8] sm:$0xff] }
 0x15a   :  { %v772_v17 = vcombine.high %v768_v10, %v768_v10 }
 0x15b   :  { %v709_v24 = vpop.permute.xlu1 %708  ;;  %v707_v25 = vpop.permute.xlu0 %706  ;;  %v1545_v35 = vsel %vm1396_vm3, %v724_v19, %v1493_v22 }
 0x15c   :  { %v714_v27 = vsel %vm710_vm12, %v709_v24, %v703_v1  ;;  %v711_v28 = vsel %vm710_vm12, %v707_v25, %v709_v24  ;;  %v712_v29 = vsel %vm710_vm12, %v705_v9, %v707_v25  ;;  %v1709_v47 = vpack.c.bf16 %v1545_v35, %v1541_v45 }
 0x15d   :  { %v727_v0 = vmul.f32 %v721_v15, %v714_v27  ;;  %v725_v31 = vmul.f32 %v720_v16, %v712_v29  ;;  %v726_v32 = vmul.f32 %v717_v4, %v711_v28  ;;  %1068 = vrot.lane.b32.xlu1 %v2697_v3, %s2610_s18  ;;  %1066 = vrot.lane.b32.xlu0 %v2995_v36, %s2610_s18  ;;  %vm1100_vm12 = vcmp.lt.s32.totalorder %v2759_v11, 93 }
 0x15e   :  { %v850_v9 = vcombine.high %v846_v5, %v846_v5  ;;  %v773_v16 = vcombine.high %v769_v62, %v769_v62  ;;  %v825_v24 = vcombine.high %v821_v13, %v821_v13 }
 0x15f   :  { %v783_v37 = vpop.permute.xlu1 %782  ;;  %v781_v38 = vpop.permute.xlu0 %780  ;;  %v1546_v39 = vsel %vm1396_vm3, %v725_v31, %v1494_v26  ;;  %v1548_v40 = vsel %vm1396_vm3, %v727_v0, %v1496_v23  ;;  %v1547_v42 = vsel %vm1396_vm3, %v726_v32, %v1495_v30  ;;  %v820_v30 = vld [vmem:[#allocation2 + $0x1e0] sm:$0xff] }
 0x160   :  { %v1710_v43 = vpack.c.bf16 %v1546_v39, %v1542_v33  ;;  %v1712_v44 = vpack.c.bf16 %v1548_v40, %v1544_v34  ;;  %v1711_v46 = vpack.c.bf16 %v1547_v42, %v1543_v41  ;;  %v791_v18 = vsel %vm788_vm14, %v781_v38, %v783_v37 }
 0x161   :  { %1072 = vrot.lane.b32.xlu1 %v2691_v2, %s2610_s18  ;;  %1070 = vrot.lane.b32.xlu0 %v3008_v48, %s2610_s18  ;;  %v802_v31 = vmul.f32 %v794_v59, %v791_v18  ;;  %v824_v34 = vcombine.high %v820_v30, %v820_v30  ;;  %v2472_v18 = vld [vmem:[%s3532_s2 + $0x4] ss:$8 sps:$4 sm:$0xff]  }
 0x162   :  { %1789 = vmatprep.subr.bf16.mxu0 %v1710_v43  ;;  %1832 = vmatprep.subr.bf16.mxu1 %v1712_v44 }
 0x163   :  { %v787_v49 = vpop.permute.xlu1 %786  ;;  %1790 = vmatpush1.bf16.msra.mxu0 %v1709_v47  ;;  %1833 = vmatpush1.bf16.msra.mxu1 %v1711_v46  ;;  %v785_v50 = vpop.permute.xlu0 %784  ;;  %v1505_v59 = vrot.slane %v802_v31, 4  ;;  %v1739_v31 = vld [vmem:[%s3533_s3] sm:$0xff] }
 0x164   :  { %v792_v63 = vsel %vm788_vm14, %v787_v49, %v781_v38  ;;  %v790_v4 = vsel %vm788_vm14, %v783_v37, %v785_v50  ;;  %v789_v7 = vsel %vm788_vm14, %v785_v50, %v787_v49  ;;  %2290 = vmatprep.mubr.msk.bf16.mxu0 %vm1760_vm1, %v2472_v18  ;;  %2292 = vmatprep.mubr.msk.bf16.mxu1 %vm1760_vm1, %v2472_v18  ;;  %vm1126_vm14 = vcmp.lt.s32.totalorder %v2759_v11, 83 }
 0x165   :  { %1120 = vrot.lane.b32.xlu1 %v2697_v3, %s2611_s19  ;;  %1118 = vrot.lane.b32.xlu0 %v2995_v36, %s2611_s19  ;;  %v805_v19 = vmul.f32 %v799_v60, %v792_v63  ;;  %v803_v20 = vmul.f32 %v798_v61, %v790_v4  ;;  %v804_v21 = vmul.f32 %v795_v55, %v789_v7  ;;  %vm1178_vm1 = vcmp.lt.s32.totalorder %v2759_v11, 81 }
 0x167   :  { %v835_v51 = vpop.permute.xlu1 %834  ;;  %v833_v52 = vpop.permute.xlu0 %832  ;;  %v1508_v35 = vrot.slane %v805_v19, 4  ;;  %v1506_v37 = vrot.slane %v803_v20, 4  ;;  %v1507_v40 = vrot.slane %v804_v21, 4  ;;  %v899_v21 = vld [vmem:[#allocation2 + $0x218] sm:$0xff] }
 0x168   :  { %v843_v8 = vsel %vm840_vm13, %v833_v52, %v835_v51 }
 0x169   :  { %1124 = vrot.lane.b32.xlu1 %v2691_v2, %s2611_s19  ;;  %1122 = vrot.lane.b32.xlu0 %v3008_v48, %s2611_s19  ;;  %v854_v22 = vmul.f32 %v846_v5, %v843_v8 }
 0x16b   :  { %v839_v53 = vpop.permute.xlu1 %838  ;;  %v837_v54 = vpop.permute.xlu0 %836  ;;  %v1517_v44 = vrot.slane %v854_v22, 4  ;;  %v2617_v22 = vmov 0  }
 0x16c   :  { %v844_v14 = vsel %vm840_vm13, %v839_v53, %v833_v52  ;;  %v842_v15 = vsel %vm840_vm13, %v835_v51, %v837_v54  ;;  %v841_v23 = vsel %vm840_vm13, %v837_v54, %v839_v53  ;;  %2370 = vset.pattern.permute.xlu0 %v2617_v22  ;;  %2371 = vset.pattern.permute.xlu1 %v2617_v22  ;;  %vm1074_vm13 = vcmp.lt.s32.totalorder %v2759_v11, 94 }
 0x16d   :  { %1198 = vrot.lane.b32.xlu1 %v2697_v3, %s2612_s1  ;;  %1196 = vrot.lane.b32.xlu0 %v2995_v36, %s2612_s1  ;;  %v857_v25 = vmul.f32 %v851_v6, %v844_v14  ;;  %v855_v26 = vmul.f32 %v850_v9, %v842_v15  ;;  %v856_v38 = vmul.f32 %v847_v56, %v841_v23  ;;  %v951_v23 = vld [vmem:[#allocation2 + $0x238] sm:$0xff] }
 0x16f   :  { %v757_v57 = vpop.permute.xlu1 %756  ;;  %v755_v58 = vpop.permute.xlu0 %754  ;;  %v1520_v45 = vrot.slane %v857_v25, 4  ;;  %v1518_v46 = vrot.slane %v855_v26, 4  ;;  %v1519_v55 = vrot.slane %v856_v38, 4  ;;  %v898_v26 = vld [vmem:[#allocation2 + $0x210] sm:$0xff]  ;;  %v925_v38 = vld [vmem:[#allocation2 + $0x228] sm:$0xff] }
 0x170   :  { %v765_v39 = vsel %vm762_vm15, %v755_v58, %v757_v57 }
 0x171   :  { %1202 = vrot.lane.b32.xlu1 %v2691_v2, %s2612_s1  ;;  %1200 = vrot.lane.b32.xlu0 %v3008_v48, %s2612_s1  ;;  %v776_v51 = vmul.f32 %v768_v10, %v765_v39 }
 0x173   :  { %v761_v1 = vpop.permute.xlu1 %760  ;;  %v759_v12 = vpop.permute.xlu0 %758 }
 0x174   :  { %v766_v27 = vsel %vm762_vm15, %v761_v1, %v755_v58  ;;  %v764_v28 = vsel %vm762_vm15, %v757_v57, %v759_v12  ;;  %v763_v32 = vsel %vm762_vm15, %v759_v12, %v761_v1  ;;  %v1549_v1 = vsel %vm1396_vm3, %v776_v51, %v1505_v59 }
 0x175   :  { %1250 = vrot.lane.b32.xlu1 %v2697_v3, %s2613_s20  ;;  %1248 = vrot.lane.b32.xlu0 %v2995_v36, %s2613_s20  ;;  %v779_v41 = vmul.f32 %v773_v16, %v766_v27  ;;  %v777_v42 = vmul.f32 %v772_v17, %v764_v28  ;;  %v778_v47 = vmul.f32 %v769_v62, %v763_v32  ;;  %vm1204_vm15 = vcmp.lt.s32.totalorder %v2759_v11, 80 }
 0x176   :  { %v903_v27 = vcombine.high %v899_v21, %v899_v21  ;;  %v902_v28 = vcombine.high %v898_v26, %v898_v26 }
 0x177   :  { %v809_v29 = vpop.permute.xlu1 %808  ;;  %v807_v0 = vpop.permute.xlu0 %806  ;;  %v1550_v60 = vsel %vm1396_vm3, %v777_v42, %v1506_v37  ;;  %v1552_v61 = vsel %vm1396_vm3, %v779_v41, %v1508_v35  ;;  %v1551_v7 = vsel %vm1396_vm3, %v778_v47, %v1507_v40 }
 0x178   :  { %v817_v33 = vsel %vm814_vm0, %v807_v0, %v809_v29 }
 0x179   :  { %1254 = vrot.lane.b32.xlu1 %v2691_v2, %s2613_s20  ;;  %1252 = vrot.lane.b32.xlu0 %v3008_v48, %s2613_s20  ;;  %v828_v43 = vmul.f32 %v820_v30, %v817_v33  ;;  %v950_v30 = vld [vmem:[#allocation2 + $0x230] sm:$0xff] }
 0x17a   :  { %v954_v33 = vcombine.high %v950_v30, %v950_v30 }
 0x17b   :  { %v813_v49 = vpop.permute.xlu1 %812  ;;  %v811_v50 = vpop.permute.xlu0 %810  ;;  %v1553_v62 = vsel %vm1396_vm3, %v828_v43, %v1517_v44 }
 0x17c   :  { %v818_v52 = vsel %vm814_vm0, %v813_v49, %v807_v0  ;;  %v815_v53 = vsel %vm814_vm0, %v811_v50, %v813_v49  ;;  %v816_v54 = vsel %vm814_vm0, %v809_v29, %v811_v50  ;;  %v955_v0 = vcombine.high %v951_v23, %v951_v23 }
 0x17d   :  { %v831_v56 = vmul.f32 %v825_v24, %v818_v52  ;;  %v829_v57 = vmul.f32 %v824_v34, %v816_v54  ;;  %v830_v58 = vmul.f32 %v821_v13, %v815_v53  ;;  %1172 = vrot.lane.b32.xlu1 %v2697_v3, %s2614_s21  ;;  %1170 = vrot.lane.b32.xlu0 %v2995_v36, %s2614_s21  ;;  %v872_v34 = vld [vmem:[#allocation2 + $0x200] sm:$0xff]  ;;  %vm1256_vm0 = vcmp.lt.s32.totalorder %v2759_v11, 78 }
 0x17e   :  { %v1713_v13 = vpack.c.bf16 %v1553_v62, %v1549_v1  ;;  %v876_v42 = vcombine.high %v872_v34, %v872_v34  ;;  %v929_v50 = vcombine.high %v925_v38, %v925_v38 }
 0x17f   :  { %v3227_v63 = vpop.permute.xlu1 %886  ;;  %v3229_v4 = vpop.permute.xlu0 %884  ;;  %v1554_v5 = vsel %vm1396_vm3, %v829_v57, %v1518_v46  ;;  %v1556_v6 = vsel %vm1396_vm3, %v831_v56, %v1520_v45  ;;  %v1555_v8 = vsel %vm1396_vm3, %v830_v58, %v1519_v55  ;;  %v924_v56 = vld [vmem:[#allocation2 + $0x220] sm:$0xff] }
 0x180   :  { %v1714_v9 = vpack.c.bf16 %v1554_v5, %v1550_v60  ;;  %v1716_v10 = vpack.c.bf16 %v1556_v6, %v1552_v61  ;;  %v1715_v12 = vpack.c.bf16 %v1555_v8, %v1551_v7  ;;  %v895_v43 = vsel %vm892_vm4, %v3229_v4, %v3227_v63 }
 0x181   :  { %1176 = vrot.lane.b32.xlu1 %v2691_v2, %s2614_s21  ;;  %1174 = vrot.lane.b32.xlu0 %v3008_v48, %s2614_s21  ;;  %v906_v58 = vmul.f32 %v898_v26, %v895_v43  ;;  %v928_v61 = vcombine.high %v924_v56, %v924_v56 }
 0x182   :  { %1791 = vmatprep.subr.bf16.mxu0 %v1714_v9  ;;  %1834 = vmatprep.subr.bf16.mxu1 %v1716_v10 }
 0x183   :  { %v891_v14 = vpop.permute.xlu1 %890  ;;  %1792 = vmatpush1.bf16.msra.mxu0 %v1713_v13  ;;  %1835 = vmatpush1.bf16.msra.mxu1 %v1715_v12  ;;  %v889_v15 = vpop.permute.xlu0 %888 }
 0x184   :  { %v894_v29 = vsel %vm892_vm4, %v3227_v63, %v889_v15 }
 0x185   :  { %1224 = vrot.lane.b32.xlu1 %v2697_v3, %s2615_s22  ;;  %1222 = vrot.lane.b32.xlu0 %v2995_v36, %s2615_s22  ;;  %v907_v45 = vmul.f32 %v902_v28, %v894_v29 }
 0x187   :  { %v939_v16 = vpop.permute.xlu1 %938  ;;  %v937_v17 = vpop.permute.xlu0 %936  ;;  %v1562_v63 = vrot.slane %v907_v45, 4  ;;  %v1002_v45 = vld [vmem:[#allocation2 + $0x250] sm:$0xff] }
 0x188   :  { %v947_v32 = vsel %vm944_vm2, %v937_v17, %v939_v16 }
 0x189   :  { %1228 = vrot.lane.b32.xlu1 %v2691_v2, %s2615_s22  ;;  %1226 = vrot.lane.b32.xlu0 %v3008_v48, %s2615_s22  ;;  %v958_v47 = vmul.f32 %v950_v30, %v947_v32 }
 0x18b   :  { %v943_v19 = vpop.permute.xlu1 %942  ;;  %v941_v20 = vpop.permute.xlu0 %940  ;;  %v1573_v10 = vrot.slane %v958_v47, 4  ;;  %v1006_v47 = vcombine.high %v1002_v45, %v1002_v45 }
 0x18c   :  { %v948_v39 = vsel %vm944_vm2, %v943_v19, %v937_v17  ;;  %v946_v40 = vsel %vm944_vm2, %v939_v16, %v941_v20  ;;  %v945_v49 = vsel %vm944_vm2, %v941_v20, %v943_v19  ;;  %vm1230_vm2 = vcmp.lt.s32.totalorder %v2759_v11, 79 }
 0x18d   :  { %1276 = vrot.lane.b32.xlu1 %v2697_v3, %s2616_s25  ;;  %1274 = vrot.lane.b32.xlu0 %v2995_v36, %s2616_s25  ;;  %v873_v3 = vld [vmem:[#allocation2 + $0x208] sm:$0xff]  ;;  %v896_v36 = vsel %vm892_vm4, %v891_v14, %v3229_v4  ;;  %v961_v51 = vmul.f32 %v955_v0, %v948_v39  ;;  %v959_v52 = vmul.f32 %v954_v33, %v946_v40 }
 0x18e   :  { %v877_v41 = vcombine.high %v873_v3, %v873_v3  ;;  %v909_v44 = vmul.f32 %v903_v27, %v896_v36  ;;  %v960_v4 = vmul.f32 %v951_v23, %v945_v49  ;;  %v977_v49 = vld [vmem:[#allocation2 + $0x248] sm:$0xff] }
 0x18f   :  { %v861_v24 = vpop.permute.xlu1 %860  ;;  %v859_v25 = vpop.permute.xlu0 %858  ;;  %v1576_v1 = vrot.slane %v961_v51, 4  ;;  %v1574_v12 = vrot.slane %v959_v52, 4  ;;  %v1054_v52 = vld [vmem:[#allocation2 + $0x270] sm:$0xff] }
 0x190   :  { %v1564_v62 = vrot.slane %v909_v44, 4  ;;  %v869_v5 = vsel %vm866_vm5, %v859_v25, %v861_v24  ;;  %v1575_v20 = vrot.slane %v960_v4, 4 }
 0x191   :  { %1280 = vrot.lane.b32.xlu1 %v2691_v2, %s2616_s25  ;;  %1278 = vrot.lane.b32.xlu0 %v3008_v48, %s2616_s25  ;;  %v1740_v2 = vld [vmem:[%s3533_s3 + $0x8] sm:$0xff]  ;;  %v893_v48 = vsel %vm892_vm4, %v889_v15, %v891_v14  ;;  %v880_v16 = vmul.f32 %v872_v34, %v869_v5  ;;  %vm1282_vm4 = vcmp.lt.s32.totalorder %v2759_v11, 77 }
 0x192   :  { %v908_v46 = vmul.f32 %v899_v21, %v893_v48 }
 0x193   :  { %v865_v35 = vpop.permute.xlu1 %864  ;;  %v863_v37 = vpop.permute.xlu0 %862 }
 0x194   :  { %v870_v53 = vsel %vm866_vm5, %v865_v35, %v859_v25  ;;  %v868_v54 = vsel %vm866_vm5, %v861_v24, %v863_v37  ;;  %v867_v59 = vsel %vm866_vm5, %v863_v37, %v865_v35  ;;  %v1563_v6 = vrot.slane %v908_v46, 4 }
 0x195   :  { %1743 = vperm.xlu0 %2370, %v1739_v31   ;;  %1748 = vperm.xlu1 %2371, %v1740_v2   ;;  %v883_v7 = vmul.f32 %v877_v41, %v870_v53  ;;  %v881_v8 = vmul.f32 %v876_v42, %v868_v54  ;;  %v882_v13 = vmul.f32 %v873_v3, %v867_v59  ;;  %v1561_v24 = vrot.slane %v906_v58, 4  ;;  %v1003_v41 = vld [vmem:[#allocation2 + $0x258] sm:$0xff] }
 0x196   :  { %v1055_v42 = vld [vmem:[#allocation2 + $0x278] sm:$0xff]  ;;  %v1007_v46 = vcombine.high %v1003_v41, %v1003_v41  ;;  %vm1764_vm5 = vcmask 1041408  }
 0x197   :  { %v913_v55 = vpop.permute.xlu1 %912  ;;  %v911_v57 = vpop.permute.xlu0 %910  ;;  %v1654_v25 = vsel %vm1396_vm3, %v881_v8, %v1562_v63  ;;  %v1656_v26 = vsel %vm1396_vm3, %v883_v7, %v1564_v62  ;;  %v1655_v30 = vsel %vm1396_vm3, %v882_v13, %v1563_v6  ;;  %v1653_v48 = vsel %vm1396_vm3, %v880_v16, %v1561_v24 }
 0x198   :  { %v921_v60 = vsel %vm918_vm6, %v911_v57, %v913_v55  ;;  %v1059_v53 = vcombine.high %v1055_v42, %v1055_v42  ;;  %v981_v63 = vcombine.high %v977_v49, %v977_v49 }
 0x199   :  { %v932_v9 = vmul.f32 %v924_v56, %v921_v60  ;;  %v1058_v56 = vcombine.high %v1054_v52, %v1054_v52  ;;  %v1029_v60 = vld [vmem:[#allocation2 + $0x268] sm:$0xff] }
 0x19b   :  { %v917_v14 = vpop.permute.xlu1 %916  ;;  %v915_v15 = vpop.permute.xlu0 %914  ;;  %v1657_v27 = vsel %vm1396_vm3, %v932_v9, %v1573_v10 }
 0x19c   :  { %v922_v17 = vsel %vm918_vm6, %v917_v14, %v911_v57  ;;  %v919_v18 = vsel %vm918_vm6, %v915_v15, %v917_v14  ;;  %v920_v19 = vsel %vm918_vm6, %v913_v55, %v915_v15  ;;  %v1717_v33 = vpack.c.bf16 %v1657_v27, %v1653_v48  ;;  %v976_v57 = vld [vmem:[#allocation2 + $0x240] sm:$0xff] }
 0x19d   :  { %v935_v21 = vmul.f32 %v929_v50, %v922_v17  ;;  %v933_v22 = vmul.f32 %v928_v61, %v920_v19  ;;  %v934_v23 = vmul.f32 %v925_v38, %v919_v18  ;;  %v980_v4 = vcombine.high %v976_v57, %v976_v57  ;;  %v1028_v17 = vld [vmem:[#allocation2 + $0x260] sm:$0xff] }
 0x19e   :  { %vm1917_vm6 = vcmask 31744  }
 0x19f   :  { %v991_v28 = vpop.permute.xlu1 %990  ;;  %v989_v3 = vpop.permute.xlu0 %988  ;;  %v1658_v36 = vsel %vm1396_vm3, %v933_v22, %v1574_v12  ;;  %v1660_v29 = vsel %vm1396_vm3, %v935_v21, %v1576_v1  ;;  %v1659_v0 = vsel %vm1396_vm3, %v934_v23, %v1575_v20  ;;  %v1033_v1 = vcombine.high %v1029_v60, %v1029_v60 }
 0x1a0   :  { %v1718_v31 = vpack.c.bf16 %v1658_v36, %v1654_v25  ;;  %v1720_v2 = vpack.c.bf16 %v1660_v29, %v1656_v26  ;;  %v1719_v32 = vpack.c.bf16 %v1659_v0, %v1655_v30  ;;  %v999_v5 = vsel %vm996_vm8, %v989_v3, %v991_v28 }
 0x1a1   :  { %v1010_v19 = vmul.f32 %v1002_v45, %v999_v5  ;;  %v1032_v22 = vcombine.high %v1028_v17, %v1028_v17 }
 0x1a2   :  { %1793 = vmatprep.subr.bf16.mxu0 %v1718_v31  ;;  %1836 = vmatprep.subr.bf16.mxu1 %v1720_v2 }
 0x1a3   :  { %v995_v34 = vpop.permute.xlu1 %994  ;;  %1794 = vmatpush1.bf16.msra.mxu0 %v1717_v33  ;;  %1837 = vmatpush1.bf16.msra.mxu1 %v1719_v32  ;;  %v993_v35 = vpop.permute.xlu0 %992 }
 0x1a4   :  { %v1000_v50 = vsel %vm996_vm8, %v995_v34, %v989_v3  ;;  %v998_v51 = vsel %vm996_vm8, %v991_v28, %v993_v35  ;;  %v997_v54 = vsel %vm996_vm8, %v993_v35, %v995_v34 }
 0x1a5   :  { %v1013_v6 = vmul.f32 %v1007_v46, %v1000_v50  ;;  %v1011_v7 = vmul.f32 %v1006_v47, %v998_v51  ;;  %v1012_v8 = vmul.f32 %v1003_v41, %v997_v54  ;;  %v1585_v41 = vrot.slane %v1010_v19, 4 }
 0x1a7   :  { %v1043_v37 = vpop.permute.xlu1 %1042  ;;  %v1041_v38 = vpop.permute.xlu0 %1040  ;;  %v1588_v23 = vrot.slane %v1013_v6, 4  ;;  %v1586_v24 = vrot.slane %v1011_v7, 4  ;;  %v1587_v27 = vrot.slane %v1012_v8, 4  ;;  %v1106_v7 = vld [vmem:[#allocation2 + $0x290] sm:$0xff] }
 0x1a8   :  { %v1051_v55 = vsel %vm1048_vm7, %v1041_v38, %v1043_v37 }
 0x1a9   :  { %v1062_v9 = vmul.f32 %v1054_v52, %v1051_v55 }
 0x1ab   :  { %v1047_v39 = vpop.permute.xlu1 %1046  ;;  %v1045_v40 = vpop.permute.xlu0 %1044  ;;  %v1597_v29 = vrot.slane %v1062_v9, 4  ;;  %v1110_v9 = vcombine.high %v1106_v7, %v1106_v7 }
 0x1ac   :  { %v1052_v61 = vsel %vm1048_vm7, %v1047_v39, %v1041_v38  ;;  %v1050_v62 = vsel %vm1048_vm7, %v1043_v37, %v1045_v40  ;;  %v1049_v10 = vsel %vm1048_vm7, %v1045_v40, %v1047_v39 }
 0x1ad   :  { %v1065_v12 = vmul.f32 %v1059_v53, %v1052_v61  ;;  %v1063_v13 = vmul.f32 %v1058_v56, %v1050_v62  ;;  %v1064_v25 = vmul.f32 %v1055_v42, %v1049_v10  ;;  %v1081_v10 = vld [vmem:[#allocation2 + $0x288] sm:$0xff] }
 0x1af   :  { %v965_v43 = vpop.permute.xlu1 %964  ;;  %v963_v44 = vpop.permute.xlu0 %962  ;;  %v1600_v30 = vrot.slane %v1065_v12, 4  ;;  %v1598_v0 = vrot.slane %v1063_v13, 4  ;;  %v1599_v37 = vrot.slane %v1064_v25, 4  ;;  %v1158_v13 = vld [vmem:[#allocation2 + $0x2b0] sm:$0xff] }
 0x1b0   :  { %v973_v26 = vsel %vm970_vm9, %v963_v44, %v965_v43 }
 0x1b1   :  { %v984_v32 = vmul.f32 %v976_v57, %v973_v26 }
 0x1b3   :  { %v969_v58 = vpop.permute.xlu1 %968  ;;  %v967_v59 = vpop.permute.xlu0 %966  ;;  %v1661_v54 = vsel %vm1396_vm3, %v984_v32, %v1585_v41 }
 0x1b4   :  { %v974_v14 = vsel %vm970_vm9, %v969_v58, %v963_v44  ;;  %v972_v15 = vsel %vm970_vm9, %v965_v43, %v967_v59  ;;  %v971_v20 = vsel %vm970_vm9, %v967_v59, %v969_v58 }
 0x1b5   :  { %v987_v28 = vmul.f32 %v981_v63, %v974_v14  ;;  %v985_v3 = vmul.f32 %v980_v4, %v972_v15  ;;  %v986_v31 = vmul.f32 %v977_v49, %v971_v20  ;;  %v1107_v63 = vld [vmem:[#allocation2 + $0x298] sm:$0xff] }
 0x1b6   :  { %v1159_v4 = vld [vmem:[#allocation2 + $0x2b8] sm:$0xff]  ;;  %v1111_v8 = vcombine.high %v1107_v63, %v1107_v63 }
 0x1b7   :  { %v1017_v16 = vpop.permute.xlu1 %1016  ;;  %v1015_v18 = vpop.permute.xlu0 %1014  ;;  %v1662_v42 = vsel %vm1396_vm3, %v985_v3, %v1586_v24  ;;  %v1664_v43 = vsel %vm1396_vm3, %v987_v28, %v1588_v23  ;;  %v1663_v50 = vsel %vm1396_vm3, %v986_v31, %v1587_v27  ;;  %v1163_v14 = vcombine.high %v1159_v4, %v1159_v4 }
 0x1b8   :  { %v1025_v21 = vsel %vm1022_vm10, %v1015_v18, %v1017_v16  ;;  %v1085_v24 = vcombine.high %v1081_v10, %v1081_v10 }
 0x1b9   :  { %v1036_v36 = vmul.f32 %v1028_v17, %v1025_v21  ;;  %v1162_v17 = vcombine.high %v1158_v13, %v1158_v13  ;;  %v1133_v21 = vld [vmem:[#allocation2 + $0x2a8] sm:$0xff] }
 0x1bb   :  { %v1021_v2 = vpop.permute.xlu1 %1020  ;;  %v1019_v48 = vpop.permute.xlu0 %1018  ;;  %v1665_v44 = vsel %vm1396_vm3, %v1036_v36, %v1597_v29 }
 0x1bc   :  { %v1026_v33 = vsel %vm1022_vm10, %v1021_v2, %v1015_v18  ;;  %v1023_v34 = vsel %vm1022_vm10, %v1019_v48, %v1021_v2  ;;  %v1024_v35 = vsel %vm1022_vm10, %v1017_v16, %v1019_v48  ;;  %v1721_v56 = vpack.c.bf16 %v1665_v44, %v1661_v54  ;;  %v1080_v18 = vld [vmem:[#allocation2 + $0x280] sm:$0xff] }
 0x1bd   :  { %v1039_v38 = vmul.f32 %v1033_v1, %v1026_v33  ;;  %v1037_v39 = vmul.f32 %v1032_v22, %v1024_v35  ;;  %v1038_v40 = vmul.f32 %v1029_v60, %v1023_v34  ;;  %v1084_v25 = vcombine.high %v1080_v18, %v1080_v18  ;;  %v1132_v33 = vld [vmem:[#allocation2 + $0x2a0] sm:$0xff] }
 0x1bf   :  { %v1095_v45 = vpop.permute.xlu1 %1094  ;;  %v1093_v46 = vpop.permute.xlu0 %1092  ;;  %v1666_v47 = vsel %vm1396_vm3, %v1037_v39, %v1598_v0  ;;  %v1668_v49 = vsel %vm1396_vm3, %v1039_v38, %v1600_v30  ;;  %v1667_v51 = vsel %vm1396_vm3, %v1038_v40, %v1599_v37  ;;  %v1137_v30 = vcombine.high %v1133_v21, %v1133_v21 }
 0x1c0   :  { %v1722_v52 = vpack.c.bf16 %v1666_v47, %v1662_v42  ;;  %v1724_v53 = vpack.c.bf16 %v1668_v49, %v1664_v43  ;;  %v1723_v55 = vpack.c.bf16 %v1667_v51, %v1663_v50  ;;  %v1103_v26 = vsel %vm1100_vm12, %v1093_v46, %v1095_v45 }
 0x1c1   :  { %v1114_v35 = vmul.f32 %v1106_v7, %v1103_v26  ;;  %v1136_v39 = vcombine.high %v1132_v33, %v1132_v33 }
 0x1c2   :  { %1795 = vmatprep.subr.bf16.mxu0 %v1722_v52  ;;  %1838 = vmatprep.subr.bf16.mxu1 %v1724_v53 }
 0x1c3   :  { %v1099_v57 = vpop.permute.xlu1 %1098  ;;  %1796 = vmatpush1.bf16.msra.mxu0 %v1721_v56  ;;  %1839 = vmatpush1.bf16.msra.mxu1 %v1723_v55  ;;  %v1097_v58 = vpop.permute.xlu0 %1096 }
 0x1c4   :  { %v1104_v1 = vsel %vm1100_vm12, %v1099_v57, %v1093_v46  ;;  %v1102_v12 = vsel %vm1100_vm12, %v1095_v45, %v1097_v58  ;;  %v1101_v15 = vsel %vm1100_vm12, %v1097_v58, %v1099_v57 }
 0x1c5   :  { %v1117_v27 = vmul.f32 %v1111_v8, %v1104_v1  ;;  %v1115_v28 = vmul.f32 %v1110_v9, %v1102_v12  ;;  %v1116_v3 = vmul.f32 %v1107_v63, %v1101_v15  ;;  %v1609_v63 = vrot.slane %v1114_v35, 4 }
 0x1c7   :  { %v1147_v59 = vpop.permute.xlu1 %1146  ;;  %v1145_v60 = vpop.permute.xlu0 %1144  ;;  %v1612_v40 = vrot.slane %v1117_v27, 4  ;;  %v1610_v41 = vrot.slane %v1115_v28, 4  ;;  %v1611_v44 = vrot.slane %v1116_v3, 4  ;;  %v1210_v28 = vld [vmem:[#allocation2 + $0x2d0] sm:$0xff]  ;;  %v1185_v3 = vld [vmem:[#allocation2 + $0x2c8] sm:$0xff] }
 0x1c8   :  { %v1155_v16 = vsel %vm1152_vm11, %v1145_v60, %v1147_v59 }
 0x1c9   :  { %v1166_v36 = vmul.f32 %v1158_v13, %v1155_v16 }
 0x1cb   :  { %v1151_v61 = vpop.permute.xlu1 %1150  ;;  %v1149_v62 = vpop.permute.xlu0 %1148  ;;  %v1621_v49 = vrot.slane %v1166_v36, 4 }
 0x1cc   :  { %v1156_v22 = vsel %vm1152_vm11, %v1151_v61, %v1145_v60  ;;  %v1154_v23 = vsel %vm1152_vm11, %v1147_v59, %v1149_v62  ;;  %v1153_v29 = vsel %vm1152_vm11, %v1149_v62, %v1151_v61 }
 0x1cd   :  { %v1169_v0 = vmul.f32 %v1163_v14, %v1156_v22  ;;  %v1167_v31 = vmul.f32 %v1162_v17, %v1154_v23  ;;  %v1168_v42 = vmul.f32 %v1159_v4, %v1153_v29  ;;  %v1214_v29 = vcombine.high %v1210_v28, %v1210_v28 }
 0x1cf   :  { %v1069_v5 = vpop.permute.xlu1 %1068  ;;  %v1067_v6 = vpop.permute.xlu0 %1066  ;;  %v1624_v50 = vrot.slane %v1169_v0, 4  ;;  %v1622_v51 = vrot.slane %v1167_v31, 4  ;;  %v1623_v59 = vrot.slane %v1168_v42, 4  ;;  %v1237_v31 = vld [vmem:[#allocation2 + $0x2e8] sm:$0xff] }
 0x1d0   :  { %v1077_v43 = vsel %vm1074_vm13, %v1067_v6, %v1069_v5 }
 0x1d1   :  { %v1088_v55 = vmul.f32 %v1080_v18, %v1077_v43  ;;  %v1241_v43 = vcombine.high %v1237_v31, %v1237_v31 }
 0x1d3   :  { %v1073_v19 = vpop.permute.xlu1 %1072  ;;  %v1071_v20 = vpop.permute.xlu0 %1070  ;;  %v1669_v15 = vsel %vm1396_vm3, %v1088_v55, %v1609_v63 }
 0x1d4   :  { %v1078_v2 = vsel %vm1074_vm13, %v1073_v19, %v1067_v6  ;;  %v1076_v48 = vsel %vm1074_vm13, %v1069_v5, %v1071_v20  ;;  %v1075_v37 = vsel %vm1074_vm13, %v1071_v20, %v1073_v19 }
 0x1d5   :  { %v1091_v45 = vmul.f32 %v1085_v24, %v1078_v2  ;;  %v1089_v46 = vmul.f32 %v1084_v25, %v1076_v48  ;;  %v1090_v52 = vmul.f32 %v1081_v10, %v1075_v37  ;;  %v1211_v24 = vld [vmem:[#allocation2 + $0x2d8] sm:$0xff]  ;;  %v1184_v37 = vld [vmem:[#allocation2 + $0x2c0] sm:$0xff] }
 0x1d6   :  { %v1263_v25 = vld [vmem:[#allocation2 + $0x2f8] sm:$0xff]  ;;  %v1215_v36 = vcombine.high %v1211_v24, %v1211_v24  ;;  %v1188_v42 = vcombine.high %v1184_v37, %v1184_v37 }
 0x1d7   :  { %v1121_v32 = vpop.permute.xlu1 %1120  ;;  %v1119_v34 = vpop.permute.xlu0 %1118  ;;  %v1670_v4 = vsel %vm1396_vm3, %v1089_v46, %v1610_v41  ;;  %v1672_v5 = vsel %vm1396_vm3, %v1091_v45, %v1612_v40  ;;  %v1671_v1 = vsel %vm1396_vm3, %v1090_v52, %v1611_v44  ;;  %v1267_v0 = vcombine.high %v1263_v25, %v1263_v25 }
 0x1d8   :  { %v1129_v38 = vsel %vm1126_vm14, %v1119_v34, %v1121_v32 }
 0x1d9   :  { %v1140_v47 = vmul.f32 %v1132_v33, %v1129_v38  ;;  %v1189_v38 = vcombine.high %v1185_v3, %v1185_v3 }
 0x1db   :  { %v1125_v53 = vpop.permute.xlu1 %1124  ;;  %v1123_v54 = vpop.permute.xlu0 %1122  ;;  %v1673_v6 = vsel %vm1396_vm3, %v1140_v47, %v1621_v49  ;;  %v1236_v49 = vld [vmem:[#allocation2 + $0x2e0] sm:$0xff] }
 0x1dc   :  { %v1130_v56 = vsel %vm1126_vm14, %v1125_v53, %v1119_v34  ;;  %v1127_v57 = vsel %vm1126_vm14, %v1123_v54, %v1125_v53  ;;  %v1128_v58 = vsel %vm1126_vm14, %v1121_v32, %v1123_v54  ;;  %v1725_v17 = vpack.c.bf16 %v1673_v6, %v1669_v15 }
 0x1dd   :  { %v1143_v60 = vmul.f32 %v1137_v30, %v1130_v56  ;;  %v1141_v61 = vmul.f32 %v1136_v39, %v1128_v58  ;;  %v1142_v62 = vmul.f32 %v1133_v21, %v1127_v57  ;;  %v1262_v30 = vld [vmem:[#allocation2 + $0x2f0] sm:$0xff]  ;;  %v1240_v53 = vcombine.high %v1236_v49, %v1236_v49 }
 0x1de   :  { %v1266_v33 = vcombine.high %v1262_v30, %v1262_v30 }
 0x1df   :  { %v1199_v7 = vpop.permute.xlu1 %1198  ;;  %v1197_v8 = vpop.permute.xlu0 %1196  ;;  %v1674_v9 = vsel %vm1396_vm3, %v1141_v61, %v1622_v51  ;;  %v1676_v10 = vsel %vm1396_vm3, %v1143_v60, %v1624_v50  ;;  %v1675_v12 = vsel %vm1396_vm3, %v1142_v62, %v1623_v59 }
 0x1e0   :  { %v1726_v13 = vpack.c.bf16 %v1674_v9, %v1670_v4  ;;  %v1728_v14 = vpack.c.bf16 %v1676_v10, %v1672_v5  ;;  %v1727_v16 = vpack.c.bf16 %v1675_v12, %v1671_v1  ;;  %v1207_v2 = vsel %vm1204_vm15, %v1197_v8, %v1199_v7 }
 0x1e1   :  { %v1218_v44 = vmul.f32 %v1210_v28, %v1207_v2  ;;  %v1289_v28 = vld [vmem:[#allocation2 + $0x308] sm:$0xff] }
 0x1e2   :  { %1797 = vmatprep.subr.bf16.mxu0 %v1726_v13  ;;  %1840 = vmatprep.subr.bf16.mxu1 %v1728_v14 }
 0x1e3   :  { %v1203_v18 = vpop.permute.xlu1 %1202  ;;  %1798 = vmatpush1.bf16.msra.mxu0 %v1725_v17  ;;  %1841 = vmatpush1.bf16.msra.mxu1 %v1727_v16  ;;  %v1201_v19 = vpop.permute.xlu0 %1200  ;;  %v1633_v63 = vrot.slane %v1218_v44, 4 }
 0x1e4   :  { %v1208_v48 = vsel %vm1204_vm15, %v1203_v18, %v1197_v8  ;;  %v1206_v32 = vsel %vm1204_vm15, %v1199_v7, %v1201_v19  ;;  %v1205_v34 = vsel %vm1204_vm15, %v1201_v19, %v1203_v18 }
 0x1e5   :  { %v1221_v45 = vmul.f32 %v1215_v36, %v1208_v48  ;;  %v1219_v46 = vmul.f32 %v1214_v29, %v1206_v32  ;;  %v1220_v50 = vmul.f32 %v1211_v24, %v1205_v34 }
 0x1e7   :  { %v1251_v20 = vpop.permute.xlu1 %1250  ;;  %v1249_v21 = vpop.permute.xlu0 %1248  ;;  %v1636_v4 = vrot.slane %v1221_v45, 4  ;;  %v1634_v5 = vrot.slane %v1219_v46, 4  ;;  %v1635_v1 = vrot.slane %v1220_v50, 4 }
 0x1e8   :  { %v1259_v35 = vsel %vm1256_vm0, %v1249_v21, %v1251_v20 }
 0x1e9   :  { %v1270_v51 = vmul.f32 %v1262_v30, %v1259_v35 }
 0x1eb   :  { %v1255_v22 = vpop.permute.xlu1 %1254  ;;  %v1253_v23 = vpop.permute.xlu0 %1252  ;;  %v1645_v12 = vrot.slane %v1270_v51, 4 }
 0x1ec   :  { %v1260_v41 = vsel %vm1256_vm0, %v1255_v22, %v1249_v21  ;;  %v1258_v47 = vsel %vm1256_vm0, %v1251_v20, %v1253_v23  ;;  %v1257_v52 = vsel %vm1256_vm0, %v1253_v23, %v1255_v22 }
 0x1ed   :  { %v1273_v54 = vmul.f32 %v1267_v0, %v1260_v41  ;;  %v1271_v60 = vmul.f32 %v1266_v33, %v1258_v47  ;;  %v1272_v6 = vmul.f32 %v1263_v25, %v1257_v52  ;;  %v1288_v25 = vld [vmem:[#allocation2 + $0x300] sm:$0xff] }
 0x1ef   :  { %v1173_v26 = vpop.permute.xlu1 %1172  ;;  %v1171_v27 = vpop.permute.xlu0 %1170  ;;  %v1648_v13 = vrot.slane %v1273_v54, 4  ;;  %v1646_v17 = vrot.slane %v1271_v60, 4  ;;  %v1647_v21 = vrot.slane %v1272_v6, 4 }
 0x1f0   :  { %v1181_v55 = vsel %vm1178_vm1, %v1171_v27, %v1173_v26 }
 0x1f1   :  { %v1192_v7 = vmul.f32 %v1184_v37, %v1181_v55 }
 0x1f3   :  { %v1177_v39 = vpop.permute.xlu1 %1176  ;;  %v1175_v40 = vpop.permute.xlu0 %1174 }
 0x1f4   :  { %v1182_v56 = vsel %vm1178_vm1, %v1177_v39, %v1171_v27  ;;  %v1180_v57 = vsel %vm1178_vm1, %v1173_v26, %v1175_v40  ;;  %v1179_v61 = vsel %vm1178_vm1, %v1175_v40, %v1177_v39  ;;  %v1292_v40 = vcombine.high %v1288_v25, %v1288_v25 }
 0x1f5   :  { %v1195_v8 = vmul.f32 %v1189_v38, %v1182_v56  ;;  %v1193_v9 = vmul.f32 %v1188_v42, %v1180_v57  ;;  %v1194_v14 = vmul.f32 %v1185_v3, %v1179_v61  ;;  %v1677_v3 = vsel %vm1396_vm3, %v1192_v7, %v1633_v63  ;;  %v2470_v56 = vld [vmem:[%s3532_s2] ss:$8 sps:$4 sm:$0xff]  }
 0x1f6   :  { %v1293_v38 = vcombine.high %v1289_v28, %v1289_v28 }
 0x1f7   :  { %v1225_v58 = vpop.permute.xlu1 %1224  ;;  %v1223_v59 = vpop.permute.xlu0 %1222  ;;  %v1678_v26 = vsel %vm1396_vm3, %v1193_v9, %v1634_v5  ;;  %v1680_v27 = vsel %vm1396_vm3, %v1195_v8, %v1636_v4  ;;  %v1679_v48 = vsel %vm1396_vm3, %v1194_v14, %v1635_v1 }
 0x1f8   :  { %v1233_v62 = vsel %vm1230_vm2, %v1223_v59, %v1225_v58 }
 0x1f9   :  { %v1244_v10 = vmul.f32 %v1236_v49, %v1233_v62 }
 0x1fb   :  { %v1229_v15 = vpop.permute.xlu1 %1228  ;;  %v1227_v16 = vpop.permute.xlu0 %1226  ;;  %v1681_v36 = vsel %vm1396_vm3, %v1244_v10, %v1645_v12 }
 0x1fc   :  { %v1234_v18 = vsel %vm1230_vm2, %v1229_v15, %v1223_v59  ;;  %v1231_v19 = vsel %vm1230_vm2, %v1227_v16, %v1229_v15  ;;  %v1232_v20 = vsel %vm1230_vm2, %v1225_v58, %v1227_v16  ;;  %v1729_v39 = vpack.c.bf16 %v1681_v36, %v1677_v3 }
 0x1fd   :  { %v1247_v22 = vmul.f32 %v1241_v43, %v1234_v18  ;;  %v1245_v23 = vmul.f32 %v1240_v53, %v1232_v20  ;;  %v1246_v24 = vmul.f32 %v1237_v31, %v1231_v19 }
 0x1ff   :  { %v1277_v29 = vpop.permute.xlu1 %1276  ;;  %v1275_v30 = vpop.permute.xlu0 %1274  ;;  %v1682_v0 = vsel %vm1396_vm3, %v1245_v23, %v1646_v17  ;;  %v1684_v2 = vsel %vm1396_vm3, %v1247_v22, %v1648_v13  ;;  %v1683_v31 = vsel %vm1396_vm3, %v1246_v24, %v1647_v21 }
 0x200   :  { %v1285_v32 = vsel %vm1282_vm4, %v1275_v30, %v1277_v29  ;;  %v1730_v33 = vpack.c.bf16 %v1682_v0, %v1678_v26  ;;  %v1732_v34 = vpack.c.bf16 %v1684_v2, %v1680_v27  ;;  %v1731_v35 = vpack.c.bf16 %v1683_v31, %v1679_v48 }
 0x201   :  { %v1296_v37 = vmul.f32 %v1288_v25, %v1285_v32 }
 0x202   :  { %1799 = vmatprep.subr.bf16.mxu0 %v1730_v33  ;;  %1842 = vmatprep.subr.bf16.mxu1 %v1732_v34 }
 0x203   :  { %v1281_v41 = vpop.permute.xlu1 %1280  ;;  %1800 = vmatpush1.bf16.msra.mxu0 %v1729_v39  ;;  %1843 = vmatpush1.bf16.msra.mxu1 %v1731_v35  ;;  %v1279_v42 = vpop.permute.xlu0 %1278  ;;  %v1733_v46 = vpack.c.bf16 %v1296_v37, %v1296_v37 }
 0x204   :  { %v1286_v43 = vsel %vm1282_vm4, %v1281_v41, %v1275_v30  ;;  %v1283_v44 = vsel %vm1282_vm4, %v1279_v42, %v1281_v41  ;;  %v1284_v45 = vsel %vm1282_vm4, %v1277_v29, %v1279_v42 }
 0x205   :  { %v1299_v47 = vmul.f32 %v1293_v38, %v1286_v43  ;;  %v1297_v49 = vmul.f32 %v1292_v40, %v1284_v45  ;;  %v1298_v50 = vmul.f32 %v1289_v28, %v1283_v44  ;;  %v1766_v54 = vsel %vm1764_vm5, %v1733_v46, 0  ;;  %v1913_v44 = vld [vmem:[%s3534_s4] sm:$0xff] }
 0x207   :  { %v1736_v51 = vpack.c.bf16 %v1299_v47, %v1299_v47  ;;  %v1734_v52 = vpack.c.bf16 %v1297_v49, %v1297_v49  ;;  %v1735_v53 = vpack.c.bf16 %v1298_v50, %v1298_v50  ;;  %v1914_v50 = vld [vmem:[%s3534_s4 + $0x8] sm:$0xff]  ;;  %s2618_s4 = smov [#allocation6]  }
 0x209   :  { %2289 = vmatprep.subr.msk.bf16.mxu0 %vm1764_vm5, %v1734_v52  ;;  %2291 = vmatprep.subr.msk.bf16.mxu1 %vm1764_vm5, %v1736_v51  ;;  %v1772_v55 = vsel %vm1764_vm5, %v1735_v53, 0  ;;  %v1915_v51 = vld [vmem:[%s3535_s5] sm:$0xff] }
 0x20a   :  { %1802 = vmatpush1.bf16.msra.mxu0 %v1766_v54  ;;  %1845 = vmatpush1.bf16.msra.mxu1 %v1772_v55  ;;  %v1916_v54 = vld [vmem:[%s3535_s5 + $0x8] sm:$0xff]  ;;  %s2270_s5 = sshll.u32 %s2618_s4, 4  ;;  %s2271_s5 = int_to_ptr.vmem [resolvable:$true] %s2270_s5 }
 0x20b   :  { %s2517_s16 = scalar_lea.vmem %s2271_s5, 512  ;;  %p2522_p9 = scmp.lt.s32.totalorder %s2271_s5, %s2271_s5 }
 0x20c   :  { %p2518_p8 = scmp.ne.s32.totalorder %s2271_s5, %s2517_s16  ;;  %p2523_p10 = scmp.lt.s32.totalorder %s2517_s16, %s2517_s16 }
 0x20d   :  { %1810 = vmatmul.mubr.bf16.vlgmr.msra.gmra.mrb[0].mxu0 %v2470_v56  ;;  %1853 = vmatmul.mubr.bf16.vlgmr.msra.gmra.mrb[0].mxu1 %v2470_v56 }
 0x20e   :  { %2307 = vmatprep.mubr.msk.f32.mxu0 %vm1917_vm6, %v1913_v44  ;;  %2312 = vmatprep.mubr.msk.f32.mxu1 %vm1917_vm6, %v1913_v44  ;;  %p2524_p11 = por %p2523_p10, %p2522_p9 }
 0x210   :  { %p2525_p12 = pnand %p2524_p11, %p2518_p8 }
 0x214   :  { %v1744_v11 = vpop.permute.xlu0 %1743  ;;  %v1749_v57 = vpop.permute.xlu1 %1748 }
 0x2e0   :  { %v1811_v58 = vpop.f32.mrb[0].mxu0  ;;  %v1854_v59 = vpop.f32.mrb[0].mxu1 }
 0x2e1   :  { %v1812_v60 = vadd.f32 %v1811_v58, %v1744_v11  ;;  %v1855_v61 = vadd.f32 %v1854_v59, %v1744_v11  ;;  %v1813_v62 = vpop.f32.mrb[1].mxu0  ;;  %v1856_v63 = vpop.f32.mrb[1].mxu1 }
 0x2e2   :  { %v1814_v4 = vadd.f32 %v1813_v62, %v1744_v11  ;;  %v1857_v5 = vadd.f32 %v1856_v63, %v1744_v11  ;;  %v1815_v6 = vpop.f32.mrb[2].mxu0  ;;  %v1858_v7 = vpop.f32.mrb[2].mxu1 }
 0x2e3   :  { %v3439_v8 = vmax.f32 %v1812_v60, 0.0  ;;  %v3441_v9 = vmax.f32 %v1855_v61, 0.0  ;;  %v1816_v10 = vadd.f32 %v1815_v6, %v1749_v57  ;;  %v1859_v1 = vadd.f32 %v1858_v7, %v1749_v57  ;;  %v1817_v12 = vpop.f32.mrb[3].mxu0  ;;  %v1860_v13 = vpop.f32.mrb[3].mxu1 }
 0x2e4   :  { %v3443_v14 = vmax.f32 %v1814_v4, 0.0  ;;  %v3445_v15 = vmax.f32 %v1857_v5, 0.0  ;;  %v1818_v16 = vadd.f32 %v1817_v12, %v1749_v57  ;;  %v1861_v17 = vadd.f32 %v1860_v13, %v1749_v57 }
 0x2e5   :  { %v3447_v18 = vmax.f32 %v1816_v10, 0.0  ;;  %v1875_v19 = vrot.slane %v3439_v8, 4  ;;  %v3450_v20 = vmax.f32 %v1859_v1, 0.0  ;;  %v1877_v21 = vrot.slane %v3441_v9, 4 }
 0x2e6   :  { %v1876_v22 = vrot.slane %v3443_v14, 4  ;;  %v1878_v23 = vrot.slane %v3445_v15, 4  ;;  %v3455_v24 = vmax.f32 %v1818_v16, 0.0  ;;  %v3457_v25 = vmax.f32 %v1861_v17, 0.0 }
 0x2e7   :  { %v1883_v26 = vadd.f32 %v1875_v19, %v3439_v8  ;;  %v1885_v27 = vadd.f32 %v1877_v21, %v3441_v9  ;;  %v1895_v29 = vrot.slane %v3447_v18, 4  ;;  %v1897_v0 = vrot.slane %v3450_v20, 4 }
 0x2e8   :  { %v1884_v28 = vadd.f32 %v1876_v22, %v3443_v14  ;;  %v1886_v3 = vadd.f32 %v1878_v23, %v3445_v15  ;;  %v1896_v48 = vrot.slane %v3455_v24, 4  ;;  %v1898_v32 = vrot.slane %v3457_v25, 4 }
 0x2e9   :  { %v1887_v36 = vadd.f32 %v1883_v26, %v3447_v18  ;;  %v1889_v30 = vadd.f32 %v1885_v27, %v3450_v20 }
 0x2ea   :  { %v1888_v2 = vadd.f32 %v1884_v28, %v3455_v24  ;;  %v1890_v31 = vadd.f32 %v1886_v3, %v3457_v25 }
 0x2eb   :  { %v1905_v33 = vadd.f32 %v1897_v0, %v1889_v30  ;;  %v1903_v34 = vadd.f32 %v1895_v29, %v1887_v36 }
 0x2ec   :  { %v1906_v35 = vadd.f32 %v1898_v32, %v1890_v31  ;;  %v1904_v37 = vadd.f32 %v1896_v48, %v1888_v2 }
 0x2ed   :  { %v2046_v38 = vsel %vm1396_vm3, %v1905_v33, 0.0  ;;  %v1907_v39 = vsel %vm1396_vm3, %v1903_v34, 0.0 }
 0x2ee   :  { %v2047_v40 = vsel %vm1396_vm3, %v1906_v35, 0.0  ;;  %v1908_v41 = vsel %vm1396_vm3, %v1904_v37, 0.0 }
 0x2ef   :  { %v2048_v42 = vadd.f32 %v2047_v40, %v2046_v38  ;;  %v1909_v43 = vadd.f32 %v1908_v41, %v1907_v39 }
 0x2f1   :  { %2049 = vadd.xlane.f32.xlu0 %v2048_v42  ;;  %1910 = vadd.xlane.f32.xlu1 %v1909_v43 }
 0x37e   :  { %v2050_v45 = vpop.xlane.xlu0 %2049  ;;  %v1911_v46 = vpop.xlane.xlu1 %1910 }
 0x37f   :  { %v2051_v47 = vmul.f32 0.00390625, %v2050_v45  ;;  %v1912_v49 = vmul.f32 0.00390625, %v1911_v46 }
 0x381   :  { %2305 = vmatprep.subr.msk.mxu0 %vm1396_vm3, %v1912_v49  ;;  %2310 = vmatprep.subr.msk.mxu1 %vm1396_vm3, %v2051_v47 }
 0x382   :  { %2306 = vmatpush3.msk.msra.mxu0 %vm1396_vm3, %v1912_v49  ;;  %2311 = vmatpush3.msk.msra.mxu1 %vm1396_vm3, %v2051_v47 }
 0x383   :  { %2308 = vmatmul.mubr.msk.f32.vlgmr.msra.gmra.mrb[4].mxu0 %vm1917_vm6, %v1914_v50  ;;  %2313 = vmatmul.mubr.msk.f32.vlgmr.msra.gmra.mrb[4].mxu1 %vm1917_vm6, %v1914_v50 }
 0x456   :  { %v2309_v52 = vpop.f32.mrb[4].mxu0  ;;  %v2314_v53 = vpop.f32.mrb[4].mxu1 }
 0x457   :  { %v1993_v55 = vpop.f32.mrb[5].mxu0  ;;  %v2121_v56 = vpop.f32.mrb[5].mxu1  ;;  %v1999_v58 = vadd.f32 %v2309_v52, %v1916_v54  ;;  %v2127_v59 = vadd.f32 %v2314_v53, %v1916_v54 }
 0x458   :  { %v1994_v11 = vadd.f32 %v1993_v55, %v1915_v51  ;;  %v2122_v57 = vadd.f32 %v2121_v56, %v1915_v51 }
 0x459   :  { %v2008_v4 = vrot.slane %v1999_v58, 4  ;;  %v2136_v5 = vrot.slane %v2127_v59, 4 }
 0x45a   :  { %v2003_v60 = vrot.slane %v1994_v11, 4  ;;  %v2131_v61 = vrot.slane %v2122_v57, 4 }
 0x45c   :  { %v2005_v62 = vmax.f32 %v1994_v11, %v2003_v60  ;;  %v2133_v63 = vmax.f32 %v2122_v57, %v2131_v61 }
 0x45e   :  { %v2006_v6 = vmax.f32 %v2005_v62, %v1999_v58  ;;  %v2134_v7 = vmax.f32 %v2133_v63, %v2127_v59 }
 0x460   :  { %v2010_v10 = vmax.f32 %v2006_v6, %v2008_v4  ;;  %v2138_v1 = vmax.f32 %v2134_v7, %v2136_v5 }
 0x462   :  { %v2011_v12 = vsub.f32 %v1994_v11, %v2010_v10  ;;  %v2015_v13 = vrot.slane %v2010_v10, 4  ;;  %v2020_v16 = vsub.f32 %v1999_v58, %v2010_v10  ;;  %v2139_v17 = vsub.f32 %v2122_v57, %v2138_v1 }
 0x463   :  { %v2143_v19 = vrot.slane %v2138_v1, 4  ;;  %v2148_v21 = vsub.f32 %v2127_v59, %v2138_v1 }
 0x464   :  { %v2012_v22 = vmul.f32 1.442695, %v2011_v12  ;;  %v2017_v23 = vsub.f32 %v1994_v11, %v2015_v13  ;;  %v2023_v26 = vsub.f32 %v1999_v58, %v2015_v13  ;;  %v2021_v27 = vmul.f32 1.442695, %v2020_v16 }
 0x465   :  { %v2145_v28 = vsub.f32 %v2122_v57, %v2143_v19  ;;  %v2151_v3 = vsub.f32 %v2127_v59, %v2143_v19  ;;  %v2140_v0 = vmul.f32 1.442695, %v2139_v17  ;;  %v2149_v48 = vmul.f32 1.442695, %v2148_v21 }
 0x466   :  { %v2018_v36 = vmul.f32 1.442695, %v2017_v23  ;;  %v2024_v29 = vmul.f32 1.442695, %v2023_v26  ;;  %2473 = vpow2.f32 %v2012_v22 }
 0x467   :  { %v2146_v30 = vmul.f32 1.442695, %v2145_v28  ;;  %v2152_v2 = vmul.f32 1.442695, %v2151_v3 }
 0x468   :  { %2475 = vpow2.f32 %v2018_v36 }
 0x469   :  { %2477 = vpow2.f32 %v2021_v27 }
 0x46a   :  { %2479 = vpow2.f32 %v2024_v29 }
 0x46b   :  { %2481 = vpow2.f32 %v2146_v30 }
 0x46c   :  { %2483 = vpow2.f32 %v2140_v0 }
 0x46d   :  { %2485 = vpow2.f32 %v2152_v2 }
 0x46e   :  { %2487 = vpow2.f32 %v2149_v48 }
 0x470   :  { %v2474_v31 = vpop.eup %2473 }
 0x472   :  { %v2476_v32 = vpop.eup %2475 }
 0x473   :  { %v2478_v33 = vpop.eup %2477  ;;  %v2027_v34 = vrot.slane %v2476_v32, 4 }
 0x474   :  { %v2480_v35 = vpop.eup %2479 }
 0x475   :  { %v2482_v37 = vpop.eup %2481  ;;  %v2029_v38 = vadd.f32 %v2474_v31, %v2027_v34  ;;  %v2032_v43 = vrot.slane %v2480_v35, 4 }
 0x476   :  { %v2484_v39 = vpop.eup %2483  ;;  %v2155_v40 = vrot.slane %v2482_v37, 4 }
 0x477   :  { %v2486_v41 = vpop.eup %2485  ;;  %v2030_v42 = vadd.f32 %v2478_v33, %v2029_v38 }
 0x478   :  { %v2157_v44 = vadd.f32 %v2484_v39, %v2155_v40  ;;  %v2488_v45 = vpop.eup %2487  ;;  %v2160_v49 = vrot.slane %v2486_v41, 4 }
 0x479   :  { %v2034_v46 = vadd.f32 %v2032_v43, %v2030_v42 }
 0x47a   :  { %v2158_v47 = vadd.f32 %v2488_v45, %v2157_v44 }
 0x47b   :  { %2489 = vrcp.f32 %v2034_v46 }
 0x47c   :  { %v2162_v50 = vadd.f32 %v2160_v49, %v2158_v47 }
 0x47e   :  { %2491 = vrcp.f32 %v2162_v50 }
 0x485   :  { %v2490_v51 = vpop.eup %2489 }
 0x486   :  { %v2037_v52 = vmul.f32 %v2490_v51, %v2474_v31  ;;  %v2039_v53 = vrot.slane %v2490_v51, 4  ;;  %v2042_v54 = vmul.f32 %v2490_v51, %v2478_v33 }
 0x488   :  { %v2492_v55 = vpop.eup %2491  ;;  %v2041_v56 = vmul.f32 %v2476_v32, %v2039_v53  ;;  %v2043_v11 = vmul.f32 %v2480_v35, %v2039_v53 }
 0x489   :  { %v2165_v57 = vmul.f32 %v2492_v55, %v2484_v39  ;;  %v2167_v58 = vrot.slane %v2492_v55, 4  ;;  %v2170_v59 = vmul.f32 %v2492_v55, %v2488_v45 }
 0x48a   :  { %v2044_v60 = vsel %vm1396_vm3, %v2037_v52, %v2041_v56  ;;  %v2045_v61 = vsel %vm1396_vm3, %v2042_v54, %v2043_v11 }
 0x48b   :  { %v2169_v62 = vmul.f32 %v2482_v37, %v2167_v58  ;;  %2176 = vperm.xlu0 %2370, %v2044_v60   ;;  %v2171_v63 = vmul.f32 %v2486_v41, %v2167_v58 }
 0x48d   :  { %v2172_v4 = vsel %vm1396_vm3, %v2165_v57, %v2169_v62  ;;  %v2173_v5 = vsel %vm1396_vm3, %v2170_v59, %v2171_v63 }
 0x48e   :  { %2186 = vperm.xlu1 %2371, %v2172_v4  }
 0x48f   :  { %2191 = vperm.xlu0 %2370, %v2173_v5  }
 0x492   :  { %2181 = vperm.xlu1 %2371, %v2045_v61  }
 0x50a   :  { %v2177_v6 = vpop.permute.xlu0 %2176 }
 0x50b   :  { %v2194_v7 = vmul.f32 %v2177_v6, %v3439_v8  ;;  %v2195_v10 = vmul.f32 %v2177_v6, %v3443_v14  ;;  %2249 = vst [vmem:[#allocation6] sm:$0xff] %v2177_v6 }
 0x50d   :  { %v2202_v1 = vrot.slane %v2194_v7, 4  ;;  %v2203_v12 = vrot.slane %v2195_v10, 4  ;;  %v2187_v13 = vpop.permute.xlu1 %2186 }
 0x50e   :  { %v2196_v16 = vmul.f32 %v2187_v13, %v3441_v9  ;;  %v2197_v17 = vmul.f32 %v2187_v13, %v3445_v15  ;;  %2250 = vst [vmem:[#allocation6 + $0x8] sm:$0xff] %v2187_v13  ;;  %v2192_v19 = vpop.permute.xlu0 %2191 }
 0x50f   :  { %v2216_v21 = vmul.f32 %v2192_v19, %v3450_v20  ;;  %v2217_v22 = vmul.f32 %v2192_v19, %v3457_v25  ;;  %2252 = vst [vmem:[#allocation6 + $0x18] sm:$0xff] %v2192_v19  ;;  %v2210_v8 = vadd.f32 %v2202_v1, %v2194_v7  ;;  %v2211_v23 = vadd.f32 %v2203_v12, %v2195_v10 }
 0x510   :  { %v2204_v14 = vrot.slane %v2196_v16, 4  ;;  %v2205_v26 = vrot.slane %v2197_v17, 4 }
 0x511   :  { %v2228_v27 = vrot.slane %v2216_v21, 4  ;;  %v2229_v28 = vrot.slane %v2217_v22, 4  ;;  %v2182_v3 = vpop.permute.xlu1 %2181 }
 0x512   :  { %v2212_v36 = vadd.f32 %v2204_v14, %v2196_v16  ;;  %v2213_v29 = vadd.f32 %v2205_v26, %v2197_v17  ;;  %v2214_v9 = vmul.f32 %v2182_v3, %v3447_v18  ;;  %v2215_v15 = vmul.f32 %v2182_v3, %v3455_v24  ;;  %2251 = vst [vmem:[#allocation6 + $0x10] sm:$0xff] %v2182_v3 }
 0x513   :  { %2528 = shalt.err (!%p2525_p12)
}
 0x514   :  { %s2529_s19 = scalar_lea.hbm %s3537_s7, 512 }
 0x515   :  { %p2530_p13 = scmp.ne.s32.totalorder %s3537_s7, %s2529_s19  ;;  %p2533_p0 = scmp.lt.u32.totalorder %s2529_s19, %s3537_s7 }
 0x517   :  { %p2535_p1 = pnand %p2533_p0, %p2530_p13 }
 0x519   :  { %2538 = shalt.err (!%p2535_p1)
}
 0x51a   :  { %2276 = dma.vmem_to_hbm [thread:$0]  %s2271_s5, 512, %s3537_s7, [#allocation7], %s2568_s11, %s2568_s11, %s2569_s12   ;;  %v2220_v18 = vadd.f32 %v2216_v21, %v2212_v36  ;;  %v2221_v20 = vadd.f32 %v2217_v22, %v2213_v29  ;;  %v2218_v24 = vadd.f32 %v2214_v9, %v2210_v8  ;;  %v2219_v25 = vadd.f32 %v2215_v15, %v2211_v23 }
 0x51b   :  { %v2226_v30 = vrot.slane %v2214_v9, 4  ;;  %v2227_v0 = vrot.slane %v2215_v15, 4  ;;  %s2619_s25 = smov [#allocation5]  }
 0x51c   :  { %v2236_v2 = vadd.f32 %v2228_v27, %v2220_v18  ;;  %v2237_v48 = vadd.f32 %v2229_v28, %v2221_v20  ;;  %s2258_s26 = sshll.u32 %s2619_s25, 4  ;;  %s2259_s26 = int_to_ptr.vmem [resolvable:$true] %s2258_s26 }
 0x51d   :  { %v2234_v31 = vadd.f32 %v2226_v30, %v2218_v24  ;;  %v2235_v32 = vadd.f32 %v2227_v0, %v2219_v25  ;;  %s2539_s27 = scalar_lea.vmem %s2259_s26, 256  ;;  %p2544_p3 = scmp.lt.s32.totalorder %s2259_s26, %s2259_s26 }
 0x51e   :  { %v2245_v33 = vcombine.low %v2236_v2, %v2237_v48  ;;  %p2540_p2 = scmp.ne.s32.totalorder %s2259_s26, %s2539_s27  ;;  %p2545_p4 = scmp.lt.s32.totalorder %s2539_s27, %s2539_s27 }
 0x51f   :  { %v2240_v34 = vcombine.low %v2234_v31, %v2235_v32 }
 0x520   :  { %2248 = vst [vmem:[#allocation5 + $0x8] sm:$0xff] %v2245_v33  ;;  %p2546_p5 = por %p2545_p4, %p2544_p3 }
 0x521   :  { %2242 = vst [vmem:[#allocation5] sm:$0xff] %v2240_v34 }
 0x522   :  { %p2547_p6 = pnand %p2546_p5, %p2540_p2 }
 0x524   :  { %2550 = shalt.err (!%p2547_p6)
}
 0x525   :  { %s2551_s12 = scalar_lea.hbm %s3536_s6, 256 }
 0x526   :  { %p2552_p7 = scmp.ne.s32.totalorder %s3536_s6, %s2551_s12  ;;  %p2555_p8 = scmp.lt.u32.totalorder %s2551_s12, %s3536_s6 }
 0x528   :  { %p2557_p9 = pnand %p2555_p8, %p2552_p7 }
 0x52a   :  { %2560 = shalt.err (!%p2557_p9)
}
 0x52b   :  { %s2620_s2 = smov 128   ;;  %s2621_s0 = smov 8  }
 0x52c   :  { %2264 = dma.vmem_to_hbm [thread:$0]  %s2259_s26, 256, %s3536_s6, [#allocation4], %s2620_s2, %s2620_s2, %s2621_s0  }
 0x52d   :  { %2563 = dma.done.wait [#allocation4], 256  }
 0x52e   :  { %2564 = vsyncadd [#allocation4], 4294967040 }
 0x52f   :  { %2565 = dma.done.wait [#allocation7], 512  }
 0x530   :  { %2566 = vsyncadd [#allocation7], 4294966784 }
 0x531   :  { %2283 = vsyncpa [#allocation3], 1 }
 0x532   :  { %2284 = vsyncpa [#allocation4], 1 }
 0x533   :  { %2285 = vsyncpa [#allocation7], 1 }

</bundles_post_ra>
